<compile_context>
chip_gen: v6e
topology: v6e:2x2x1
jax: 0.10.0
libtpu: 0.0.40
codegen_flags: <defaults>
</compile_context>

<pallas_src>
import math

import numpy as np
import jax
import jax.numpy as jnp
from jax.experimental import pallas as pl
from jax.experimental.pallas import tpu as pltpu

# Small, module-consistent configuration (embed_dim divisible by num_heads).
EMBED_DIM = 32
NUM_HEADS = 4
NUM_LEVELS = 2
NUM_POINTS = 2
SPATIAL_SHAPES = ((8, 8), (4, 4))   # [(H_0, W_0), (H_1, W_1)]


def init_params(key, embed_dim, num_heads, num_levels, num_points):
    """Deterministic re-implementation of MSDeformableAttention._reset_parameters.

    Weights are stored as [in, out] (so forward is x @ W + b)."""
    total = num_heads * num_levels * num_points
    k1, k2 = jax.random.split(key)

    def xavier_uniform(k, fan_in, fan_out):
        bound = math.sqrt(6.0 / (fan_in + fan_out))
        return jax.random.uniform(k, (fan_in, fan_out), jnp.float32, -bound, bound)

    # sampling_offsets: weight = 0, bias = directional grid init
    thetas = jnp.arange(num_heads, dtype=jnp.float32) * (2.0 * math.pi / num_heads)
    grid_init = jnp.stack([jnp.cos(thetas), jnp.sin(thetas)], axis=-1)            # [H, 2]
    grid_init = grid_init / jnp.max(jnp.abs(grid_init), axis=-1, keepdims=True)
    grid_init = jnp.tile(grid_init.reshape(num_heads, 1, 1, 2),
                         (1, num_levels, num_points, 1))                          # [H, L, P, 2]
    scaling = jnp.arange(1, num_points + 1, dtype=jnp.float32).reshape(1, 1, -1, 1)
    grid_init = grid_init * scaling

    return dict(
        Wo=jnp.zeros((embed_dim, total * 2), jnp.float32),
        bo=grid_init.reshape(-1),
        Wa=jnp.zeros((embed_dim, total), jnp.float32),
        ba=jnp.zeros((total,), jnp.float32),
        Wv=xavier_uniform(k1, embed_dim, embed_dim),
        bv=jnp.zeros((embed_dim,), jnp.float32),
        Wout=xavier_uniform(k2, embed_dim, embed_dim),
        bout=jnp.zeros((embed_dim,), jnp.float32),
    )


def _make_kernel(spatial_shapes, num_heads, num_levels, num_points, head_dim, bs, len_q, len_v):
    H_, L_, P_ = num_heads, num_levels, num_points
    LP = L_ * P_
    HLP = H_ * LP
    C = H_ * head_dim
    R = bs * len_q          # batch folded into rows (toy shapes): grid=(1,), M = bs*Len_q
    Lv = len_v

    def kernel(xin_ref, vin_ref, wh_ref, wv_ref, wall_ref, ball_ref, wout_ref, bout_ref, out_ref):
        xin = xin_ref[...]          # [R, C + 2*HLP]   (query | ref_x*W_l | ref_y*H_l per column)
        vin = vin_ref[...]          # [bs*Lv, C + 8]   (value*mask | mask | zero pad)
        wh = wh_ref[...]            # [1, 2*HLP]       (W_l | H_l per (h,l,p) column)
        wl = wh[:, :HLP]
        hl = wh[:, HLP:]

        # ---- masked value projection: one augmented matmul. The mask column times the bias row
        # reproduces mask * (value @ Wv + bv) exactly; no mask multiply / bias add in the kernel.
        val = jnp.dot(vin, wv_ref[...], preferred_element_type=jnp.float32)        # [bs*Lv, C]
        val_b16 = val.astype(jnp.bfloat16)     # bf16 operand for the sampling MXU matmuls

        # ---- one fused query-side projection: [ix | iy | attention logits]. The pre-scaled
        # reference points ride along identity rows of wall (the rp+offset add runs on the MXU);
        # grid_sample's -0.5 pixel-center shift is folded into the bias.
        proj = jnp.dot(xin, wall_ref[...], preferred_element_type=jnp.float32) + ball_ref[...]
        ix = proj[:, :HLP]                     # [R, HLP] grid_sample pixel coords (x)
        iy = proj[:, HLP:2 * HLP]              # [R, HLP] grid_sample pixel coords (y)
        logits = proj[:, 2 * HLP:]             # [R, HLP]

        # ---- per-head softmax with a PER-HEAD max (denominator >= 1, so the approx reciprocal
        # on the EUP can never see 0 / produce NaN even with trained weights).
        aw_parts = []
        for h in range(H_):
            lg = logits[:, h * LP:(h + 1) * LP]                                    # [R, LP]
            e = jnp.exp(lg - jnp.max(lg, axis=-1, keepdims=True))
            aw_parts.append(e * pl.reciprocal(jnp.sum(e, axis=-1, keepdims=True), approx=True))
        aw = jnp.concatenate(aw_parts, axis=-1)                                    # [R, HLP]

        # ---- bilinear corner weights and within-level flat indices, [R, HLP] lane-wide, all f32.
        # Bounds masks are folded into the WEIGHTS (kept f32 so zeros stay exactly zero before the
        # bf16 cast); aliased out-of-bounds flat indices therefore contribute nothing.
        x0 = jnp.floor(ix)
        y0 = jnp.floor(iy)
        fx = ix - x0
        fy = iy - y0
        inx0 = ((x0 >= 0.0) & (x0 < wl)).astype(jnp.float32)
        inx1 = ((x0 >= -1.0) & (x0 < wl - 1.0)).astype(jnp.float32)
        iny0 = ((y0 >= 0.0) & (y0 < hl)).astype(jnp.float32)
        iny1 = ((y0 >= -1.0) & (y0 < hl - 1.0)).astype(jnp.float32)
        w00 = (1.0 - fy) * (1.0 - fx) * iny0 * inx0 * aw
        w01 = (1.0 - fy) * fx * iny0 * inx1 * aw
        w10 = fy * (1.0 - fx) * iny1 * inx0 * aw
        w11 = fy * fx * iny1 * inx1 * aw
        i00 = y0 * wl + x0                     # flat index inside the column's own level
        corners = ((i00, w00), (i00 + 1.0, w01), (i00 + wl, w10), (i00 + wl + 1.0, w11))

        # Per-level lane iotas (float holding exact small ints), built once, reused by every head.
        iotas = [jax.lax.broadcasted_iota(jnp.int32, (1, hw[0] * hw[1]), 1).astype(jnp.float32)
                 for hw in spatial_shapes]

        # ---- comb built per head AND per level: each (h,l,p,corner) column is compared only
        # against its own level's HW_l lanes and accumulated in place (no 3-D one-hot, no reduce).
        # TODO(synk): the pltpu.roll-derived corners (XLU) are still skipped; the explicit compares
        # already run per level and correctly handle the x0==-1 / y0==-1 border case.
        combs = []
        for h in range(H_):
            lvl_blocks = []
            for l in range(L_):
                HWl = spatial_shapes[l][0] * spatial_shapes[l][1]
                blk = jnp.zeros((R, HWl), jnp.float32)
                for p in range(P_):
                    c = h * LP + l * P_ + p
                    for (idx, w) in corners:
                        blk = blk + jnp.where(idx[:, c:c + 1] == iotas[l], w[:, c:c + 1], 0.0)
                lvl_blocks.append(blk)
            combs.append(jnp.concatenate(lvl_blocks, axis=-1).astype(jnp.bfloat16))   # [R, Lv]

        # ---- sampling matmuls: per (batch, head), comb rows of that batch against that batch's
        # per-head value columns. bf16 operands, f32 accumulation on the MXU. No block-diagonal
        # value buffer, no zero FLOPs.
        batch_rows = []
        for b in range(bs):
            parts = []
            for h in range(H_):
                cb = combs[h][b * len_q:(b + 1) * len_q]                               # [Lq, Lv]
                vb = val_b16[b * Lv:(b + 1) * Lv, h * head_dim:(h + 1) * head_dim]     # [Lv, hd]
                parts.append(jnp.dot(cb, vb, preferred_element_type=jnp.float32))
            batch_rows.append(jnp.concatenate(parts, axis=-1))                         # [Lq, C]
        sampled = jnp.concatenate(batch_rows, axis=0)                                  # [R, C]

        # ---- output projection; single [R, C] store.
        out = jnp.dot(sampled, wout_ref[...], preferred_element_type=jnp.float32) + bout_ref[...]
        out_ref[...] = out.astype(out_ref.dtype)

    return kernel


def ms_deformable_attention(query, reference_points, value, spatial_shapes, value_mask, params,
                            num_heads=NUM_HEADS, num_levels=NUM_LEVELS, num_points=NUM_POINTS):
    bs, Lq, C = query.shape
    Lv = value.shape[1]
    H_, L_, P_ = num_heads, num_levels, num_points
    LP = L_ * P_
    HLP = H_ * LP
    hd = C // H_
    R = bs * Lq

    # Static per-(h, l, p) column metadata (column order: head-major, then level, then point).
    lvl_of_col = np.array([(c % LP) // P_ for c in range(HLP)], np.int32)
    w_of_col = np.array([spatial_shapes[l][1] for l in lvl_of_col], np.float32)
    h_of_col = np.array([spatial_shapes[l][0] for l in lvl_of_col], np.float32)

    # Reference points expanded per sampling column, pre-scaled to pixel units, and concatenated
    # with the query into a single lane-dense kernel input (one DMA stream instead of three).
    rpx = reference_points[..., 0][:, :, lvl_of_col] * w_of_col            # [bs, Lq, HLP]
    rpy = reference_points[..., 1][:, :, lvl_of_col] * h_of_col
    xin = jnp.concatenate([query, rpx, rpy], axis=-1).reshape(R, C + 2 * HLP)

    # Padding mask folded into the value tensor: rows pre-zeroed, mask kept as one augmented column
    # (plus zero padding to an 8-multiple width) so the kernel's single matmul reproduces
    # mask * (value @ Wv + bv). The narrow [*, Lv, 1] mask stream disappears from the kernel.
    maskf = value_mask.astype(query.dtype)[..., None]                      # [bs, Lv, 1]
    padz = jnp.zeros((bs, Lv, 7), query.dtype)
    vin = jnp.concatenate([value * maskf, maskf, padz], axis=-1).reshape(bs * Lv, C + 8)
    Wv_ext = jnp.concatenate([params["Wv"], params["bv"][None, :],
                              jnp.zeros((7, C), jnp.float32)], axis=0)     # [C+8, C]

    # Fused query-side projection [query | rpx | rpy] -> [ix | iy | logits]: identity rows add the
    # pre-scaled reference points; grid_sample's -0.5 lives in the offset biases.
    Wox, Woy = params["Wo"][:, 0::2], params["Wo"][:, 1::2]
    box, boy = params["bo"][0::2], params["bo"][1::2]
    eye = jnp.eye(HLP, dtype=jnp.float32)
    zer = jnp.zeros((HLP, HLP), jnp.float32)
    W_ext = jnp.concatenate([
        jnp.concatenate([Wox, Woy, params["Wa"]], axis=1),
        jnp.concatenate([eye, zer, zer], axis=1),
        jnp.concatenate([zer, eye, zer], axis=1)], axis=0)                 # [C+2*HLP, 3*HLP]
    b_all = jnp.concatenate([box - 0.5, boy - 0.5, params["ba"]])[None, :]  # [1, 3*HLP]

    wh_row = jnp.asarray(np.concatenate([w_of_col, h_of_col])[None, :])    # [1, 2*HLP]
    bout = params["bout"][None, :]

    kernel = _make_kernel(tuple(spatial_shapes), H_, L_, P_, hd, bs, Lq, Lv)

    def full2d(shape):
        return pl.BlockSpec(shape, lambda i: (0, 0))

    grid_spec = pltpu.PrefetchScalarGridSpec(
        num_scalar_prefetch=0,
        grid=(1,),    # toy shapes: whole problem in one step (batch folded into rows, M = bs*Lq)
        in_specs=[
            full2d((R, C + 2 * HLP)),        # query | rpx | rpy
            full2d((bs * Lv, C + 8)),        # masked value | mask | pad
            full2d((1, 2 * HLP)),            # per-column W_l | H_l constants
            full2d((C + 8, C)),              # value_proj (bias via mask column)
            full2d((C + 2 * HLP, 3 * HLP)),  # fused offsets_x | offsets_y | attn (+ rp identity)
            full2d((1, 3 * HLP)),
            full2d((C, C)),                  # output_proj
            full2d((1, C)),
        ],
        out_specs=full2d((R, C)),
    )

    # TODO(synk): at real RT-DETR shapes (Lq~300, C=256, HW_l up to 6400) tile Lq to 128 (v5e) /
    # 256 (v6e, v7x) rows per step as the many-step "parallel" grid axis, add an "arbitrary" level
    # axis with a pl.when-initialized [Lq_tile, C] accumulator, and set
    # pltpu.CompilerParams(vmem_limit_bytes=...) sized generation-aware (v7x has only 64 MiB VMEM).
    out = pl.pallas_call(
        kernel,
        out_shape=jax.ShapeDtypeStruct((R, C), query.dtype),
        grid_spec=grid_spec,
        compiler_params=pltpu.CompilerParams(dimension_semantics=("arbitrary",)),
    )(xin, vin, wh_row, Wv_ext, W_ext, b_all, params["Wout"], bout)
    return out.reshape(bs, Lq, C)


def reference_forward(query, reference_points, value, spatial_shapes, value_mask, params,
                      num_heads=NUM_HEADS, num_levels=NUM_LEVELS, num_points=NUM_POINTS):
    """Pure-JAX reference of the PyTorch forward (for numerical verification)."""
    bs, Lq, C = query.shape
    Lv = value.shape[1]
    H_, L_, P_ = num_heads, num_levels, num_points
    hd = C // H_

    val = value @ params["Wv"] + params["bv"]
    val = val * value_mask.astype(val.dtype)[..., None]
    val = val.reshape(bs, Lv, H_, hd)

    soff = (query @ params["Wo"] + params["bo"]).reshape(bs, Lq, H_, L_, P_, 2)
    aw = (query @ params["Wa"] + params["ba"]).reshape(bs, Lq, H_, L_ * P_)
    aw = jax.nn.softmax(aw, axis=-1).reshape(bs, Lq, H_, L_, P_)

    norm = jnp.array([[w, h] for (h, w) in spatial_shapes], jnp.float32)   # flipped (W, H)
    loc = reference_points[:, :, None, :, None, :] + soff / norm[None, None, None, :, None, :]

    out = jnp.zeros((bs, Lq, H_, hd), jnp.float32)
    start = 0
    for l, (Hl, Wl) in enumerate(spatial_shapes):
        HWl = Hl * Wl
        vl = val[:, start:start + HWl]                 # [bs, HWl, H, hd]
        start += HWl
        ix = loc[:, :, :, l, :, 0] * Wl - 0.5          # [bs, Lq, H, P]
        iy = loc[:, :, :, l, :, 1] * Hl - 0.5
        x0 = jnp.floor(ix)
        y0 = jnp.floor(iy)
        wx1 = ix - x0
        wx0 = 1.0 - wx1
        wy1 = iy - y0
        wy0 = 1.0 - wy1
        lanes = jnp.arange(HWl)

        def corner(yc, xc, w):
            m = ((xc >= 0) & (xc < Wl) & (yc >= 0) & (yc < Hl)).astype(jnp.float32)
            idx = (yc * Wl + xc).astype(jnp.int32)
            oh = (idx[..., None] == lanes).astype(jnp.float32)
            return oh * (w * m)[..., None]

        bw = (corner(y0, x0, wy0 * wx0) + corner(y0, x0 + 1, wy0 * wx1)
              + corner(y0 + 1, x0, wy1 * wx0) + corner(y0 + 1, x0 + 1, wy1 * wx1))
        comb = jnp.einsum("bqhps,bqhp->bqhs", bw, aw[:, :, :, l, :])
        out = out + jnp.einsum("bqhs,bshd->bqhd", comb, vl)

    return out.reshape(bs, Lq, C) @ params["Wout"] + params["bout"]


if __name__ == "__main__":
    key = jax.random.PRNGKey(0)
    k0, k1, k2, k3 = jax.random.split(key, 4)

    bs, Lq = 2, 8
    Lv = sum(h * w for h, w in SPATIAL_SHAPES)

    query = jax.random.normal(k0, (bs, Lq, EMBED_DIM), jnp.float32)
    value = jax.random.normal(k1, (bs, Lv, EMBED_DIM), jnp.float32)
    reference_points = jax.random.uniform(k2, (bs, Lq, NUM_LEVELS, 2), jnp.float32)
    value_mask = jnp.ones((bs, Lv), dtype=bool).at[1, -5:].set(False)

    params = init_params(k3, EMBED_DIM, NUM_HEADS, NUM_LEVELS, NUM_POINTS)

    out = ms_deformable_attention(query, reference_points, value, SPATIAL_SHAPES,
                                  value_mask, params)
    out = jax.block_until_ready(out)

    assert out.shape == (bs, Lq, EMBED_DIM)
    assert bool(jnp.all(jnp.isfinite(out)))

    ref = reference_forward(query, reference_points, value, SPATIAL_SHAPES, value_mask, params)
    err = float(jnp.max(jnp.abs(out - ref)))
    assert err < 1e-2, f"kernel vs reference mismatch: {err}"

    print("KERNEL_OK")
</pallas_src>

<mosaic_0001>
module attributes {stable_mosaic.version = 11 : i64} {
  func.func @kernel(%arg0: i32, %arg1: memref<16x64xf32, #tpu.memory_space<vmem>>, %arg2: memref<160x40xf32, #tpu.memory_space<vmem>>, %arg3: memref<1x32xf32, #tpu.memory_space<vmem>>, %arg4: memref<40x32xf32, #tpu.memory_space<vmem>>, %arg5: memref<64x48xf32, #tpu.memory_space<vmem>>, %arg6: memref<1x48xf32, #tpu.memory_space<vmem>>, %arg7: memref<32x32xf32, #tpu.memory_space<vmem>>, %arg8: memref<1x32xf32, #tpu.memory_space<vmem>>, %arg9: memref<16x32xf32, #tpu.memory_space<vmem>>) attributes {dimension_semantics = [#tpu.dimension_semantics<arbitrary>], iteration_bounds = array<i64: 1>, scalar_prefetch = 0 : i64, scratch_operands = 0 : i64, tpu.core_type = #tpu.core_type<tc>, window_params = [{pipeline_mode = #tpu.pipeline_mode<synchronous>, transform_indices = @transform_0, window_bounds = array<i64: 16, 64>}, {pipeline_mode = #tpu.pipeline_mode<synchronous>, transform_indices = @transform_1, window_bounds = array<i64: 160, 40>}, {pipeline_mode = #tpu.pipeline_mode<synchronous>, transform_indices = @transform_2, window_bounds = array<i64: 1, 32>}, {pipeline_mode = #tpu.pipeline_mode<synchronous>, transform_indices = @transform_3, window_bounds = array<i64: 40, 32>}, {pipeline_mode = #tpu.pipeline_mode<synchronous>, transform_indices = @transform_4, window_bounds = array<i64: 64, 48>}, {pipeline_mode = #tpu.pipeline_mode<synchronous>, transform_indices = @transform_5, window_bounds = array<i64: 1, 48>}, {pipeline_mode = #tpu.pipeline_mode<synchronous>, transform_indices = @transform_6, window_bounds = array<i64: 32, 32>}, {pipeline_mode = #tpu.pipeline_mode<synchronous>, transform_indices = @transform_7, window_bounds = array<i64: 1, 32>}, {pipeline_mode = #tpu.pipeline_mode<synchronous>, transform_indices = @transform_8, window_bounds = array<i64: 16, 32>}]} {
    %c0 = arith.constant 0 : index
    %c0_0 = arith.constant 0 : index
    %0 = vector.load %arg1[%c0, %c0_0] : memref<16x64xf32, #tpu.memory_space<vmem>>, vector<16x64xf32>
    %c0_1 = arith.constant 0 : index
    %c0_2 = arith.constant 0 : index
    %1 = vector.load %arg2[%c0_1, %c0_2] : memref<160x40xf32, #tpu.memory_space<vmem>>, vector<160x40xf32>
    %c0_3 = arith.constant 0 : index
    %c0_4 = arith.constant 0 : index
    %2 = vector.load %arg3[%c0_3, %c0_4] : memref<1x32xf32, #tpu.memory_space<vmem>>, vector<1x32xf32>
    %3 = vector.extract_strided_slice %2 {offsets = [0, 0], sizes = [1, 16], strides = [1, 1]} : vector<1x32xf32> to vector<1x16xf32>
    %4 = vector.extract_strided_slice %2 {offsets = [0, 16], sizes = [1, 16], strides = [1, 1]} : vector<1x32xf32> to vector<1x16xf32>
    %c0_5 = arith.constant 0 : index
    %c0_6 = arith.constant 0 : index
    %5 = vector.load %arg4[%c0_5, %c0_6] : memref<40x32xf32, #tpu.memory_space<vmem>>, vector<40x32xf32>
    %cst = arith.constant dense<0.000000e+00> : vector<160x32xf32>
    %6 = tpu.matmul %1, %5, %cst {dimension_numbers = #tpu.dot_dimension_numbers<[1], [0], [0], [1], [0, 0, 1, 1], [], []>} : vector<160x40xf32>, vector<40x32xf32>, vector<160x32xf32> -> vector<160x32xf32>
    %7 = arith.truncf %6 : vector<160x32xf32> to vector<160x32xbf16>
    %c0_7 = arith.constant 0 : index
    %c0_8 = arith.constant 0 : index
    %8 = vector.load %arg5[%c0_7, %c0_8] : memref<64x48xf32, #tpu.memory_space<vmem>>, vector<64x48xf32>
    %cst_9 = arith.constant dense<0.000000e+00> : vector<16x48xf32>
    %9 = tpu.matmul %0, %8, %cst_9 {dimension_numbers = #tpu.dot_dimension_numbers<[1], [0], [0], [1], [0, 0, 1, 1], [], []>} : vector<16x64xf32>, vector<64x48xf32>, vector<16x48xf32> -> vector<16x48xf32>
    %c0_10 = arith.constant 0 : index
    %c0_11 = arith.constant 0 : index
    %10 = vector.load %arg6[%c0_10, %c0_11] : memref<1x48xf32, #tpu.memory_space<vmem>>, vector<1x48xf32>
    %11 = vector.broadcast %10 : vector<1x48xf32> to vector<16x48xf32>
    %12 = arith.addf %9, %11 : vector<16x48xf32>
    %13 = vector.extract_strided_slice %12 {offsets = [0, 0], sizes = [16, 16], strides = [1, 1]} : vector<16x48xf32> to vector<16x16xf32>
    %14 = vector.extract_strided_slice %12 {offsets = [0, 16], sizes = [16, 16], strides = [1, 1]} : vector<16x48xf32> to vector<16x16xf32>
    %15 = vector.extract_strided_slice %12 {offsets = [0, 32], sizes = [16, 16], strides = [1, 1]} : vector<16x48xf32> to vector<16x16xf32>
    %16 = vector.extract_strided_slice %15 {offsets = [0, 0], sizes = [16, 4], strides = [1, 1]} : vector<16x16xf32> to vector<16x4xf32>
    %cst_12 = arith.constant dense<0xFF800000> : vector<16xf32>
    %17 = vector.multi_reduction <maximumf>, %16, %cst_12 [1] : vector<16x4xf32> to vector<16xf32>
    %18 = vector.shape_cast %17 : vector<16xf32> to vector<16x1xf32>
    %19 = vector.broadcast %18 : vector<16x1xf32> to vector<16x4xf32>
    %20 = arith.subf %16, %19 : vector<16x4xf32>
    %21 = math.exp %20 : vector<16x4xf32>
    %cst_13 = arith.constant dense<0.000000e+00> : vector<16xf32>
    %22 = vector.multi_reduction <add>, %21, %cst_13 [1] : vector<16x4xf32> to vector<16xf32>
    %23 = vector.shape_cast %22 : vector<16xf32> to vector<16x1xf32>
    %24 = tpu.reciprocal %23 {approx = true} : vector<16x1xf32> -> vector<16x1xf32>
    %25 = vector.broadcast %24 : vector<16x1xf32> to vector<16x4xf32>
    %26 = arith.mulf %21, %25 : vector<16x4xf32>
    %27 = vector.extract_strided_slice %15 {offsets = [0, 4], sizes = [16, 4], strides = [1, 1]} : vector<16x16xf32> to vector<16x4xf32>
    %cst_14 = arith.constant dense<0xFF800000> : vector<16xf32>
    %28 = vector.multi_reduction <maximumf>, %27, %cst_14 [1] : vector<16x4xf32> to vector<16xf32>
    %29 = vector.shape_cast %28 : vector<16xf32> to vector<16x1xf32>
    %30 = vector.broadcast %29 : vector<16x1xf32> to vector<16x4xf32>
    %31 = arith.subf %27, %30 : vector<16x4xf32>
    %32 = math.exp %31 : vector<16x4xf32>
    %cst_15 = arith.constant dense<0.000000e+00> : vector<16xf32>
    %33 = vector.multi_reduction <add>, %32, %cst_15 [1] : vector<16x4xf32> to vector<16xf32>
    %34 = vector.shape_cast %33 : vector<16xf32> to vector<16x1xf32>
    %35 = tpu.reciprocal %34 {approx = true} : vector<16x1xf32> -> vector<16x1xf32>
    %36 = vector.broadcast %35 : vector<16x1xf32> to vector<16x4xf32>
    %37 = arith.mulf %32, %36 : vector<16x4xf32>
    %38 = vector.extract_strided_slice %15 {offsets = [0, 8], sizes = [16, 4], strides = [1, 1]} : vector<16x16xf32> to vector<16x4xf32>
    %cst_16 = arith.constant dense<0xFF800000> : vector<16xf32>
    %39 = vector.multi_reduction <maximumf>, %38, %cst_16 [1] : vector<16x4xf32> to vector<16xf32>
    %40 = vector.shape_cast %39 : vector<16xf32> to vector<16x1xf32>
    %41 = vector.broadcast %40 : vector<16x1xf32> to vector<16x4xf32>
    %42 = arith.subf %38, %41 : vector<16x4xf32>
    %43 = math.exp %42 : vector<16x4xf32>
    %cst_17 = arith.constant dense<0.000000e+00> : vector<16xf32>
    %44 = vector.multi_reduction <add>, %43, %cst_17 [1] : vector<16x4xf32> to vector<16xf32>
    %45 = vector.shape_cast %44 : vector<16xf32> to vector<16x1xf32>
    %46 = tpu.reciprocal %45 {approx = true} : vector<16x1xf32> -> vector<16x1xf32>
    %47 = vector.broadcast %46 : vector<16x1xf32> to vector<16x4xf32>
    %48 = arith.mulf %43, %47 : vector<16x4xf32>
    %49 = vector.extract_strided_slice %15 {offsets = [0, 12], sizes = [16, 4], strides = [1, 1]} : vector<16x16xf32> to vector<16x4xf32>
    %cst_18 = arith.constant dense<0xFF800000> : vector<16xf32>
    %50 = vector.multi_reduction <maximumf>, %49, %cst_18 [1] : vector<16x4xf32> to vector<16xf32>
    %51 = vector.shape_cast %50 : vector<16xf32> to vector<16x1xf32>
    %52 = vector.broadcast %51 : vector<16x1xf32> to vector<16x4xf32>
    %53 = arith.subf %49, %52 : vector<16x4xf32>
    %54 = math.exp %53 : vector<16x4xf32>
    %cst_19 = arith.constant dense<0.000000e+00> : vector<16xf32>
    %55 = vector.multi_reduction <add>, %54, %cst_19 [1] : vector<16x4xf32> to vector<16xf32>
    %56 = vector.shape_cast %55 : vector<16xf32> to vector<16x1xf32>
    %57 = tpu.reciprocal %56 {approx = true} : vector<16x1xf32> -> vector<16x1xf32>
    %58 = vector.broadcast %57 : vector<16x1xf32> to vector<16x4xf32>
    %59 = arith.mulf %54, %58 : vector<16x4xf32>
    %60 = tpu.concatenate %26, %37, %48, %59 in 1 : vector<16x4xf32>, vector<16x4xf32>, vector<16x4xf32>, vector<16x4xf32> -> vector<16x16xf32>
    %61 = math.floor %13 : vector<16x16xf32>
    %62 = math.floor %14 : vector<16x16xf32>
    %63 = arith.subf %13, %61 : vector<16x16xf32>
    %64 = arith.subf %14, %62 : vector<16x16xf32>
    %cst_20 = arith.constant 0.000000e+00 : f32
    %65 = vector.broadcast %cst_20 : f32 to vector<16x16xf32>
    %66 = arith.cmpf oge, %61, %65 : vector<16x16xf32>
    %67 = vector.broadcast %3 : vector<1x16xf32> to vector<16x16xf32>
    %68 = arith.cmpf olt, %61, %67 : vector<16x16xf32>
    %69 = arith.andi %66, %68 : vector<16x16xi1>
    %70 = arith.extui %69 : vector<16x16xi1> to vector<16x16xi32>
    %71 = arith.sitofp %70 : vector<16x16xi32> to vector<16x16xf32>
    %cst_21 = arith.constant -1.000000e+00 : f32
    %72 = vector.broadcast %cst_21 : f32 to vector<16x16xf32>
    %73 = arith.cmpf oge, %61, %72 : vector<16x16xf32>
    %cst_22 = arith.constant 1.000000e+00 : f32
    %74 = vector.broadcast %cst_22 : f32 to vector<1x16xf32>
    %75 = arith.subf %3, %74 : vector<1x16xf32>
    %76 = vector.broadcast %75 : vector<1x16xf32> to vector<16x16xf32>
    %77 = arith.cmpf olt, %61, %76 : vector<16x16xf32>
    %78 = arith.andi %73, %77 : vector<16x16xi1>
    %79 = arith.extui %78 : vector<16x16xi1> to vector<16x16xi32>
    %80 = arith.sitofp %79 : vector<16x16xi32> to vector<16x16xf32>
    %cst_23 = arith.constant 0.000000e+00 : f32
    %81 = vector.broadcast %cst_23 : f32 to vector<16x16xf32>
    %82 = arith.cmpf oge, %62, %81 : vector<16x16xf32>
    %83 = vector.broadcast %4 : vector<1x16xf32> to vector<16x16xf32>
    %84 = arith.cmpf olt, %62, %83 : vector<16x16xf32>
    %85 = arith.andi %82, %84 : vector<16x16xi1>
    %86 = arith.extui %85 : vector<16x16xi1> to vector<16x16xi32>
    %87 = arith.sitofp %86 : vector<16x16xi32> to vector<16x16xf32>
    %cst_24 = arith.constant -1.000000e+00 : f32
    %88 = vector.broadcast %cst_24 : f32 to vector<16x16xf32>
    %89 = arith.cmpf oge, %62, %88 : vector<16x16xf32>
    %cst_25 = arith.constant 1.000000e+00 : f32
    %90 = vector.broadcast %cst_25 : f32 to vector<1x16xf32>
    %91 = arith.subf %4, %90 : vector<1x16xf32>
    %92 = vector.broadcast %91 : vector<1x16xf32> to vector<16x16xf32>
    %93 = arith.cmpf olt, %62, %92 : vector<16x16xf32>
    %94 = arith.andi %89, %93 : vector<16x16xi1>
    %95 = arith.extui %94 : vector<16x16xi1> to vector<16x16xi32>
    %96 = arith.sitofp %95 : vector<16x16xi32> to vector<16x16xf32>
    %cst_26 = arith.constant 1.000000e+00 : f32
    %97 = vector.broadcast %cst_26 : f32 to vector<16x16xf32>
    %98 = arith.subf %97, %64 : vector<16x16xf32>
    %cst_27 = arith.constant 1.000000e+00 : f32
    %99 = vector.broadcast %cst_27 : f32 to vector<16x16xf32>
    %100 = arith.subf %99, %63 : vector<16x16xf32>
    %101 = arith.mulf %98, %100 : vector<16x16xf32>
    %102 = arith.mulf %101, %87 : vector<16x16xf32>
    %103 = arith.mulf %102, %71 : vector<16x16xf32>
    %104 = arith.mulf %103, %60 : vector<16x16xf32>
    %cst_28 = arith.constant 1.000000e+00 : f32
    %105 = vector.broadcast %cst_28 : f32 to vector<16x16xf32>
    %106 = arith.subf %105, %64 : vector<16x16xf32>
    %107 = arith.mulf %106, %63 : vector<16x16xf32>
    %108 = arith.mulf %107, %87 : vector<16x16xf32>
    %109 = arith.mulf %108, %80 : vector<16x16xf32>
    %110 = arith.mulf %109, %60 : vector<16x16xf32>
    %cst_29 = arith.constant 1.000000e+00 : f32
    %111 = vector.broadcast %cst_29 : f32 to vector<16x16xf32>
    %112 = arith.subf %111, %63 : vector<16x16xf32>
    %113 = arith.mulf %64, %112 : vector<16x16xf32>
    %114 = arith.mulf %113, %96 : vector<16x16xf32>
    %115 = arith.mulf %114, %71 : vector<16x16xf32>
    %116 = arith.mulf %115, %60 : vector<16x16xf32>
    %117 = arith.mulf %64, %63 : vector<16x16xf32>
    %118 = arith.mulf %117, %96 : vector<16x16xf32>
    %119 = arith.mulf %118, %80 : vector<16x16xf32>
    %120 = arith.mulf %119, %60 : vector<16x16xf32>
    %121 = vector.broadcast %3 : vector<1x16xf32> to vector<16x16xf32>
    %122 = arith.mulf %62, %121 : vector<16x16xf32>
    %123 = arith.addf %122, %61 : vector<16x16xf32>
    %cst_30 = arith.constant 1.000000e+00 : f32
    %124 = vector.broadcast %cst_30 : f32 to vector<16x16xf32>
    %125 = arith.addf %123, %124 : vector<16x16xf32>
    %126 = vector.broadcast %3 : vector<1x16xf32> to vector<16x16xf32>
    %127 = arith.addf %123, %126 : vector<16x16xf32>
    %128 = vector.broadcast %3 : vector<1x16xf32> to vector<16x16xf32>
    %129 = arith.addf %123, %128 : vector<16x16xf32>
    %cst_31 = arith.constant 1.000000e+00 : f32
    %130 = vector.broadcast %cst_31 : f32 to vector<16x16xf32>
    %131 = arith.addf %129, %130 : vector<16x16xf32>
    %132 = tpu.iota {dimensions = array<i32: 1>} : vector<1x64xi32>
    %133 = arith.sitofp %132 : vector<1x64xi32> to vector<1x64xf32>
    %134 = tpu.iota {dimensions = array<i32: 1>} : vector<1x16xi32>
    %135 = arith.sitofp %134 : vector<1x16xi32> to vector<1x16xf32>
    %cst_32 = arith.constant 0.000000e+00 : f32
    %136 = vector.broadcast %cst_32 : f32 to vector<16x64xf32>
    %137 = vector.extract_strided_slice %123 {offsets = [0, 0], sizes = [16, 1], strides = [1, 1]} : vector<16x16xf32> to vector<16x1xf32>
    %138 = vector.broadcast %137 : vector<16x1xf32> to vector<16x64xf32>
    %139 = vector.broadcast %133 : vector<1x64xf32> to vector<16x64xf32>
    %140 = arith.cmpf oeq, %138, %139 : vector<16x64xf32>
    %141 = vector.extract_strided_slice %104 {offsets = [0, 0], sizes = [16, 1], strides = [1, 1]} : vector<16x16xf32> to vector<16x1xf32>
    %cst_33 = arith.constant 0.000000e+00 : f32
    %142 = vector.shape_cast %141 : vector<16x1xf32> to vector<16x1xf32>
    %143 = vector.broadcast %142 : vector<16x1xf32> to vector<16x64xf32>
    %144 = vector.broadcast %cst_33 : f32 to vector<16x64xf32>
    %145 = arith.select %140, %143, %144 : vector<16x64xi1>, vector<16x64xf32>
    %146 = arith.addf %136, %145 : vector<16x64xf32>
    %147 = vector.extract_strided_slice %125 {offsets = [0, 0], sizes = [16, 1], strides = [1, 1]} : vector<16x16xf32> to vector<16x1xf32>
    %148 = vector.broadcast %147 : vector<16x1xf32> to vector<16x64xf32>
    %149 = vector.broadcast %133 : vector<1x64xf32> to vector<16x64xf32>
    %150 = arith.cmpf oeq, %148, %149 : vector<16x64xf32>
    %151 = vector.extract_strided_slice %110 {offsets = [0, 0], sizes = [16, 1], strides = [1, 1]} : vector<16x16xf32> to vector<16x1xf32>
    %cst_34 = arith.constant 0.000000e+00 : f32
    %152 = vector.shape_cast %151 : vector<16x1xf32> to vector<16x1xf32>
    %153 = vector.broadcast %152 : vector<16x1xf32> to vector<16x64xf32>
    %154 = vector.broadcast %cst_34 : f32 to vector<16x64xf32>
    %155 = arith.select %150, %153, %154 : vector<16x64xi1>, vector<16x64xf32>
    %156 = arith.addf %146, %155 : vector<16x64xf32>
    %157 = vector.extract_strided_slice %127 {offsets = [0, 0], sizes = [16, 1], strides = [1, 1]} : vector<16x16xf32> to vector<16x1xf32>
    %158 = vector.broadcast %157 : vector<16x1xf32> to vector<16x64xf32>
    %159 = vector.broadcast %133 : vector<1x64xf32> to vector<16x64xf32>
    %160 = arith.cmpf oeq, %158, %159 : vector<16x64xf32>
    %161 = vector.extract_strided_slice %116 {offsets = [0, 0], sizes = [16, 1], strides = [1, 1]} : vector<16x16xf32> to vector<16x1xf32>
    %cst_35 = arith.constant 0.000000e+00 : f32
    %162 = vector.shape_cast %161 : vector<16x1xf32> to vector<16x1xf32>
    %163 = vector.broadcast %162 : vector<16x1xf32> to vector<16x64xf32>
    %164 = vector.broadcast %cst_35 : f32 to vector<16x64xf32>
    %165 = arith.select %160, %163, %164 : vector<16x64xi1>, vector<16x64xf32>
    %166 = arith.addf %156, %165 : vector<16x64xf32>
    %167 = vector.extract_strided_slice %131 {offsets = [0, 0], sizes = [16, 1], strides = [1, 1]} : vector<16x16xf32> to vector<16x1xf32>
    %168 = vector.broadcast %167 : vector<16x1xf32> to vector<16x64xf32>
    %169 = vector.broadcast %133 : vector<1x64xf32> to vector<16x64xf32>
    %170 = arith.cmpf oeq, %168, %169 : vector<16x64xf32>
    %171 = vector.extract_strided_slice %120 {offsets = [0, 0], sizes = [16, 1], strides = [1, 1]} : vector<16x16xf32> to vector<16x1xf32>
    %cst_36 = arith.constant 0.000000e+00 : f32
    %172 = vector.shape_cast %171 : vector<16x1xf32> to vector<16x1xf32>
    %173 = vector.broadcast %172 : vector<16x1xf32> to vector<16x64xf32>
    %174 = vector.broadcast %cst_36 : f32 to vector<16x64xf32>
    %175 = arith.select %170, %173, %174 : vector<16x64xi1>, vector<16x64xf32>
    %176 = arith.addf %166, %175 : vector<16x64xf32>
    %177 = vector.extract_strided_slice %123 {offsets = [0, 1], sizes = [16, 1], strides = [1, 1]} : vector<16x16xf32> to vector<16x1xf32>
    %178 = vector.broadcast %177 : vector<16x1xf32> to vector<16x64xf32>
    %179 = vector.broadcast %133 : vector<1x64xf32> to vector<16x64xf32>
    %180 = arith.cmpf oeq, %178, %179 : vector<16x64xf32>
    %181 = vector.extract_strided_slice %104 {offsets = [0, 1], sizes = [16, 1], strides = [1, 1]} : vector<16x16xf32> to vector<16x1xf32>
    %cst_37 = arith.constant 0.000000e+00 : f32
    %182 = vector.shape_cast %181 : vector<16x1xf32> to vector<16x1xf32>
    %183 = vector.broadcast %182 : vector<16x1xf32> to vector<16x64xf32>
    %184 = vector.broadcast %cst_37 : f32 to vector<16x64xf32>
    %185 = arith.select %180, %183, %184 : vector<16x64xi1>, vector<16x64xf32>
    %186 = arith.addf %176, %185 : vector<16x64xf32>
    %187 = vector.extract_strided_slice %125 {offsets = [0, 1], sizes = [16, 1], strides = [1, 1]} : vector<16x16xf32> to vector<16x1xf32>
    %188 = vector.broadcast %187 : vector<16x1xf32> to vector<16x64xf32>
    %189 = vector.broadcast %133 : vector<1x64xf32> to vector<16x64xf32>
    %190 = arith.cmpf oeq, %188, %189 : vector<16x64xf32>
    %191 = vector.extract_strided_slice %110 {offsets = [0, 1], sizes = [16, 1], strides = [1, 1]} : vector<16x16xf32> to vector<16x1xf32>
    %cst_38 = arith.constant 0.000000e+00 : f32
    %192 = vector.shape_cast %191 : vector<16x1xf32> to vector<16x1xf32>
    %193 = vector.broadcast %192 : vector<16x1xf32> to vector<16x64xf32>
    %194 = vector.broadcast %cst_38 : f32 to vector<16x64xf32>
    %195 = arith.select %190, %193, %194 : vector<16x64xi1>, vector<16x64xf32>
    %196 = arith.addf %186, %195 : vector<16x64xf32>
    %197 = vector.extract_strided_slice %127 {offsets = [0, 1], sizes = [16, 1], strides = [1, 1]} : vector<16x16xf32> to vector<16x1xf32>
    %198 = vector.broadcast %197 : vector<16x1xf32> to vector<16x64xf32>
    %199 = vector.broadcast %133 : vector<1x64xf32> to vector<16x64xf32>
    %200 = arith.cmpf oeq, %198, %199 : vector<16x64xf32>
    %201 = vector.extract_strided_slice %116 {offsets = [0, 1], sizes = [16, 1], strides = [1, 1]} : vector<16x16xf32> to vector<16x1xf32>
    %cst_39 = arith.constant 0.000000e+00 : f32
    %202 = vector.shape_cast %201 : vector<16x1xf32> to vector<16x1xf32>
    %203 = vector.broadcast %202 : vector<16x1xf32> to vector<16x64xf32>
    %204 = vector.broadcast %cst_39 : f32 to vector<16x64xf32>
    %205 = arith.select %200, %203, %204 : vector<16x64xi1>, vector<16x64xf32>
    %206 = arith.addf %196, %205 : vector<16x64xf32>
    %207 = vector.extract_strided_slice %131 {offsets = [0, 1], sizes = [16, 1], strides = [1, 1]} : vector<16x16xf32> to vector<16x1xf32>
    %208 = vector.broadcast %207 : vector<16x1xf32> to vector<16x64xf32>
    %209 = vector.broadcast %133 : vector<1x64xf32> to vector<16x64xf32>
    %210 = arith.cmpf oeq, %208, %209 : vector<16x64xf32>
    %211 = vector.extract_strided_slice %120 {offsets = [0, 1], sizes = [16, 1], strides = [1, 1]} : vector<16x16xf32> to vector<16x1xf32>
    %cst_40 = arith.constant 0.000000e+00 : f32
    %212 = vector.shape_cast %211 : vector<16x1xf32> to vector<16x1xf32>
    %213 = vector.broadcast %212 : vector<16x1xf32> to vector<16x64xf32>
    %214 = vector.broadcast %cst_40 : f32 to vector<16x64xf32>
    %215 = arith.select %210, %213, %214 : vector<16x64xi1>, vector<16x64xf32>
    %216 = arith.addf %206, %215 : vector<16x64xf32>
    %cst_41 = arith.constant 0.000000e+00 : f32
    %217 = vector.broadcast %cst_41 : f32 to vector<16x16xf32>
    %218 = vector.extract_strided_slice %123 {offsets = [0, 2], sizes = [16, 1], strides = [1, 1]} : vector<16x16xf32> to vector<16x1xf32>
    %219 = vector.broadcast %218 : vector<16x1xf32> to vector<16x16xf32>
    %220 = vector.broadcast %135 : vector<1x16xf32> to vector<16x16xf32>
    %221 = arith.cmpf oeq, %219, %220 : vector<16x16xf32>
    %222 = vector.extract_strided_slice %104 {offsets = [0, 2], sizes = [16, 1], strides = [1, 1]} : vector<16x16xf32> to vector<16x1xf32>
    %cst_42 = arith.constant 0.000000e+00 : f32
    %223 = vector.shape_cast %222 : vector<16x1xf32> to vector<16x1xf32>
    %224 = vector.broadcast %223 : vector<16x1xf32> to vector<16x16xf32>
    %225 = vector.broadcast %cst_42 : f32 to vector<16x16xf32>
    %226 = arith.select %221, %224, %225 : vector<16x16xi1>, vector<16x16xf32>
    %227 = arith.addf %217, %226 : vector<16x16xf32>
    %228 = vector.extract_strided_slice %125 {offsets = [0, 2], sizes = [16, 1], strides = [1, 1]} : vector<16x16xf32> to vector<16x1xf32>
    %229 = vector.broadcast %228 : vector<16x1xf32> to vector<16x16xf32>
    %230 = vector.broadcast %135 : vector<1x16xf32> to vector<16x16xf32>
    %231 = arith.cmpf oeq, %229, %230 : vector<16x16xf32>
    %232 = vector.extract_strided_slice %110 {offsets = [0, 2], sizes = [16, 1], strides = [1, 1]} : vector<16x16xf32> to vector<16x1xf32>
    %cst_43 = arith.constant 0.000000e+00 : f32
    %233 = vector.shape_cast %232 : vector<16x1xf32> to vector<16x1xf32>
    %234 = vector.broadcast %233 : vector<16x1xf32> to vector<16x16xf32>
    %235 = vector.broadcast %cst_43 : f32 to vector<16x16xf32>
    %236 = arith.select %231, %234, %235 : vector<16x16xi1>, vector<16x16xf32>
    %237 = arith.addf %227, %236 : vector<16x16xf32>
    %238 = vector.extract_strided_slice %127 {offsets = [0, 2], sizes = [16, 1], strides = [1, 1]} : vector<16x16xf32> to vector<16x1xf32>
    %239 = vector.broadcast %238 : vector<16x1xf32> to vector<16x16xf32>
    %240 = vector.broadcast %135 : vector<1x16xf32> to vector<16x16xf32>
    %241 = arith.cmpf oeq, %239, %240 : vector<16x16xf32>
    %242 = vector.extract_strided_slice %116 {offsets = [0, 2], sizes = [16, 1], strides = [1, 1]} : vector<16x16xf32> to vector<16x1xf32>
    %cst_44 = arith.constant 0.000000e+00 : f32
    %243 = vector.shape_cast %242 : vector<16x1xf32> to vector<16x1xf32>
    %244 = vector.broadcast %243 : vector<16x1xf32> to vector<16x16xf32>
    %245 = vector.broadcast %cst_44 : f32 to vector<16x16xf32>
    %246 = arith.select %241, %244, %245 : vector<16x16xi1>, vector<16x16xf32>
    %247 = arith.addf %237, %246 : vector<16x16xf32>
    %248 = vector.extract_strided_slice %131 {offsets = [0, 2], sizes = [16, 1], strides = [1, 1]} : vector<16x16xf32> to vector<16x1xf32>
    %249 = vector.broadcast %248 : vector<16x1xf32> to vector<16x16xf32>
    %250 = vector.broadcast %135 : vector<1x16xf32> to vector<16x16xf32>
    %251 = arith.cmpf oeq, %249, %250 : vector<16x16xf32>
    %252 = vector.extract_strided_slice %120 {offsets = [0, 2], sizes = [16, 1], strides = [1, 1]} : vector<16x16xf32> to vector<16x1xf32>
    %cst_45 = arith.constant 0.000000e+00 : f32
    %253 = vector.shape_cast %252 : vector<16x1xf32> to vector<16x1xf32>
    %254 = vector.broadcast %253 : vector<16x1xf32> to vector<16x16xf32>
    %255 = vector.broadcast %cst_45 : f32 to vector<16x16xf32>
    %256 = arith.select %251, %254, %255 : vector<16x16xi1>, vector<16x16xf32>
    %257 = arith.addf %247, %256 : vector<16x16xf32>
    %258 = vector.extract_strided_slice %123 {offsets = [0, 3], sizes = [16, 1], strides = [1, 1]} : vector<16x16xf32> to vector<16x1xf32>
    %259 = vector.broadcast %258 : vector<16x1xf32> to vector<16x16xf32>
    %260 = vector.broadcast %135 : vector<1x16xf32> to vector<16x16xf32>
    %261 = arith.cmpf oeq, %259, %260 : vector<16x16xf32>
    %262 = vector.extract_strided_slice %104 {offsets = [0, 3], sizes = [16, 1], strides = [1, 1]} : vector<16x16xf32> to vector<16x1xf32>
    %cst_46 = arith.constant 0.000000e+00 : f32
    %263 = vector.shape_cast %262 : vector<16x1xf32> to vector<16x1xf32>
    %264 = vector.broadcast %263 : vector<16x1xf32> to vector<16x16xf32>
    %265 = vector.broadcast %cst_46 : f32 to vector<16x16xf32>
    %266 = arith.select %261, %264, %265 : vector<16x16xi1>, vector<16x16xf32>
    %267 = arith.addf %257, %266 : vector<16x16xf32>
    %268 = vector.extract_strided_slice %125 {offsets = [0, 3], sizes = [16, 1], strides = [1, 1]} : vector<16x16xf32> to vector<16x1xf32>
    %269 = vector.broadcast %268 : vector<16x1xf32> to vector<16x16xf32>
    %270 = vector.broadcast %135 : vector<1x16xf32> to vector<16x16xf32>
    %271 = arith.cmpf oeq, %269, %270 : vector<16x16xf32>
    %272 = vector.extract_strided_slice %110 {offsets = [0, 3], sizes = [16, 1], strides = [1, 1]} : vector<16x16xf32> to vector<16x1xf32>
    %cst_47 = arith.constant 0.000000e+00 : f32
    %273 = vector.shape_cast %272 : vector<16x1xf32> to vector<16x1xf32>
    %274 = vector.broadcast %273 : vector<16x1xf32> to vector<16x16xf32>
    %275 = vector.broadcast %cst_47 : f32 to vector<16x16xf32>
    %276 = arith.select %271, %274, %275 : vector<16x16xi1>, vector<16x16xf32>
    %277 = arith.addf %267, %276 : vector<16x16xf32>
    %278 = vector.extract_strided_slice %127 {offsets = [0, 3], sizes = [16, 1], strides = [1, 1]} : vector<16x16xf32> to vector<16x1xf32>
    %279 = vector.broadcast %278 : vector<16x1xf32> to vector<16x16xf32>
    %280 = vector.broadcast %135 : vector<1x16xf32> to vector<16x16xf32>
    %281 = arith.cmpf oeq, %279, %280 : vector<16x16xf32>
    %282 = vector.extract_strided_slice %116 {offsets = [0, 3], sizes = [16, 1], strides = [1, 1]} : vector<16x16xf32> to vector<16x1xf32>
    %cst_48 = arith.constant 0.000000e+00 : f32
    %283 = vector.shape_cast %282 : vector<16x1xf32> to vector<16x1xf32>
    %284 = vector.broadcast %283 : vector<16x1xf32> to vector<16x16xf32>
    %285 = vector.broadcast %cst_48 : f32 to vector<16x16xf32>
    %286 = arith.select %281, %284, %285 : vector<16x16xi1>, vector<16x16xf32>
    %287 = arith.addf %277, %286 : vector<16x16xf32>
    %288 = vector.extract_strided_slice %131 {offsets = [0, 3], sizes = [16, 1], strides = [1, 1]} : vector<16x16xf32> to vector<16x1xf32>
    %289 = vector.broadcast %288 : vector<16x1xf32> to vector<16x16xf32>
    %290 = vector.broadcast %135 : vector<1x16xf32> to vector<16x16xf32>
    %291 = arith.cmpf oeq, %289, %290 : vector<16x16xf32>
    %292 = vector.extract_strided_slice %120 {offsets = [0, 3], sizes = [16, 1], strides = [1, 1]} : vector<16x16xf32> to vector<16x1xf32>
    %cst_49 = arith.constant 0.000000e+00 : f32
    %293 = vector.shape_cast %292 : vector<16x1xf32> to vector<16x1xf32>
    %294 = vector.broadcast %293 : vector<16x1xf32> to vector<16x16xf32>
    %295 = vector.broadcast %cst_49 : f32 to vector<16x16xf32>
    %296 = arith.select %291, %294, %295 : vector<16x16xi1>, vector<16x16xf32>
    %297 = arith.addf %287, %296 : vector<16x16xf32>
    %298 = tpu.concatenate %216, %297 in 1 : vector<16x64xf32>, vector<16x16xf32> -> vector<16x80xf32>
    %299 = arith.truncf %298 : vector<16x80xf32> to vector<16x80xbf16>
    %cst_50 = arith.constant 0.000000e+00 : f32
    %300 = vector.broadcast %cst_50 : f32 to vector<16x64xf32>
    %301 = vector.extract_strided_slice %123 {offsets = [0, 4], sizes = [16, 1], strides = [1, 1]} : vector<16x16xf32> to vector<16x1xf32>
    %302 = vector.broadcast %301 : vector<16x1xf32> to vector<16x64xf32>
    %303 = vector.broadcast %133 : vector<1x64xf32> to vector<16x64xf32>
    %304 = arith.cmpf oeq, %302, %303 : vector<16x64xf32>
    %305 = vector.extract_strided_slice %104 {offsets = [0, 4], sizes = [16, 1], strides = [1, 1]} : vector<16x16xf32> to vector<16x1xf32>
    %cst_51 = arith.constant 0.000000e+00 : f32
    %306 = vector.shape_cast %305 : vector<16x1xf32> to vector<16x1xf32>
    %307 = vector.broadcast %306 : vector<16x1xf32> to vector<16x64xf32>
    %308 = vector.broadcast %cst_51 : f32 to vector<16x64xf32>
    %309 = arith.select %304, %307, %308 : vector<16x64xi1>, vector<16x64xf32>
    %310 = arith.addf %300, %309 : vector<16x64xf32>
    %311 = vector.extract_strided_slice %125 {offsets = [0, 4], sizes = [16, 1], strides = [1, 1]} : vector<16x16xf32> to vector<16x1xf32>
    %312 = vector.broadcast %311 : vector<16x1xf32> to vector<16x64xf32>
    %313 = vector.broadcast %133 : vector<1x64xf32> to vector<16x64xf32>
    %314 = arith.cmpf oeq, %312, %313 : vector<16x64xf32>
    %315 = vector.extract_strided_slice %110 {offsets = [0, 4], sizes = [16, 1], strides = [1, 1]} : vector<16x16xf32> to vector<16x1xf32>
    %cst_52 = arith.constant 0.000000e+00 : f32
    %316 = vector.shape_cast %315 : vector<16x1xf32> to vector<16x1xf32>
    %317 = vector.broadcast %316 : vector<16x1xf32> to vector<16x64xf32>
    %318 = vector.broadcast %cst_52 : f32 to vector<16x64xf32>
    %319 = arith.select %314, %317, %318 : vector<16x64xi1>, vector<16x64xf32>
    %320 = arith.addf %310, %319 : vector<16x64xf32>
    %321 = vector.extract_strided_slice %127 {offsets = [0, 4], sizes = [16, 1], strides = [1, 1]} : vector<16x16xf32> to vector<16x1xf32>
    %322 = vector.broadcast %321 : vector<16x1xf32> to vector<16x64xf32>
    %323 = vector.broadcast %133 : vector<1x64xf32> to vector<16x64xf32>
    %324 = arith.cmpf oeq, %322, %323 : vector<16x64xf32>
    %325 = vector.extract_strided_slice %116 {offsets = [0, 4], sizes = [16, 1], strides = [1, 1]} : vector<16x16xf32> to vector<16x1xf32>
    %cst_53 = arith.constant 0.000000e+00 : f32
    %326 = vector.shape_cast %325 : vector<16x1xf32> to vector<16x1xf32>
    %327 = vector.broadcast %326 : vector<16x1xf32> to vector<16x64xf32>
    %328 = vector.broadcast %cst_53 : f32 to vector<16x64xf32>
    %329 = arith.select %324, %327, %328 : vector<16x64xi1>, vector<16x64xf32>
    %330 = arith.addf %320, %329 : vector<16x64xf32>
    %331 = vector.extract_strided_slice %131 {offsets = [0, 4], sizes = [16, 1], strides = [1, 1]} : vector<16x16xf32> to vector<16x1xf32>
    %332 = vector.broadcast %331 : vector<16x1xf32> to vector<16x64xf32>
    %333 = vector.broadcast %133 : vector<1x64xf32> to vector<16x64xf32>
    %334 = arith.cmpf oeq, %332, %333 : vector<16x64xf32>
    %335 = vector.extract_strided_slice %120 {offsets = [0, 4], sizes = [16, 1], strides = [1, 1]} : vector<16x16xf32> to vector<16x1xf32>
    %cst_54 = arith.constant 0.000000e+00 : f32
    %336 = vector.shape_cast %335 : vector<16x1xf32> to vector<16x1xf32>
    %337 = vector.broadcast %336 : vector<16x1xf32> to vector<16x64xf32>
    %338 = vector.broadcast %cst_54 : f32 to vector<16x64xf32>
    %339 = arith.select %334, %337, %338 : vector<16x64xi1>, vector<16x64xf32>
    %340 = arith.addf %330, %339 : vector<16x64xf32>
    %341 = vector.extract_strided_slice %123 {offsets = [0, 5], sizes = [16, 1], strides = [1, 1]} : vector<16x16xf32> to vector<16x1xf32>
    %342 = vector.broadcast %341 : vector<16x1xf32> to vector<16x64xf32>
    %343 = vector.broadcast %133 : vector<1x64xf32> to vector<16x64xf32>
    %344 = arith.cmpf oeq, %342, %343 : vector<16x64xf32>
    %345 = vector.extract_strided_slice %104 {offsets = [0, 5], sizes = [16, 1], strides = [1, 1]} : vector<16x16xf32> to vector<16x1xf32>
    %cst_55 = arith.constant 0.000000e+00 : f32
    %346 = vector.shape_cast %345 : vector<16x1xf32> to vector<16x1xf32>
    %347 = vector.broadcast %346 : vector<16x1xf32> to vector<16x64xf32>
    %348 = vector.broadcast %cst_55 : f32 to vector<16x64xf32>
    %349 = arith.select %344, %347, %348 : vector<16x64xi1>, vector<16x64xf32>
    %350 = arith.addf %340, %349 : vector<16x64xf32>
    %351 = vector.extract_strided_slice %125 {offsets = [0, 5], sizes = [16, 1], strides = [1, 1]} : vector<16x16xf32> to vector<16x1xf32>
    %352 = vector.broadcast %351 : vector<16x1xf32> to vector<16x64xf32>
    %353 = vector.broadcast %133 : vector<1x64xf32> to vector<16x64xf32>
    %354 = arith.cmpf oeq, %352, %353 : vector<16x64xf32>
    %355 = vector.extract_strided_slice %110 {offsets = [0, 5], sizes = [16, 1], strides = [1, 1]} : vector<16x16xf32> to vector<16x1xf32>
    %cst_56 = arith.constant 0.000000e+00 : f32
    %356 = vector.shape_cast %355 : vector<16x1xf32> to vector<16x1xf32>
    %357 = vector.broadcast %356 : vector<16x1xf32> to vector<16x64xf32>
    %358 = vector.broadcast %cst_56 : f32 to vector<16x64xf32>
    %359 = arith.select %354, %357, %358 : vector<16x64xi1>, vector<16x64xf32>
    %360 = arith.addf %350, %359 : vector<16x64xf32>
    %361 = vector.extract_strided_slice %127 {offsets = [0, 5], sizes = [16, 1], strides = [1, 1]} : vector<16x16xf32> to vector<16x1xf32>
    %362 = vector.broadcast %361 : vector<16x1xf32> to vector<16x64xf32>
    %363 = vector.broadcast %133 : vector<1x64xf32> to vector<16x64xf32>
    %364 = arith.cmpf oeq, %362, %363 : vector<16x64xf32>
    %365 = vector.extract_strided_slice %116 {offsets = [0, 5], sizes = [16, 1], strides = [1, 1]} : vector<16x16xf32> to vector<16x1xf32>
    %cst_57 = arith.constant 0.000000e+00 : f32
    %366 = vector.shape_cast %365 : vector<16x1xf32> to vector<16x1xf32>
    %367 = vector.broadcast %366 : vector<16x1xf32> to vector<16x64xf32>
    %368 = vector.broadcast %cst_57 : f32 to vector<16x64xf32>
    %369 = arith.select %364, %367, %368 : vector<16x64xi1>, vector<16x64xf32>
    %370 = arith.addf %360, %369 : vector<16x64xf32>
    %371 = vector.extract_strided_slice %131 {offsets = [0, 5], sizes = [16, 1], strides = [1, 1]} : vector<16x16xf32> to vector<16x1xf32>
    %372 = vector.broadcast %371 : vector<16x1xf32> to vector<16x64xf32>
    %373 = vector.broadcast %133 : vector<1x64xf32> to vector<16x64xf32>
    %374 = arith.cmpf oeq, %372, %373 : vector<16x64xf32>
    %375 = vector.extract_strided_slice %120 {offsets = [0, 5], sizes = [16, 1], strides = [1, 1]} : vector<16x16xf32> to vector<16x1xf32>
    %cst_58 = arith.constant 0.000000e+00 : f32
    %376 = vector.shape_cast %375 : vector<16x1xf32> to vector<16x1xf32>
    %377 = vector.broadcast %376 : vector<16x1xf32> to vector<16x64xf32>
    %378 = vector.broadcast %cst_58 : f32 to vector<16x64xf32>
    %379 = arith.select %374, %377, %378 : vector<16x64xi1>, vector<16x64xf32>
    %380 = arith.addf %370, %379 : vector<16x64xf32>
    %cst_59 = arith.constant 0.000000e+00 : f32
    %381 = vector.broadcast %cst_59 : f32 to vector<16x16xf32>
    %382 = vector.extract_strided_slice %123 {offsets = [0, 6], sizes = [16, 1], strides = [1, 1]} : vector<16x16xf32> to vector<16x1xf32>
    %383 = vector.broadcast %382 : vector<16x1xf32> to vector<16x16xf32>
    %384 = vector.broadcast %135 : vector<1x16xf32> to vector<16x16xf32>
    %385 = arith.cmpf oeq, %383, %384 : vector<16x16xf32>
    %386 = vector.extract_strided_slice %104 {offsets = [0, 6], sizes = [16, 1], strides = [1, 1]} : vector<16x16xf32> to vector<16x1xf32>
    %cst_60 = arith.constant 0.000000e+00 : f32
    %387 = vector.shape_cast %386 : vector<16x1xf32> to vector<16x1xf32>
    %388 = vector.broadcast %387 : vector<16x1xf32> to vector<16x16xf32>
    %389 = vector.broadcast %cst_60 : f32 to vector<16x16xf32>
    %390 = arith.select %385, %388, %389 : vector<16x16xi1>, vector<16x16xf32>
    %391 = arith.addf %381, %390 : vector<16x16xf32>
    %392 = vector.extract_strided_slice %125 {offsets = [0, 6], sizes = [16, 1], strides = [1, 1]} : vector<16x16xf32> to vector<16x1xf32>
    %393 = vector.broadcast %392 : vector<16x1xf32> to vector<16x16xf32>
    %394 = vector.broadcast %135 : vector<1x16xf32> to vector<16x16xf32>
    %395 = arith.cmpf oeq, %393, %394 : vector<16x16xf32>
    %396 = vector.extract_strided_slice %110 {offsets = [0, 6], sizes = [16, 1], strides = [1, 1]} : vector<16x16xf32> to vector<16x1xf32>
    %cst_61 = arith.constant 0.000000e+00 : f32
    %397 = vector.shape_cast %396 : vector<16x1xf32> to vector<16x1xf32>
    %398 = vector.broadcast %397 : vector<16x1xf32> to vector<16x16xf32>
    %399 = vector.broadcast %cst_61 : f32 to vector<16x16xf32>
    %400 = arith.select %395, %398, %399 : vector<16x16xi1>, vector<16x16xf32>
    %401 = arith.addf %391, %400 : vector<16x16xf32>
    %402 = vector.extract_strided_slice %127 {offsets = [0, 6], sizes = [16, 1], strides = [1, 1]} : vector<16x16xf32> to vector<16x1xf32>
    %403 = vector.broadcast %402 : vector<16x1xf32> to vector<16x16xf32>
    %404 = vector.broadcast %135 : vector<1x16xf32> to vector<16x16xf32>
    %405 = arith.cmpf oeq, %403, %404 : vector<16x16xf32>
    %406 = vector.extract_strided_slice %116 {offsets = [0, 6], sizes = [16, 1], strides = [1, 1]} : vector<16x16xf32> to vector<16x1xf32>
    %cst_62 = arith.constant 0.000000e+00 : f32
    %407 = vector.shape_cast %406 : vector<16x1xf32> to vector<16x1xf32>
    %408 = vector.broadcast %407 : vector<16x1xf32> to vector<16x16xf32>
    %409 = vector.broadcast %cst_62 : f32 to vector<16x16xf32>
    %410 = arith.select %405, %408, %409 : vector<16x16xi1>, vector<16x16xf32>
    %411 = arith.addf %401, %410 : vector<16x16xf32>
    %412 = vector.extract_strided_slice %131 {offsets = [0, 6], sizes = [16, 1], strides = [1, 1]} : vector<16x16xf32> to vector<16x1xf32>
    %413 = vector.broadcast %412 : vector<16x1xf32> to vector<16x16xf32>
    %414 = vector.broadcast %135 : vector<1x16xf32> to vector<16x16xf32>
    %415 = arith.cmpf oeq, %413, %414 : vector<16x16xf32>
    %416 = vector.extract_strided_slice %120 {offsets = [0, 6], sizes = [16, 1], strides = [1, 1]} : vector<16x16xf32> to vector<16x1xf32>
    %cst_63 = arith.constant 0.000000e+00 : f32
    %417 = vector.shape_cast %416 : vector<16x1xf32> to vector<16x1xf32>
    %418 = vector.broadcast %417 : vector<16x1xf32> to vector<16x16xf32>
    %419 = vector.broadcast %cst_63 : f32 to vector<16x16xf32>
    %420 = arith.select %415, %418, %419 : vector<16x16xi1>, vector<16x16xf32>
    %421 = arith.addf %411, %420 : vector<16x16xf32>
    %422 = vector.extract_strided_slice %123 {offsets = [0, 7], sizes = [16, 1], strides = [1, 1]} : vector<16x16xf32> to vector<16x1xf32>
    %423 = vector.broadcast %422 : vector<16x1xf32> to vector<16x16xf32>
    %424 = vector.broadcast %135 : vector<1x16xf32> to vector<16x16xf32>
    %425 = arith.cmpf oeq, %423, %424 : vector<16x16xf32>
    %426 = vector.extract_strided_slice %104 {offsets = [0, 7], sizes = [16, 1], strides = [1, 1]} : vector<16x16xf32> to vector<16x1xf32>
    %cst_64 = arith.constant 0.000000e+00 : f32
    %427 = vector.shape_cast %426 : vector<16x1xf32> to vector<16x1xf32>
    %428 = vector.broadcast %427 : vector<16x1xf32> to vector<16x16xf32>
    %429 = vector.broadcast %cst_64 : f32 to vector<16x16xf32>
    %430 = arith.select %425, %428, %429 : vector<16x16xi1>, vector<16x16xf32>
    %431 = arith.addf %421, %430 : vector<16x16xf32>
    %432 = vector.extract_strided_slice %125 {offsets = [0, 7], sizes = [16, 1], strides = [1, 1]} : vector<16x16xf32> to vector<16x1xf32>
    %433 = vector.broadcast %432 : vector<16x1xf32> to vector<16x16xf32>
    %434 = vector.broadcast %135 : vector<1x16xf32> to vector<16x16xf32>
    %435 = arith.cmpf oeq, %433, %434 : vector<16x16xf32>
    %436 = vector.extract_strided_slice %110 {offsets = [0, 7], sizes = [16, 1], strides = [1, 1]} : vector<16x16xf32> to vector<16x1xf32>
    %cst_65 = arith.constant 0.000000e+00 : f32
    %437 = vector.shape_cast %436 : vector<16x1xf32> to vector<16x1xf32>
    %438 = vector.broadcast %437 : vector<16x1xf32> to vector<16x16xf32>
    %439 = vector.broadcast %cst_65 : f32 to vector<16x16xf32>
    %440 = arith.select %435, %438, %439 : vector<16x16xi1>, vector<16x16xf32>
    %441 = arith.addf %431, %440 : vector<16x16xf32>
    %442 = vector.extract_strided_slice %127 {offsets = [0, 7], sizes = [16, 1], strides = [1, 1]} : vector<16x16xf32> to vector<16x1xf32>
    %443 = vector.broadcast %442 : vector<16x1xf32> to vector<16x16xf32>
    %444 = vector.broadcast %135 : vector<1x16xf32> to vector<16x16xf32>
    %445 = arith.cmpf oeq, %443, %444 : vector<16x16xf32>
    %446 = vector.extract_strided_slice %116 {offsets = [0, 7], sizes = [16, 1], strides = [1, 1]} : vector<16x16xf32> to vector<16x1xf32>
    %cst_66 = arith.constant 0.000000e+00 : f32
    %447 = vector.shape_cast %446 : vector<16x1xf32> to vector<16x1xf32>
    %448 = vector.broadcast %447 : vector<16x1xf32> to vector<16x16xf32>
    %449 = vector.broadcast %cst_66 : f32 to vector<16x16xf32>
    %450 = arith.select %445, %448, %449 : vector<16x16xi1>, vector<16x16xf32>
    %451 = arith.addf %441, %450 : vector<16x16xf32>
    %452 = vector.extract_strided_slice %131 {offsets = [0, 7], sizes = [16, 1], strides = [1, 1]} : vector<16x16xf32> to vector<16x1xf32>
    %453 = vector.broadcast %452 : vector<16x1xf32> to vector<16x16xf32>
    %454 = vector.broadcast %135 : vector<1x16xf32> to vector<16x16xf32>
    %455 = arith.cmpf oeq, %453, %454 : vector<16x16xf32>
    %456 = vector.extract_strided_slice %120 {offsets = [0, 7], sizes = [16, 1], strides = [1, 1]} : vector<16x16xf32> to vector<16x1xf32>
    %cst_67 = arith.constant 0.000000e+00 : f32
    %457 = vector.shape_cast %456 : vector<16x1xf32> to vector<16x1xf32>
    %458 = vector.broadcast %457 : vector<16x1xf32> to vector<16x16xf32>
    %459 = vector.broadcast %cst_67 : f32 to vector<16x16xf32>
    %460 = arith.select %455, %458, %459 : vector<16x16xi1>, vector<16x16xf32>
    %461 = arith.addf %451, %460 : vector<16x16xf32>
    %462 = tpu.concatenate %380, %461 in 1 : vector<16x64xf32>, vector<16x16xf32> -> vector<16x80xf32>
    %463 = arith.truncf %462 : vector<16x80xf32> to vector<16x80xbf16>
    %cst_68 = arith.constant 0.000000e+00 : f32
    %464 = vector.broadcast %cst_68 : f32 to vector<16x64xf32>
    %465 = vector.extract_strided_slice %123 {offsets = [0, 8], sizes = [16, 1], strides = [1, 1]} : vector<16x16xf32> to vector<16x1xf32>
    %466 = vector.broadcast %465 : vector<16x1xf32> to vector<16x64xf32>
    %467 = vector.broadcast %133 : vector<1x64xf32> to vector<16x64xf32>
    %468 = arith.cmpf oeq, %466, %467 : vector<16x64xf32>
    %469 = vector.extract_strided_slice %104 {offsets = [0, 8], sizes = [16, 1], strides = [1, 1]} : vector<16x16xf32> to vector<16x1xf32>
    %cst_69 = arith.constant 0.000000e+00 : f32
    %470 = vector.shape_cast %469 : vector<16x1xf32> to vector<16x1xf32>
    %471 = vector.broadcast %470 : vector<16x1xf32> to vector<16x64xf32>
    %472 = vector.broadcast %cst_69 : f32 to vector<16x64xf32>
    %473 = arith.select %468, %471, %472 : vector<16x64xi1>, vector<16x64xf32>
    %474 = arith.addf %464, %473 : vector<16x64xf32>
    %475 = vector.extract_strided_slice %125 {offsets = [0, 8], sizes = [16, 1], strides = [1, 1]} : vector<16x16xf32> to vector<16x1xf32>
    %476 = vector.broadcast %475 : vector<16x1xf32> to vector<16x64xf32>
    %477 = vector.broadcast %133 : vector<1x64xf32> to vector<16x64xf32>
    %478 = arith.cmpf oeq, %476, %477 : vector<16x64xf32>
    %479 = vector.extract_strided_slice %110 {offsets = [0, 8], sizes = [16, 1], strides = [1, 1]} : vector<16x16xf32> to vector<16x1xf32>
    %cst_70 = arith.constant 0.000000e+00 : f32
    %480 = vector.shape_cast %479 : vector<16x1xf32> to vector<16x1xf32>
    %481 = vector.broadcast %480 : vector<16x1xf32> to vector<16x64xf32>
    %482 = vector.broadcast %cst_70 : f32 to vector<16x64xf32>
    %483 = arith.select %478, %481, %482 : vector<16x64xi1>, vector<16x64xf32>
    %484 = arith.addf %474, %483 : vector<16x64xf32>
    %485 = vector.extract_strided_slice %127 {offsets = [0, 8], sizes = [16, 1], strides = [1, 1]} : vector<16x16xf32> to vector<16x1xf32>
    %486 = vector.broadcast %485 : vector<16x1xf32> to vector<16x64xf32>
    %487 = vector.broadcast %133 : vector<1x64xf32> to vector<16x64xf32>
    %488 = arith.cmpf oeq, %486, %487 : vector<16x64xf32>
    %489 = vector.extract_strided_slice %116 {offsets = [0, 8], sizes = [16, 1], strides = [1, 1]} : vector<16x16xf32> to vector<16x1xf32>
    %cst_71 = arith.constant 0.000000e+00 : f32
    %490 = vector.shape_cast %489 : vector<16x1xf32> to vector<16x1xf32>
    %491 = vector.broadcast %490 : vector<16x1xf32> to vector<16x64xf32>
    %492 = vector.broadcast %cst_71 : f32 to vector<16x64xf32>
    %493 = arith.select %488, %491, %492 : vector<16x64xi1>, vector<16x64xf32>
    %494 = arith.addf %484, %493 : vector<16x64xf32>
    %495 = vector.extract_strided_slice %131 {offsets = [0, 8], sizes = [16, 1], strides = [1, 1]} : vector<16x16xf32> to vector<16x1xf32>
    %496 = vector.broadcast %495 : vector<16x1xf32> to vector<16x64xf32>
    %497 = vector.broadcast %133 : vector<1x64xf32> to vector<16x64xf32>
    %498 = arith.cmpf oeq, %496, %497 : vector<16x64xf32>
    %499 = vector.extract_strided_slice %120 {offsets = [0, 8], sizes = [16, 1], strides = [1, 1]} : vector<16x16xf32> to vector<16x1xf32>
    %cst_72 = arith.constant 0.000000e+00 : f32
    %500 = vector.shape_cast %499 : vector<16x1xf32> to vector<16x1xf32>
    %501 = vector.broadcast %500 : vector<16x1xf32> to vector<16x64xf32>
    %502 = vector.broadcast %cst_72 : f32 to vector<16x64xf32>
    %503 = arith.select %498, %501, %502 : vector<16x64xi1>, vector<16x64xf32>
    %504 = arith.addf %494, %503 : vector<16x64xf32>
    %505 = vector.extract_strided_slice %123 {offsets = [0, 9], sizes = [16, 1], strides = [1, 1]} : vector<16x16xf32> to vector<16x1xf32>
    %506 = vector.broadcast %505 : vector<16x1xf32> to vector<16x64xf32>
    %507 = vector.broadcast %133 : vector<1x64xf32> to vector<16x64xf32>
    %508 = arith.cmpf oeq, %506, %507 : vector<16x64xf32>
    %509 = vector.extract_strided_slice %104 {offsets = [0, 9], sizes = [16, 1], strides = [1, 1]} : vector<16x16xf32> to vector<16x1xf32>
    %cst_73 = arith.constant 0.000000e+00 : f32
    %510 = vector.shape_cast %509 : vector<16x1xf32> to vector<16x1xf32>
    %511 = vector.broadcast %510 : vector<16x1xf32> to vector<16x64xf32>
    %512 = vector.broadcast %cst_73 : f32 to vector<16x64xf32>
    %513 = arith.select %508, %511, %512 : vector<16x64xi1>, vector<16x64xf32>
    %514 = arith.addf %504, %513 : vector<16x64xf32>
    %515 = vector.extract_strided_slice %125 {offsets = [0, 9], sizes = [16, 1], strides = [1, 1]} : vector<16x16xf32> to vector<16x1xf32>
    %516 = vector.broadcast %515 : vector<16x1xf32> to vector<16x64xf32>
    %517 = vector.broadcast %133 : vector<1x64xf32> to vector<16x64xf32>
    %518 = arith.cmpf oeq, %516, %517 : vector<16x64xf32>
    %519 = vector.extract_strided_slice %110 {offsets = [0, 9], sizes = [16, 1], strides = [1, 1]} : vector<16x16xf32> to vector<16x1xf32>
    %cst_74 = arith.constant 0.000000e+00 : f32
    %520 = vector.shape_cast %519 : vector<16x1xf32> to vector<16x1xf32>
    %521 = vector.broadcast %520 : vector<16x1xf32> to vector<16x64xf32>
    %522 = vector.broadcast %cst_74 : f32 to vector<16x64xf32>
    %523 = arith.select %518, %521, %522 : vector<16x64xi1>, vector<16x64xf32>
    %524 = arith.addf %514, %523 : vector<16x64xf32>
    %525 = vector.extract_strided_slice %127 {offsets = [0, 9], sizes = [16, 1], strides = [1, 1]} : vector<16x16xf32> to vector<16x1xf32>
    %526 = vector.broadcast %525 : vector<16x1xf32> to vector<16x64xf32>
    %527 = vector.broadcast %133 : vector<1x64xf32> to vector<16x64xf32>
    %528 = arith.cmpf oeq, %526, %527 : vector<16x64xf32>
    %529 = vector.extract_strided_slice %116 {offsets = [0, 9], sizes = [16, 1], strides = [1, 1]} : vector<16x16xf32> to vector<16x1xf32>
    %cst_75 = arith.constant 0.000000e+00 : f32
    %530 = vector.shape_cast %529 : vector<16x1xf32> to vector<16x1xf32>
    %531 = vector.broadcast %530 : vector<16x1xf32> to vector<16x64xf32>
    %532 = vector.broadcast %cst_75 : f32 to vector<16x64xf32>
    %533 = arith.select %528, %531, %532 : vector<16x64xi1>, vector<16x64xf32>
    %534 = arith.addf %524, %533 : vector<16x64xf32>
    %535 = vector.extract_strided_slice %131 {offsets = [0, 9], sizes = [16, 1], strides = [1, 1]} : vector<16x16xf32> to vector<16x1xf32>
    %536 = vector.broadcast %535 : vector<16x1xf32> to vector<16x64xf32>
    %537 = vector.broadcast %133 : vector<1x64xf32> to vector<16x64xf32>
    %538 = arith.cmpf oeq, %536, %537 : vector<16x64xf32>
    %539 = vector.extract_strided_slice %120 {offsets = [0, 9], sizes = [16, 1], strides = [1, 1]} : vector<16x16xf32> to vector<16x1xf32>
    %cst_76 = arith.constant 0.000000e+00 : f32
    %540 = vector.shape_cast %539 : vector<16x1xf32> to vector<16x1xf32>
    %541 = vector.broadcast %540 : vector<16x1xf32> to vector<16x64xf32>
    %542 = vector.broadcast %cst_76 : f32 to vector<16x64xf32>
    %543 = arith.select %538, %541, %542 : vector<16x64xi1>, vector<16x64xf32>
    %544 = arith.addf %534, %543 : vector<16x64xf32>
    %cst_77 = arith.constant 0.000000e+00 : f32
    %545 = vector.broadcast %cst_77 : f32 to vector<16x16xf32>
    %546 = vector.extract_strided_slice %123 {offsets = [0, 10], sizes = [16, 1], strides = [1, 1]} : vector<16x16xf32> to vector<16x1xf32>
    %547 = vector.broadcast %546 : vector<16x1xf32> to vector<16x16xf32>
    %548 = vector.broadcast %135 : vector<1x16xf32> to vector<16x16xf32>
    %549 = arith.cmpf oeq, %547, %548 : vector<16x16xf32>
    %550 = vector.extract_strided_slice %104 {offsets = [0, 10], sizes = [16, 1], strides = [1, 1]} : vector<16x16xf32> to vector<16x1xf32>
    %cst_78 = arith.constant 0.000000e+00 : f32
    %551 = vector.shape_cast %550 : vector<16x1xf32> to vector<16x1xf32>
    %552 = vector.broadcast %551 : vector<16x1xf32> to vector<16x16xf32>
    %553 = vector.broadcast %cst_78 : f32 to vector<16x16xf32>
    %554 = arith.select %549, %552, %553 : vector<16x16xi1>, vector<16x16xf32>
    %555 = arith.addf %545, %554 : vector<16x16xf32>
    %556 = vector.extract_strided_slice %125 {offsets = [0, 10], sizes = [16, 1], strides = [1, 1]} : vector<16x16xf32> to vector<16x1xf32>
    %557 = vector.broadcast %556 : vector<16x1xf32> to vector<16x16xf32>
    %558 = vector.broadcast %135 : vector<1x16xf32> to vector<16x16xf32>
    %559 = arith.cmpf oeq, %557, %558 : vector<16x16xf32>
    %560 = vector.extract_strided_slice %110 {offsets = [0, 10], sizes = [16, 1], strides = [1, 1]} : vector<16x16xf32> to vector<16x1xf32>
    %cst_79 = arith.constant 0.000000e+00 : f32
    %561 = vector.shape_cast %560 : vector<16x1xf32> to vector<16x1xf32>
    %562 = vector.broadcast %561 : vector<16x1xf32> to vector<16x16xf32>
    %563 = vector.broadcast %cst_79 : f32 to vector<16x16xf32>
    %564 = arith.select %559, %562, %563 : vector<16x16xi1>, vector<16x16xf32>
    %565 = arith.addf %555, %564 : vector<16x16xf32>
    %566 = vector.extract_strided_slice %127 {offsets = [0, 10], sizes = [16, 1], strides = [1, 1]} : vector<16x16xf32> to vector<16x1xf32>
    %567 = vector.broadcast %566 : vector<16x1xf32> to vector<16x16xf32>
    %568 = vector.broadcast %135 : vector<1x16xf32> to vector<16x16xf32>
    %569 = arith.cmpf oeq, %567, %568 : vector<16x16xf32>
    %570 = vector.extract_strided_slice %116 {offsets = [0, 10], sizes = [16, 1], strides = [1, 1]} : vector<16x16xf32> to vector<16x1xf32>
    %cst_80 = arith.constant 0.000000e+00 : f32
    %571 = vector.shape_cast %570 : vector<16x1xf32> to vector<16x1xf32>
    %572 = vector.broadcast %571 : vector<16x1xf32> to vector<16x16xf32>
    %573 = vector.broadcast %cst_80 : f32 to vector<16x16xf32>
    %574 = arith.select %569, %572, %573 : vector<16x16xi1>, vector<16x16xf32>
    %575 = arith.addf %565, %574 : vector<16x16xf32>
    %576 = vector.extract_strided_slice %131 {offsets = [0, 10], sizes = [16, 1], strides = [1, 1]} : vector<16x16xf32> to vector<16x1xf32>
    %577 = vector.broadcast %576 : vector<16x1xf32> to vector<16x16xf32>
    %578 = vector.broadcast %135 : vector<1x16xf32> to vector<16x16xf32>
    %579 = arith.cmpf oeq, %577, %578 : vector<16x16xf32>
    %580 = vector.extract_strided_slice %120 {offsets = [0, 10], sizes = [16, 1], strides = [1, 1]} : vector<16x16xf32> to vector<16x1xf32>
    %cst_81 = arith.constant 0.000000e+00 : f32
    %581 = vector.shape_cast %580 : vector<16x1xf32> to vector<16x1xf32>
    %582 = vector.broadcast %581 : vector<16x1xf32> to vector<16x16xf32>
    %583 = vector.broadcast %cst_81 : f32 to vector<16x16xf32>
    %584 = arith.select %579, %582, %583 : vector<16x16xi1>, vector<16x16xf32>
    %585 = arith.addf %575, %584 : vector<16x16xf32>
    %586 = vector.extract_strided_slice %123 {offsets = [0, 11], sizes = [16, 1], strides = [1, 1]} : vector<16x16xf32> to vector<16x1xf32>
    %587 = vector.broadcast %586 : vector<16x1xf32> to vector<16x16xf32>
    %588 = vector.broadcast %135 : vector<1x16xf32> to vector<16x16xf32>
    %589 = arith.cmpf oeq, %587, %588 : vector<16x16xf32>
    %590 = vector.extract_strided_slice %104 {offsets = [0, 11], sizes = [16, 1], strides = [1, 1]} : vector<16x16xf32> to vector<16x1xf32>
    %cst_82 = arith.constant 0.000000e+00 : f32
    %591 = vector.shape_cast %590 : vector<16x1xf32> to vector<16x1xf32>
    %592 = vector.broadcast %591 : vector<16x1xf32> to vector<16x16xf32>
    %593 = vector.broadcast %cst_82 : f32 to vector<16x16xf32>
    %594 = arith.select %589, %592, %593 : vector<16x16xi1>, vector<16x16xf32>
    %595 = arith.addf %585, %594 : vector<16x16xf32>
    %596 = vector.extract_strided_slice %125 {offsets = [0, 11], sizes = [16, 1], strides = [1, 1]} : vector<16x16xf32> to vector<16x1xf32>
    %597 = vector.broadcast %596 : vector<16x1xf32> to vector<16x16xf32>
    %598 = vector.broadcast %135 : vector<1x16xf32> to vector<16x16xf32>
    %599 = arith.cmpf oeq, %597, %598 : vector<16x16xf32>
    %600 = vector.extract_strided_slice %110 {offsets = [0, 11], sizes = [16, 1], strides = [1, 1]} : vector<16x16xf32> to vector<16x1xf32>
    %cst_83 = arith.constant 0.000000e+00 : f32
    %601 = vector.shape_cast %600 : vector<16x1xf32> to vector<16x1xf32>
    %602 = vector.broadcast %601 : vector<16x1xf32> to vector<16x16xf32>
    %603 = vector.broadcast %cst_83 : f32 to vector<16x16xf32>
    %604 = arith.select %599, %602, %603 : vector<16x16xi1>, vector<16x16xf32>
    %605 = arith.addf %595, %604 : vector<16x16xf32>
    %606 = vector.extract_strided_slice %127 {offsets = [0, 11], sizes = [16, 1], strides = [1, 1]} : vector<16x16xf32> to vector<16x1xf32>
    %607 = vector.broadcast %606 : vector<16x1xf32> to vector<16x16xf32>
    %608 = vector.broadcast %135 : vector<1x16xf32> to vector<16x16xf32>
    %609 = arith.cmpf oeq, %607, %608 : vector<16x16xf32>
    %610 = vector.extract_strided_slice %116 {offsets = [0, 11], sizes = [16, 1], strides = [1, 1]} : vector<16x16xf32> to vector<16x1xf32>
    %cst_84 = arith.constant 0.000000e+00 : f32
    %611 = vector.shape_cast %610 : vector<16x1xf32> to vector<16x1xf32>
    %612 = vector.broadcast %611 : vector<16x1xf32> to vector<16x16xf32>
    %613 = vector.broadcast %cst_84 : f32 to vector<16x16xf32>
    %614 = arith.select %609, %612, %613 : vector<16x16xi1>, vector<16x16xf32>
    %615 = arith.addf %605, %614 : vector<16x16xf32>
    %616 = vector.extract_strided_slice %131 {offsets = [0, 11], sizes = [16, 1], strides = [1, 1]} : vector<16x16xf32> to vector<16x1xf32>
    %617 = vector.broadcast %616 : vector<16x1xf32> to vector<16x16xf32>
    %618 = vector.broadcast %135 : vector<1x16xf32> to vector<16x16xf32>
    %619 = arith.cmpf oeq, %617, %618 : vector<16x16xf32>
    %620 = vector.extract_strided_slice %120 {offsets = [0, 11], sizes = [16, 1], strides = [1, 1]} : vector<16x16xf32> to vector<16x1xf32>
    %cst_85 = arith.constant 0.000000e+00 : f32
    %621 = vector.shape_cast %620 : vector<16x1xf32> to vector<16x1xf32>
    %622 = vector.broadcast %621 : vector<16x1xf32> to vector<16x16xf32>
    %623 = vector.broadcast %cst_85 : f32 to vector<16x16xf32>
    %624 = arith.select %619, %622, %623 : vector<16x16xi1>, vector<16x16xf32>
    %625 = arith.addf %615, %624 : vector<16x16xf32>
    %626 = tpu.concatenate %544, %625 in 1 : vector<16x64xf32>, vector<16x16xf32> -> vector<16x80xf32>
    %627 = arith.truncf %626 : vector<16x80xf32> to vector<16x80xbf16>
    %cst_86 = arith.constant 0.000000e+00 : f32
    %628 = vector.broadcast %cst_86 : f32 to vector<16x64xf32>
    %629 = vector.extract_strided_slice %123 {offsets = [0, 12], sizes = [16, 1], strides = [1, 1]} : vector<16x16xf32> to vector<16x1xf32>
    %630 = vector.broadcast %629 : vector<16x1xf32> to vector<16x64xf32>
    %631 = vector.broadcast %133 : vector<1x64xf32> to vector<16x64xf32>
    %632 = arith.cmpf oeq, %630, %631 : vector<16x64xf32>
    %633 = vector.extract_strided_slice %104 {offsets = [0, 12], sizes = [16, 1], strides = [1, 1]} : vector<16x16xf32> to vector<16x1xf32>
    %cst_87 = arith.constant 0.000000e+00 : f32
    %634 = vector.shape_cast %633 : vector<16x1xf32> to vector<16x1xf32>
    %635 = vector.broadcast %634 : vector<16x1xf32> to vector<16x64xf32>
    %636 = vector.broadcast %cst_87 : f32 to vector<16x64xf32>
    %637 = arith.select %632, %635, %636 : vector<16x64xi1>, vector<16x64xf32>
    %638 = arith.addf %628, %637 : vector<16x64xf32>
    %639 = vector.extract_strided_slice %125 {offsets = [0, 12], sizes = [16, 1], strides = [1, 1]} : vector<16x16xf32> to vector<16x1xf32>
    %640 = vector.broadcast %639 : vector<16x1xf32> to vector<16x64xf32>
    %641 = vector.broadcast %133 : vector<1x64xf32> to vector<16x64xf32>
    %642 = arith.cmpf oeq, %640, %641 : vector<16x64xf32>
    %643 = vector.extract_strided_slice %110 {offsets = [0, 12], sizes = [16, 1], strides = [1, 1]} : vector<16x16xf32> to vector<16x1xf32>
    %cst_88 = arith.constant 0.000000e+00 : f32
    %644 = vector.shape_cast %643 : vector<16x1xf32> to vector<16x1xf32>
    %645 = vector.broadcast %644 : vector<16x1xf32> to vector<16x64xf32>
    %646 = vector.broadcast %cst_88 : f32 to vector<16x64xf32>
    %647 = arith.select %642, %645, %646 : vector<16x64xi1>, vector<16x64xf32>
    %648 = arith.addf %638, %647 : vector<16x64xf32>
    %649 = vector.extract_strided_slice %127 {offsets = [0, 12], sizes = [16, 1], strides = [1, 1]} : vector<16x16xf32> to vector<16x1xf32>
    %650 = vector.broadcast %649 : vector<16x1xf32> to vector<16x64xf32>
    %651 = vector.broadcast %133 : vector<1x64xf32> to vector<16x64xf32>
    %652 = arith.cmpf oeq, %650, %651 : vector<16x64xf32>
    %653 = vector.extract_strided_slice %116 {offsets = [0, 12], sizes = [16, 1], strides = [1, 1]} : vector<16x16xf32> to vector<16x1xf32>
    %cst_89 = arith.constant 0.000000e+00 : f32
    %654 = vector.shape_cast %653 : vector<16x1xf32> to vector<16x1xf32>
    %655 = vector.broadcast %654 : vector<16x1xf32> to vector<16x64xf32>
    %656 = vector.broadcast %cst_89 : f32 to vector<16x64xf32>
    %657 = arith.select %652, %655, %656 : vector<16x64xi1>, vector<16x64xf32>
    %658 = arith.addf %648, %657 : vector<16x64xf32>
    %659 = vector.extract_strided_slice %131 {offsets = [0, 12], sizes = [16, 1], strides = [1, 1]} : vector<16x16xf32> to vector<16x1xf32>
    %660 = vector.broadcast %659 : vector<16x1xf32> to vector<16x64xf32>
    %661 = vector.broadcast %133 : vector<1x64xf32> to vector<16x64xf32>
    %662 = arith.cmpf oeq, %660, %661 : vector<16x64xf32>
    %663 = vector.extract_strided_slice %120 {offsets = [0, 12], sizes = [16, 1], strides = [1, 1]} : vector<16x16xf32> to vector<16x1xf32>
    %cst_90 = arith.constant 0.000000e+00 : f32
    %664 = vector.shape_cast %663 : vector<16x1xf32> to vector<16x1xf32>
    %665 = vector.broadcast %664 : vector<16x1xf32> to vector<16x64xf32>
    %666 = vector.broadcast %cst_90 : f32 to vector<16x64xf32>
    %667 = arith.select %662, %665, %666 : vector<16x64xi1>, vector<16x64xf32>
    %668 = arith.addf %658, %667 : vector<16x64xf32>
    %669 = vector.extract_strided_slice %123 {offsets = [0, 13], sizes = [16, 1], strides = [1, 1]} : vector<16x16xf32> to vector<16x1xf32>
    %670 = vector.broadcast %669 : vector<16x1xf32> to vector<16x64xf32>
    %671 = vector.broadcast %133 : vector<1x64xf32> to vector<16x64xf32>
    %672 = arith.cmpf oeq, %670, %671 : vector<16x64xf32>
    %673 = vector.extract_strided_slice %104 {offsets = [0, 13], sizes = [16, 1], strides = [1, 1]} : vector<16x16xf32> to vector<16x1xf32>
    %cst_91 = arith.constant 0.000000e+00 : f32
    %674 = vector.shape_cast %673 : vector<16x1xf32> to vector<16x1xf32>
    %675 = vector.broadcast %674 : vector<16x1xf32> to vector<16x64xf32>
    %676 = vector.broadcast %cst_91 : f32 to vector<16x64xf32>
    %677 = arith.select %672, %675, %676 : vector<16x64xi1>, vector<16x64xf32>
    %678 = arith.addf %668, %677 : vector<16x64xf32>
    %679 = vector.extract_strided_slice %125 {offsets = [0, 13], sizes = [16, 1], strides = [1, 1]} : vector<16x16xf32> to vector<16x1xf32>
    %680 = vector.broadcast %679 : vector<16x1xf32> to vector<16x64xf32>
    %681 = vector.broadcast %133 : vector<1x64xf32> to vector<16x64xf32>
    %682 = arith.cmpf oeq, %680, %681 : vector<16x64xf32>
    %683 = vector.extract_strided_slice %110 {offsets = [0, 13], sizes = [16, 1], strides = [1, 1]} : vector<16x16xf32> to vector<16x1xf32>
    %cst_92 = arith.constant 0.000000e+00 : f32
    %684 = vector.shape_cast %683 : vector<16x1xf32> to vector<16x1xf32>
    %685 = vector.broadcast %684 : vector<16x1xf32> to vector<16x64xf32>
    %686 = vector.broadcast %cst_92 : f32 to vector<16x64xf32>
    %687 = arith.select %682, %685, %686 : vector<16x64xi1>, vector<16x64xf32>
    %688 = arith.addf %678, %687 : vector<16x64xf32>
    %689 = vector.extract_strided_slice %127 {offsets = [0, 13], sizes = [16, 1], strides = [1, 1]} : vector<16x16xf32> to vector<16x1xf32>
    %690 = vector.broadcast %689 : vector<16x1xf32> to vector<16x64xf32>
    %691 = vector.broadcast %133 : vector<1x64xf32> to vector<16x64xf32>
    %692 = arith.cmpf oeq, %690, %691 : vector<16x64xf32>
    %693 = vector.extract_strided_slice %116 {offsets = [0, 13], sizes = [16, 1], strides = [1, 1]} : vector<16x16xf32> to vector<16x1xf32>
    %cst_93 = arith.constant 0.000000e+00 : f32
    %694 = vector.shape_cast %693 : vector<16x1xf32> to vector<16x1xf32>
    %695 = vector.broadcast %694 : vector<16x1xf32> to vector<16x64xf32>
    %696 = vector.broadcast %cst_93 : f32 to vector<16x64xf32>
    %697 = arith.select %692, %695, %696 : vector<16x64xi1>, vector<16x64xf32>
    %698 = arith.addf %688, %697 : vector<16x64xf32>
    %699 = vector.extract_strided_slice %131 {offsets = [0, 13], sizes = [16, 1], strides = [1, 1]} : vector<16x16xf32> to vector<16x1xf32>
    %700 = vector.broadcast %699 : vector<16x1xf32> to vector<16x64xf32>
    %701 = vector.broadcast %133 : vector<1x64xf32> to vector<16x64xf32>
    %702 = arith.cmpf oeq, %700, %701 : vector<16x64xf32>
    %703 = vector.extract_strided_slice %120 {offsets = [0, 13], sizes = [16, 1], strides = [1, 1]} : vector<16x16xf32> to vector<16x1xf32>
    %cst_94 = arith.constant 0.000000e+00 : f32
    %704 = vector.shape_cast %703 : vector<16x1xf32> to vector<16x1xf32>
    %705 = vector.broadcast %704 : vector<16x1xf32> to vector<16x64xf32>
    %706 = vector.broadcast %cst_94 : f32 to vector<16x64xf32>
    %707 = arith.select %702, %705, %706 : vector<16x64xi1>, vector<16x64xf32>
    %708 = arith.addf %698, %707 : vector<16x64xf32>
    %cst_95 = arith.constant 0.000000e+00 : f32
    %709 = vector.broadcast %cst_95 : f32 to vector<16x16xf32>
    %710 = vector.extract_strided_slice %123 {offsets = [0, 14], sizes = [16, 1], strides = [1, 1]} : vector<16x16xf32> to vector<16x1xf32>
    %711 = vector.broadcast %710 : vector<16x1xf32> to vector<16x16xf32>
    %712 = vector.broadcast %135 : vector<1x16xf32> to vector<16x16xf32>
    %713 = arith.cmpf oeq, %711, %712 : vector<16x16xf32>
    %714 = vector.extract_strided_slice %104 {offsets = [0, 14], sizes = [16, 1], strides = [1, 1]} : vector<16x16xf32> to vector<16x1xf32>
    %cst_96 = arith.constant 0.000000e+00 : f32
    %715 = vector.shape_cast %714 : vector<16x1xf32> to vector<16x1xf32>
    %716 = vector.broadcast %715 : vector<16x1xf32> to vector<16x16xf32>
    %717 = vector.broadcast %cst_96 : f32 to vector<16x16xf32>
    %718 = arith.select %713, %716, %717 : vector<16x16xi1>, vector<16x16xf32>
    %719 = arith.addf %709, %718 : vector<16x16xf32>
    %720 = vector.extract_strided_slice %125 {offsets = [0, 14], sizes = [16, 1], strides = [1, 1]} : vector<16x16xf32> to vector<16x1xf32>
    %721 = vector.broadcast %720 : vector<16x1xf32> to vector<16x16xf32>
    %722 = vector.broadcast %135 : vector<1x16xf32> to vector<16x16xf32>
    %723 = arith.cmpf oeq, %721, %722 : vector<16x16xf32>
    %724 = vector.extract_strided_slice %110 {offsets = [0, 14], sizes = [16, 1], strides = [1, 1]} : vector<16x16xf32> to vector<16x1xf32>
    %cst_97 = arith.constant 0.000000e+00 : f32
    %725 = vector.shape_cast %724 : vector<16x1xf32> to vector<16x1xf32>
    %726 = vector.broadcast %725 : vector<16x1xf32> to vector<16x16xf32>
    %727 = vector.broadcast %cst_97 : f32 to vector<16x16xf32>
    %728 = arith.select %723, %726, %727 : vector<16x16xi1>, vector<16x16xf32>
    %729 = arith.addf %719, %728 : vector<16x16xf32>
    %730 = vector.extract_strided_slice %127 {offsets = [0, 14], sizes = [16, 1], strides = [1, 1]} : vector<16x16xf32> to vector<16x1xf32>
    %731 = vector.broadcast %730 : vector<16x1xf32> to vector<16x16xf32>
    %732 = vector.broadcast %135 : vector<1x16xf32> to vector<16x16xf32>
    %733 = arith.cmpf oeq, %731, %732 : vector<16x16xf32>
    %734 = vector.extract_strided_slice %116 {offsets = [0, 14], sizes = [16, 1], strides = [1, 1]} : vector<16x16xf32> to vector<16x1xf32>
    %cst_98 = arith.constant 0.000000e+00 : f32
    %735 = vector.shape_cast %734 : vector<16x1xf32> to vector<16x1xf32>
    %736 = vector.broadcast %735 : vector<16x1xf32> to vector<16x16xf32>
    %737 = vector.broadcast %cst_98 : f32 to vector<16x16xf32>
    %738 = arith.select %733, %736, %737 : vector<16x16xi1>, vector<16x16xf32>
    %739 = arith.addf %729, %738 : vector<16x16xf32>
    %740 = vector.extract_strided_slice %131 {offsets = [0, 14], sizes = [16, 1], strides = [1, 1]} : vector<16x16xf32> to vector<16x1xf32>
    %741 = vector.broadcast %740 : vector<16x1xf32> to vector<16x16xf32>
    %742 = vector.broadcast %135 : vector<1x16xf32> to vector<16x16xf32>
    %743 = arith.cmpf oeq, %741, %742 : vector<16x16xf32>
    %744 = vector.extract_strided_slice %120 {offsets = [0, 14], sizes = [16, 1], strides = [1, 1]} : vector<16x16xf32> to vector<16x1xf32>
    %cst_99 = arith.constant 0.000000e+00 : f32
    %745 = vector.shape_cast %744 : vector<16x1xf32> to vector<16x1xf32>
    %746 = vector.broadcast %745 : vector<16x1xf32> to vector<16x16xf32>
    %747 = vector.broadcast %cst_99 : f32 to vector<16x16xf32>
    %748 = arith.select %743, %746, %747 : vector<16x16xi1>, vector<16x16xf32>
    %749 = arith.addf %739, %748 : vector<16x16xf32>
    %750 = vector.extract_strided_slice %123 {offsets = [0, 15], sizes = [16, 1], strides = [1, 1]} : vector<16x16xf32> to vector<16x1xf32>
    %751 = vector.broadcast %750 : vector<16x1xf32> to vector<16x16xf32>
    %752 = vector.broadcast %135 : vector<1x16xf32> to vector<16x16xf32>
    %753 = arith.cmpf oeq, %751, %752 : vector<16x16xf32>
    %754 = vector.extract_strided_slice %104 {offsets = [0, 15], sizes = [16, 1], strides = [1, 1]} : vector<16x16xf32> to vector<16x1xf32>
    %cst_100 = arith.constant 0.000000e+00 : f32
    %755 = vector.shape_cast %754 : vector<16x1xf32> to vector<16x1xf32>
    %756 = vector.broadcast %755 : vector<16x1xf32> to vector<16x16xf32>
    %757 = vector.broadcast %cst_100 : f32 to vector<16x16xf32>
    %758 = arith.select %753, %756, %757 : vector<16x16xi1>, vector<16x16xf32>
    %759 = arith.addf %749, %758 : vector<16x16xf32>
    %760 = vector.extract_strided_slice %125 {offsets = [0, 15], sizes = [16, 1], strides = [1, 1]} : vector<16x16xf32> to vector<16x1xf32>
    %761 = vector.broadcast %760 : vector<16x1xf32> to vector<16x16xf32>
    %762 = vector.broadcast %135 : vector<1x16xf32> to vector<16x16xf32>
    %763 = arith.cmpf oeq, %761, %762 : vector<16x16xf32>
    %764 = vector.extract_strided_slice %110 {offsets = [0, 15], sizes = [16, 1], strides = [1, 1]} : vector<16x16xf32> to vector<16x1xf32>
    %cst_101 = arith.constant 0.000000e+00 : f32
    %765 = vector.shape_cast %764 : vector<16x1xf32> to vector<16x1xf32>
    %766 = vector.broadcast %765 : vector<16x1xf32> to vector<16x16xf32>
    %767 = vector.broadcast %cst_101 : f32 to vector<16x16xf32>
    %768 = arith.select %763, %766, %767 : vector<16x16xi1>, vector<16x16xf32>
    %769 = arith.addf %759, %768 : vector<16x16xf32>
    %770 = vector.extract_strided_slice %127 {offsets = [0, 15], sizes = [16, 1], strides = [1, 1]} : vector<16x16xf32> to vector<16x1xf32>
    %771 = vector.broadcast %770 : vector<16x1xf32> to vector<16x16xf32>
    %772 = vector.broadcast %135 : vector<1x16xf32> to vector<16x16xf32>
    %773 = arith.cmpf oeq, %771, %772 : vector<16x16xf32>
    %774 = vector.extract_strided_slice %116 {offsets = [0, 15], sizes = [16, 1], strides = [1, 1]} : vector<16x16xf32> to vector<16x1xf32>
    %cst_102 = arith.constant 0.000000e+00 : f32
    %775 = vector.shape_cast %774 : vector<16x1xf32> to vector<16x1xf32>
    %776 = vector.broadcast %775 : vector<16x1xf32> to vector<16x16xf32>
    %777 = vector.broadcast %cst_102 : f32 to vector<16x16xf32>
    %778 = arith.select %773, %776, %777 : vector<16x16xi1>, vector<16x16xf32>
    %779 = arith.addf %769, %778 : vector<16x16xf32>
    %780 = vector.extract_strided_slice %131 {offsets = [0, 15], sizes = [16, 1], strides = [1, 1]} : vector<16x16xf32> to vector<16x1xf32>
    %781 = vector.broadcast %780 : vector<16x1xf32> to vector<16x16xf32>
    %782 = vector.broadcast %135 : vector<1x16xf32> to vector<16x16xf32>
    %783 = arith.cmpf oeq, %781, %782 : vector<16x16xf32>
    %784 = vector.extract_strided_slice %120 {offsets = [0, 15], sizes = [16, 1], strides = [1, 1]} : vector<16x16xf32> to vector<16x1xf32>
    %cst_103 = arith.constant 0.000000e+00 : f32
    %785 = vector.shape_cast %784 : vector<16x1xf32> to vector<16x1xf32>
    %786 = vector.broadcast %785 : vector<16x1xf32> to vector<16x16xf32>
    %787 = vector.broadcast %cst_103 : f32 to vector<16x16xf32>
    %788 = arith.select %783, %786, %787 : vector<16x16xi1>, vector<16x16xf32>
    %789 = arith.addf %779, %788 : vector<16x16xf32>
    %790 = tpu.concatenate %708, %789 in 1 : vector<16x64xf32>, vector<16x16xf32> -> vector<16x80xf32>
    %791 = arith.truncf %790 : vector<16x80xf32> to vector<16x80xbf16>
    %792 = vector.extract_strided_slice %299 {offsets = [0, 0], sizes = [8, 80], strides = [1, 1]} : vector<16x80xbf16> to vector<8x80xbf16>
    %793 = vector.extract_strided_slice %7 {offsets = [0, 0], sizes = [80, 8], strides = [1, 1]} : vector<160x32xbf16> to vector<80x8xbf16>
    %cst_104 = arith.constant dense<0.000000e+00> : vector<8x8xf32>
    %794 = tpu.matmul %792, %793, %cst_104 {dimension_numbers = #tpu.dot_dimension_numbers<[1], [0], [0], [1], [0, 0, 1, 1], [], []>} : vector<8x80xbf16>, vector<80x8xbf16>, vector<8x8xf32> -> vector<8x8xf32>
    %795 = vector.extract_strided_slice %463 {offsets = [0, 0], sizes = [8, 80], strides = [1, 1]} : vector<16x80xbf16> to vector<8x80xbf16>
    %796 = vector.extract_strided_slice %7 {offsets = [0, 8], sizes = [80, 8], strides = [1, 1]} : vector<160x32xbf16> to vector<80x8xbf16>
    %cst_105 = arith.constant dense<0.000000e+00> : vector<8x8xf32>
    %797 = tpu.matmul %795, %796, %cst_105 {dimension_numbers = #tpu.dot_dimension_numbers<[1], [0], [0], [1], [0, 0, 1, 1], [], []>} : vector<8x80xbf16>, vector<80x8xbf16>, vector<8x8xf32> -> vector<8x8xf32>
    %798 = vector.extract_strided_slice %627 {offsets = [0, 0], sizes = [8, 80], strides = [1, 1]} : vector<16x80xbf16> to vector<8x80xbf16>
    %799 = vector.extract_strided_slice %7 {offsets = [0, 16], sizes = [80, 8], strides = [1, 1]} : vector<160x32xbf16> to vector<80x8xbf16>
    %cst_106 = arith.constant dense<0.000000e+00> : vector<8x8xf32>
    %800 = tpu.matmul %798, %799, %cst_106 {dimension_numbers = #tpu.dot_dimension_numbers<[1], [0], [0], [1], [0, 0, 1, 1], [], []>} : vector<8x80xbf16>, vector<80x8xbf16>, vector<8x8xf32> -> vector<8x8xf32>
    %801 = vector.extract_strided_slice %791 {offsets = [0, 0], sizes = [8, 80], strides = [1, 1]} : vector<16x80xbf16> to vector<8x80xbf16>
    %802 = vector.extract_strided_slice %7 {offsets = [0, 24], sizes = [80, 8], strides = [1, 1]} : vector<160x32xbf16> to vector<80x8xbf16>
    %cst_107 = arith.constant dense<0.000000e+00> : vector<8x8xf32>
    %803 = tpu.matmul %801, %802, %cst_107 {dimension_numbers = #tpu.dot_dimension_numbers<[1], [0], [0], [1], [0, 0, 1, 1], [], []>} : vector<8x80xbf16>, vector<80x8xbf16>, vector<8x8xf32> -> vector<8x8xf32>
    %804 = tpu.concatenate %794, %797, %800, %803 in 1 : vector<8x8xf32>, vector<8x8xf32>, vector<8x8xf32>, vector<8x8xf32> -> vector<8x32xf32>
    %805 = vector.extract_strided_slice %299 {offsets = [8, 0], sizes = [8, 80], strides = [1, 1]} : vector<16x80xbf16> to vector<8x80xbf16>
    %806 = vector.extract_strided_slice %7 {offsets = [80, 0], sizes = [80, 8], strides = [1, 1]} : vector<160x32xbf16> to vector<80x8xbf16>
    %cst_108 = arith.constant dense<0.000000e+00> : vector<8x8xf32>
    %807 = tpu.matmul %805, %806, %cst_108 {dimension_numbers = #tpu.dot_dimension_numbers<[1], [0], [0], [1], [0, 0, 1, 1], [], []>} : vector<8x80xbf16>, vector<80x8xbf16>, vector<8x8xf32> -> vector<8x8xf32>
    %808 = vector.extract_strided_slice %463 {offsets = [8, 0], sizes = [8, 80], strides = [1, 1]} : vector<16x80xbf16> to vector<8x80xbf16>
    %809 = vector.extract_strided_slice %7 {offsets = [80, 8], sizes = [80, 8], strides = [1, 1]} : vector<160x32xbf16> to vector<80x8xbf16>
    %cst_109 = arith.constant dense<0.000000e+00> : vector<8x8xf32>
    %810 = tpu.matmul %808, %809, %cst_109 {dimension_numbers = #tpu.dot_dimension_numbers<[1], [0], [0], [1], [0, 0, 1, 1], [], []>} : vector<8x80xbf16>, vector<80x8xbf16>, vector<8x8xf32> -> vector<8x8xf32>
    %811 = vector.extract_strided_slice %627 {offsets = [8, 0], sizes = [8, 80], strides = [1, 1]} : vector<16x80xbf16> to vector<8x80xbf16>
    %812 = vector.extract_strided_slice %7 {offsets = [80, 16], sizes = [80, 8], strides = [1, 1]} : vector<160x32xbf16> to vector<80x8xbf16>
    %cst_110 = arith.constant dense<0.000000e+00> : vector<8x8xf32>
    %813 = tpu.matmul %811, %812, %cst_110 {dimension_numbers = #tpu.dot_dimension_numbers<[1], [0], [0], [1], [0, 0, 1, 1], [], []>} : vector<8x80xbf16>, vector<80x8xbf16>, vector<8x8xf32> -> vector<8x8xf32>
    %814 = vector.extract_strided_slice %791 {offsets = [8, 0], sizes = [8, 80], strides = [1, 1]} : vector<16x80xbf16> to vector<8x80xbf16>
    %815 = vector.extract_strided_slice %7 {offsets = [80, 24], sizes = [80, 8], strides = [1, 1]} : vector<160x32xbf16> to vector<80x8xbf16>
    %cst_111 = arith.constant dense<0.000000e+00> : vector<8x8xf32>
    %816 = tpu.matmul %814, %815, %cst_111 {dimension_numbers = #tpu.dot_dimension_numbers<[1], [0], [0], [1], [0, 0, 1, 1], [], []>} : vector<8x80xbf16>, vector<80x8xbf16>, vector<8x8xf32> -> vector<8x8xf32>
    %817 = tpu.concatenate %807, %810, %813, %816 in 1 : vector<8x8xf32>, vector<8x8xf32>, vector<8x8xf32>, vector<8x8xf32> -> vector<8x32xf32>
    %818 = tpu.concatenate %804, %817 in 0 : vector<8x32xf32>, vector<8x32xf32> -> vector<16x32xf32>
    %c0_112 = arith.constant 0 : index
    %c0_113 = arith.constant 0 : index
    %819 = vector.load %arg7[%c0_112, %c0_113] : memref<32x32xf32, #tpu.memory_space<vmem>>, vector<32x32xf32>
    %cst_114 = arith.constant dense<0.000000e+00> : vector<16x32xf32>
    %820 = tpu.matmul %818, %819, %cst_114 {dimension_numbers = #tpu.dot_dimension_numbers<[1], [0], [0], [1], [0, 0, 1, 1], [], []>} : vector<16x32xf32>, vector<32x32xf32>, vector<16x32xf32> -> vector<16x32xf32>
    %c0_115 = arith.constant 0 : index
    %c0_116 = arith.constant 0 : index
    %821 = vector.load %arg8[%c0_115, %c0_116] : memref<1x32xf32, #tpu.memory_space<vmem>>, vector<1x32xf32>
    %822 = vector.broadcast %821 : vector<1x32xf32> to vector<16x32xf32>
    %823 = arith.addf %820, %822 : vector<16x32xf32>
    %c0_117 = arith.constant 0 : index
    %c0_118 = arith.constant 0 : index
    %824 = vector.load %arg9[%c0_117, %c0_118] : memref<16x32xf32, #tpu.memory_space<vmem>>, vector<16x32xf32>
    tpu.vector_store %arg9[%c0_117, %c0_118], %823 {strides = array<i32>} : memref<16x32xf32, #tpu.memory_space<vmem>>, vector<16x32xf32>,
    return
  }
  func.func @transform_0(%arg0: i32) -> (i32, i32) {
    %c0_i32 = arith.constant 0 : i32
    %c0_i32_0 = arith.constant 0 : i32
    %c0_i32_1 = arith.constant 0 : i32
    return %c0_i32, %c0_i32_0 : i32, i32
  }
  func.func @transform_1(%arg0: i32) -> (i32, i32) {
    %c0_i32 = arith.constant 0 : i32
    %c0_i32_0 = arith.constant 0 : i32
    %c0_i32_1 = arith.constant 0 : i32
    return %c0_i32, %c0_i32_0 : i32, i32
  }
  func.func @transform_2(%arg0: i32) -> (i32, i32) {
    %c0_i32 = arith.constant 0 : i32
    %c0_i32_0 = arith.constant 0 : i32
    %c0_i32_1 = arith.constant 0 : i32
    return %c0_i32, %c0_i32_0 : i32, i32
  }
  func.func @transform_3(%arg0: i32) -> (i32, i32) {
    %c0_i32 = arith.constant 0 : i32
    %c0_i32_0 = arith.constant 0 : i32
    %c0_i32_1 = arith.constant 0 : i32
    return %c0_i32, %c0_i32_0 : i32, i32
  }
  func.func @transform_4(%arg0: i32) -> (i32, i32) {
    %c0_i32 = arith.constant 0 : i32
    %c0_i32_0 = arith.constant 0 : i32
    %c0_i32_1 = arith.constant 0 : i32
    return %c0_i32, %c0_i32_0 : i32, i32
  }
  func.func @transform_5(%arg0: i32) -> (i32, i32) {
    %c0_i32 = arith.constant 0 : i32
    %c0_i32_0 = arith.constant 0 : i32
    %c0_i32_1 = arith.constant 0 : i32
    return %c0_i32, %c0_i32_0 : i32, i32
  }
  func.func @transform_6(%arg0: i32) -> (i32, i32) {
    %c0_i32 = arith.constant 0 : i32
    %c0_i32_0 = arith.constant 0 : i32
    %c0_i32_1 = arith.constant 0 : i32
    return %c0_i32, %c0_i32_0 : i32, i32
  }
  func.func @transform_7(%arg0: i32) -> (i32, i32) {
    %c0_i32 = arith.constant 0 : i32
    %c0_i32_0 = arith.constant 0 : i32
    %c0_i32_1 = arith.constant 0 : i32
    return %c0_i32, %c0_i32_0 : i32, i32
  }
  func.func @transform_8(%arg0: i32) -> (i32, i32) {
    %c0_i32 = arith.constant 0 : i32
    %c0_i32_0 = arith.constant 0 : i32
    %c0_i32_1 = arith.constant 0 : i32
    return %c0_i32, %c0_i32_0 : i32, i32
  }
}

</mosaic_0001>

<bundles_post_ra>
// kernel: tpu_custom_call.1
= control target key start
LH: loop header
LB: loop body
LE: loop exit
PB: predicated region body
PF: predicated region fallthrough
CT: control target
= control target key end

     0   :  { %vm59_vm0 = vcmask 326656   ;;  %v5297_v2 = vlaneseq  ;;  %s5286_s0 = inlined_call_operand.vmem [shape: f32[16,64], index: 0, kind: input, shape index: {}]   ;;  %s5287_s1 = inlined_call_operand.vmem [shape: f32[160,40], index: 1, kind: input, shape index: {}]   ;;  %s5288_s2 = inlined_call_operand.vmem [shape: f32[1,32], index: 2, kind: input, shape index: {}]   ;;  %s5289_s3 = inlined_call_operand.vmem [shape: f32[40,32], index: 3, kind: input, shape index: {}]   ;;  %s5290_s4 = inlined_call_operand.vmem [shape: f32[64,48], index: 4, kind: input, shape index: {}]   ;;  %s5291_s5 = inlined_call_operand.vmem [shape: f32[1,48], index: 5, kind: input, shape index: {}]   ;;  %s5292_s6 = inlined_call_operand.vmem [shape: f32[32,32], index: 6, kind: input, shape index: {}]   ;;  %s5293_s7 = inlined_call_operand.vmem [shape: f32[1,32], index: 7, kind: input, shape index: {}]   ;;  %s5294_s8 = inlined_call_operand.hbm [shape: f32[16,32], index: 8, kind: output, shape index: {}]  }
   0x1   :  { %v58_v0 = vld [vmem:[%s5289_s3 + $0x20] sm:$0xff]  ;;  %v57_v1 = vld [vmem:[%s5289_s3 + $0x18] sm:$0xff]  ;;  %v56_v4 = vld [vmem:[%s5289_s3 + $0x10] sm:$0xff] }
   0x2   :  { %2884 = vmatprep.subr.mxu0 %v58_v0  ;;  %v33_v3 = vld [vmem:[%s5287_s1] sm:$0xff]  ;;  %v565_v5 = vshrl.u32 %v5297_v2, 7  ;;  %v55_v6 = vld [vmem:[%s5289_s3 + $0x8] sm:$0xff]  ;;  %v302_v7 = vld [vmem:[%s5290_s4 + $0x38] sm:$0xff] }
   0x3   :  { %2885 = vmatpush3.msra.mxu0 %v58_v0  ;;  %2894 = vmatprep.mubr.msk.f32.mxu0 %vm59_vm0, %v33_v3  ;;  %v301_v8 = vld [vmem:[%s5290_s4 + $0x30] sm:$0xff]  ;;  %v54_v9 = vld [vmem:[%s5289_s3] sm:$0xff]  ;;  %v300_v11 = vld [vmem:[%s5290_s4 + $0x28] sm:$0xff] }
   0x4   :  { %2886 = vmatprep.subr.mxu0 %v57_v1  ;;  %2924 = vmatprep.subr.mxu1 %v302_v7  ;;  %v566_v10 = vsub.s32 0, %v565_v5  ;;  %v34_v12 = vld [vmem:[%s5287_s1 + $0x8] sm:$0xff]  ;;  %v53_v13 = vld [vmem:[%s5288_s2] sm:$0x1] }
   0x5   :  { %2887 = vmatpush3.msra.mxu0 %v57_v1  ;;  %2925 = vmatpush3.msra.mxu1 %v302_v7 }
   0x6   :  { %2888 = vmatprep.subr.mxu0 %v56_v4  ;;  %2926 = vmatprep.subr.mxu1 %v301_v8 }
   0x7   :  { %2889 = vmatpush3.msra.mxu0 %v56_v4 }
   0x8   :  { %2890 = vmatprep.subr.mxu0 %v55_v6 }
   0x9   :  { %2891 = vmatpush3.msra.mxu0 %v55_v6 }
   0xa   :  { %13 = vsyncpa [#allocation3], 0  ;;  %2892 = vmatprep.subr.mxu0 %v54_v9  ;;  %v35_v14 = vld [vmem:[%s5287_s1 + $0x10] sm:$0xff]  ;;  %2927 = vmatpush3.msra.mxu1 %v301_v8  ;;  %v299_v15 = vld [vmem:[%s5290_s4 + $0x20] sm:$0xff]  ;;  %v2781_v16 = vadd.f32 -1.0, %v53_v13  ;;  %vm310_vm1 = vcmask 523264   ;;  %v3451_v18 = vrot.slane %v53_v13, %v566_v10 }
   0xb   :  { %2893 = vmatpush3.msra.mxu0 %v54_v9  ;;  %2928 = vmatprep.subr.mxu1 %v300_v11  ;;  %v31_v17 = vld [vmem:[%s5286_s0] sm:$0xff]  ;;  %v298_v19 = vld [vmem:[%s5290_s4 + $0x18] sm:$0xff]  ;;  %v297_v23 = vld [vmem:[%s5290_s4 + $0x10] sm:$0xff]  ;;  %s3331_s17 = smov 16   ;;  %v5295_v32 = vmov 0.0   ;;  %s3333_s9 = smov 120  }
   0xc   :  { %2895 = vmatmul.mubr.msk.f32.vlgmr.msra.gmra.mxu0 %vm59_vm0, %v34_v12  ;;  %2929 = vmatpush3.msra.mxu1 %v300_v11  ;;  %v3457_v20 = vrot.slane %v2781_v16, %v566_v10  ;;  %v36_v21 = vld [vmem:[%s5287_s1 + $0x18] sm:$0xff]  ;;  %v37_v22 = vld [vmem:[%s5287_s1 + $0x20] sm:$0xff]  ;;  %v296_v24 = vld [vmem:[%s5290_s4 + $0x8] sm:$0xff]  ;;  %vm392_vm2 = vcmask 294144   ;;  %vm455_vm3 = vcmask 359744   ;;  %vm424_vm4 = vcmask 326944  }
   0xd   :  { %2897 = vmatprep.mubr.msk.f32.mxu0 %vm59_vm0, %v35_v14  ;;  %2930 = vmatprep.subr.mxu1 %v299_v15  ;;  %v38_v25 = vld [vmem:[%s5287_s1 + $0x28] sm:$0xff]  ;;  %v39_v26 = vld [vmem:[%s5287_s1 + $0x30] sm:$0xff]  ;;  %v295_v27 = vld [vmem:[%s5290_s4] sm:$0xff]  ;;  %vm486_vm5 = vcmask 392544   ;;  %v5302_v60 = vmov 16   ;;  %v5310_v61 = vmov 17  }
   0xe   :  { %2931 = vmatpush3.msra.mxu1 %v299_v15  ;;  %2940 = vmatprep.mubr.msk.f32.mxu1 %vm310_vm1, %v31_v17  ;;  %v32_v28 = vld [vmem:[%s5286_s0 + $0x8] sm:$0xff]  ;;  %v40_v29 = vld [vmem:[%s5287_s1 + $0x38] sm:$0xff]  ;;  %v41_v30 = vld [vmem:[%s5287_s1 + $0x40] sm:$0xff]  ;;  %s3337_s11 = smov 104   ;;  %s3352_s12 = smov 92  }
   0xf   :  { %2932 = vmatprep.subr.mxu1 %v298_v19  ;;  %668 = vrot.lane.b32.xlu1 %v3451_v18, %s3331_s17  ;;  %v42_v31 = vld [vmem:[%s5287_s1 + $0x48] sm:$0xff]  ;;  %v2776_v48 = vld [vmem:[%s5291_s5] ss:$0 sm:$0xff]  ;;  %s3336_s5 = smov 112   ;;  %s3353_s13 = smov 84  }
  0x10   :  { %2898 = vmatmul.mubr.msk.f32.gmra.mxu0 %vm59_vm0, %v36_v21  ;;  %2933 = vmatpush3.msra.mxu1 %v298_v19  ;;  %s3354_s14 = smov 96   ;;  %s3355_s15 = smov 88  }
  0x11   :  { %2900 = vmatprep.mubr.msk.f32.mxu0 %vm59_vm0, %v37_v22  ;;  %2934 = vmatprep.subr.mxu1 %v297_v23  ;;  %v5312_v22 = vmov 18   ;;  %s3360_s21 = smov [#allocation2]  }
  0x12   :  { %2935 = vmatpush3.msra.mxu1 %v297_v23  ;;  %2957 = vmatprep.subr.bf16.mxu0 %v5295_v32  ;;  %v5320_v23 = vmov 19   ;;  %s2745_s22 = sshll.u32 %s3360_s21, 4  ;;  %s2746_s22 = int_to_ptr.vmem [resolvable:$true] %s2745_s22 }
  0x13   :  { %2936 = vmatprep.subr.mxu1 %v296_v24  ;;  %3107 = vset.pattern.permute.xlu1 %v5302_v60  ;;  %s3309_s23 = scalar_lea.vmem %s2746_s22, 256  ;;  %p3314_p1 = scmp.lt.s32.totalorder %s2746_s22, %s2746_s22 }
  0x14   :  { %2901 = vmatmul.mubr.msk.f32.gmra.mxu0 %vm59_vm0, %v38_v25  ;;  %2937 = vmatpush3.msra.mxu1 %v296_v24  ;;  %v5326_v25 = vmov 21   ;;  %p3310_p0 = scmp.ne.s32.totalorder %s2746_s22, %s3309_s23  ;;  %p3315_p2 = scmp.lt.s32.totalorder %s3309_s23, %s3309_s23 }
  0x15   :  { %2903 = vmatprep.mubr.msk.f32.mxu0 %vm59_vm0, %v39_v26  ;;  %2938 = vmatprep.subr.mxu1 %v295_v27  ;;  %v5324_v26 = vmov 20  }
  0x16   :  { %2939 = vmatpush3.msra.mxu1 %v295_v27  ;;  %3108 = vset.pattern.permute.xlu0 %v5310_v61  ;;  %p3316_p3 = por %p3315_p2, %p3314_p1 }
  0x17   :  { %2941 = vmatmul.mubr.msk.f32.vlgmr.msra.gmra.mxu1 %vm310_vm1, %v32_v28  ;;  %2943 = vmatprep.subr.bf16.mxu1 %v5295_v32  ;;  %v5316_v28 = vmov 23  }
  0x18   :  { %2904 = vmatmul.mubr.msk.f32.gmra.mxu0 %vm59_vm0, %v40_v29  ;;  %v5314_v29 = vmov 22   ;;  %p3317_p4 = pnand %p3316_p3, %p3310_p0 }
  0x19   :  { %2906 = vmatprep.mubr.msk.f32.mxu0 %vm59_vm0, %v41_v30 }
  0x1c   :  { %2907 = vmatmul.mubr.msk.f32.gmra.mxu0 %vm59_vm0, %v42_v31  ;;  %v5306_v31 = vmov 30  }
  0x81   :  { %v3619_v12 = vpop.permute.xlu1 %668 }
  0xcc   :  { %v2896_v33 = vpop.f32.mrf.mxu0 }
  0xce   :  { %v186_v34 = vpop.f32.mrf.mxu0 }
  0xcf   :  { %v3506_v35 = vpack.c.bf16 %v2896_v33, %v186_v34  ;;  %v5308_v33 = vmov 26   ;;  %v5328_v34 = vmov 27  }
  0xd0   :  { %v2899_v36 = vpop.f32.mrf.mxu0 }
  0xd1   :  { %5353 = vst [vmem:[#allocation5_spill] sm:$0xff] %v3506_v35  ;;  %2209 = vrot.lane.b32.xlu1 %v3506_v35, %s3333_s9 }
  0xd2   :  { %v196_v37 = vpop.f32.mrf.mxu0 }
  0xd3   :  { %v3510_v38 = vpack.c.bf16 %v2899_v36, %v196_v37  ;;  %v5304_v36 = vmov 25  }
  0xd4   :  { %v2902_v39 = vpop.f32.mrf.mxu0 }
  0xd5   :  { %5354 = vst [vmem:[#allocation6_spill] sm:$0xff] %v3510_v38  ;;  %2211 = vrot.lane.b32.xlu0 %v3510_v38, %s3333_s9 }
  0xd6   :  { %v206_v40 = vpop.f32.mrf.mxu0 }
  0xd7   :  { %v3520_v47 = vpack.c.bf16 %v2902_v39, %v206_v40  ;;  %v2942_v49 = vpop.f32.mrf.mxu1 }
  0xd8   :  { %v2905_v41 = vpop.f32.mrf.mxu0  ;;  %v3529_v50 = vadd.f32 %v2942_v49, %v2776_v48 }
  0xd9   :  { %v383_v54 = vpop.f32.mrf.mxu1 }
  0xda   :  { %v216_v42 = vpop.f32.mrf.mxu0  ;;  %v396_v51 = vsel %vm392_vm2, %v3529_v50, -inf  ;;  %v459_v52 = vsel %vm455_vm3, %v3529_v50, -inf  ;;  %v428_v53 = vsel %vm424_vm4, %v3529_v50, -inf  ;;  %v490_v55 = vsel %vm486_vm5, %v3529_v50, -inf }
  0xdb   :  { %v3516_v46 = vpack.c.bf16 %v2905_v41, %v216_v42  ;;  %v3541_v56 = vadd.f32 %v2776_v48, %v383_v54  ;;  %v558_v59 = vfloor.f32 %v3529_v50  ;;  %v5322_v41 = vmov 31  }
  0xdc   :  { %v2908_v43 = vpop.f32.mrf.mxu0 }
  0xdd   :  { %v393_v57 = vsel %vm392_vm2, %v3541_v56, -inf  ;;  %v425_v58 = vsel %vm424_vm4, %v3541_v56, -inf  ;;  %v487_v62 = vsel %vm486_vm5, %v3541_v56, -inf  ;;  %v3552_v63 = vfloor.f32 %v3541_v56 }
  0xde   :  { %v226_v44 = vpop.f32.mrf.mxu0  ;;  %vm578_vm6 = vcmp.ge.f32.partialorder %v558_v59, -1.0  ;;  %vm587_vm7 = vcmp.lt.f32.partialorder %v558_v59, %v3457_v20  ;;  %v456_v5 = vsel %vm455_vm3, %v3541_v56, -inf  ;;  %v3582_v6 = vsub.f32 %v3529_v50, %v558_v59 }
  0xdf   :  { %v3514_v45 = vpack.c.bf16 %v2908_v43, %v226_v44  ;;  %vm577_vm8 = vcmp.ge.f32.partialorder %v3552_v63, -1.0  ;;  %vm586_vm9 = vcmp.lt.f32.partialorder %v3552_v63, %v3457_v20  ;;  %vm589_vm10 = vmand %vm578_vm6, %vm587_vm7  ;;  %v3562_v0 = vsub.f32 %v3541_v56, %v3552_v63 }
  0xe0   :  { %vm588_vm11 = vmand %vm577_vm8, %vm586_vm9  ;;  %v3568_v3 = vsel %vm589_vm10, 1.0, %v5295_v32  ;;  %vm561_vm12 = vcmp.ge.f32.partialorder %v3552_v63, 0.0  ;;  %vm569_vm13 = vcmp.lt.f32.partialorder %v3552_v63, %v3451_v18  ;;  %vm562_vm14 = vcmp.ge.f32.partialorder %v558_v59, 0.0 }
  0xe1   :  { %2944 = vmatpush3.bf16.msra.mxu1 %v3514_v45  ;;  %v3565_v1 = vsel %vm588_vm11, 1.0, %v5295_v32  ;;  %vm570_vm15 = vcmp.lt.f32.partialorder %v558_v59, %v3451_v18  ;;  %vm571_vm2 = vmand %vm561_vm12, %vm569_vm13  ;;  %v3593_v7 = vsub.f32 1.0, %v3582_v6  ;;  %v3607_v11 = vsub.f32 1.0, %v3562_v0 }
  0xe2   :  { %2945 = vmatprep.subr.bf16.mxu1 %v5295_v32  ;;  %v3102_v4 = vpack.i.bf16 %v3568_v3, %v3565_v1  ;;  %vm572_vm3 = vmand %vm562_vm14, %vm570_vm15  ;;  %v3596_v8 = vsel %vm571_vm2, 1.0, %v5295_v32  ;;  %v672_v18 = vmul.f32 %v3619_v12, %v558_v59  ;;  %v671_v39 = vmul.f32 %v3619_v12, %v3552_v63 }
  0xe3   :  { %v3599_v9 = vsel %vm572_vm3, 1.0, %v5295_v32  ;;  %v5318_v43 = vmov 28   ;;  %vm413_vm4 = vcmask 31744   ;;  %vm551_vm5 = vcmask 64512  }
  0xe4   :  { %v3097_v10 = vpack.i.bf16 %v3599_v9, %v3596_v8  ;;  %vm554_vm6 = vcmask 97280  }
  0xe5   :  { %2946 = vmatpush3.bf16.msra.mxu1 %v3516_v46 }
  0xe6   :  { %2947 = vmatprep.subr.bf16.mxu1 %v5295_v32 }
  0xe9   :  { %2948 = vmatpush3.bf16.msra.mxu1 %v3520_v47 }
  0xea   :  { %2949 = vmatprep.subr.bf16.mxu1 %v5295_v32 }
  0xed   :  { %2950 = vmatpush3.bf16.msra.mxu1 %v3510_v38 }
  0xee   :  { %2951 = vmatprep.subr.bf16.mxu1 %v5295_v32 }
  0xf1   :  { %2952 = vmatpush3.bf16.msra.mxu1 %v3506_v35 }
  0xf2   :  { %2971 = vmatprep.subr.bf16.mxu1 %v5295_v32 }
  0xf4   :  { %397 = vmax.xlane.f32.xlu0 %v396_v51 }
  0xf5   :  { %460 = vmax.xlane.f32.xlu1 %v459_v52 }
  0xf8   :  { %429 = vmax.xlane.f32.xlu0 %v428_v53 }
  0xfc   :  { %491 = vmax.xlane.f32.xlu0 %v490_v55 }
 0x100   :  { %394 = vmax.xlane.f32.xlu0 %v393_v57 }
 0x104   :  { %426 = vmax.xlane.f32.xlu0 %v425_v58 }
 0x106   :  { %677 = vrot.lane.b32.xlu1 %v558_v59, %s3331_s17 }
 0x108   :  { %488 = vmax.xlane.f32.xlu0 %v487_v62 }
 0x11e   :  { %675 = vrot.lane.b32.xlu0 %v3552_v63, %s3331_s17 }
 0x122   :  { %630 = vrot.lane.b32.xlu0 %v3562_v0, %s3331_s17 }
 0x126   :  { %3103 = vrot.lane.b32.xlu0 %v3102_v4, %s3331_s17 }
 0x12a   :  { %457 = vmax.xlane.f32.xlu1 %v456_v5  ;;  %2215 = vrot.lane.b32.xlu0 %v3516_v46, %s3333_s9 }
 0x12e   :  { %2273 = vrot.lane.b32.xlu0 %v3516_v46, %s3336_s5 }
 0x13b   :  { %632 = vrot.lane.b32.xlu1 %v3582_v6, %s3331_s17 }
 0x13f   :  { %2213 = vrot.lane.b32.xlu1 %v3520_v47, %s3333_s9 }
 0x143   :  { %600 = vrot.lane.b32.xlu1 %v3593_v7, %s3331_s17  ;;  %v3623_v14 = vpop.permute.xlu1 %2209 }
 0x147   :  { %3098 = vrot.lane.b32.xlu1 %v3097_v10, %s3331_s17  ;;  %v3621_v13 = vpop.permute.xlu0 %2211 }
 0x14b   :  { %598 = vrot.lane.b32.xlu1 %v3607_v11, %s3331_s17 }
 0x14f   :  { %2331 = vrot.lane.b32.xlu1 %v3516_v46, %s3337_s11 }
 0x153   :  { %2217 = vrot.lane.b32.xlu1 %v3514_v45, %s3333_s9 }
 0x157   :  { %2275 = vrot.lane.b32.xlu1 %v3514_v45, %s3336_s5 }
 0x15b   :  { %2333 = vrot.lane.b32.xlu1 %v3514_v45, %s3337_s11  ;;  %v5298_v45 = vmov 29  }
 0x17d   :  { %v3625_v15 = vpop.xlane.xlu0 %397 }
 0x17e   :  { %v3627_v16 = vpop.xlane.xlu1 %460 }
 0x181   :  { %v3629_v17 = vpop.xlane.xlu0 %429 }
 0x182   :  { %v678_v19 = vpop.permute.xlu1 %677 }
 0x183   :  { %v3632_v20 = vadd.f32 %v678_v19, %v672_v18 }
 0x185   :  { %699 = vperm.xlu1 %3107, %v3632_v20   ;;  %801 = vperm.xlu0 %3108, %v3632_v20   ;;  %v3636_v21 = vpop.xlane.xlu0 %491  ;;  %v3673_v42 = vadd.f32 1.0, %v3632_v20  ;;  %v3680_v44 = vadd.f32 %v3632_v20, %v3619_v12 }
 0x187   :  { %v3780_v19 = vadd.f32 1.0, %v3680_v44 }
 0x189   :  { %3109 = vset.pattern.permute.xlu1 %v5312_v22  ;;  %3110 = vset.pattern.permute.xlu0 %v5320_v23  ;;  %v3642_v24 = vpop.xlane.xlu0 %394 }
 0x18a   :  { %889 = vperm.xlu1 %3109, %v3632_v20   ;;  %977 = vperm.xlu0 %3110, %v3632_v20  }
 0x18d   :  { %v3648_v27 = vpop.xlane.xlu0 %426 }
 0x18e   :  { %3112 = vset.pattern.permute.xlu1 %v5326_v25  ;;  %3111 = vset.pattern.permute.xlu0 %v5324_v26 }
 0x18f   :  { %1164 = vperm.xlu1 %3112, %v3632_v20   ;;  %1076 = vperm.xlu0 %3111, %v3632_v20  }
 0x191   :  { %v3654_v30 = vpop.xlane.xlu0 %488 }
 0x193   :  { %3114 = vset.pattern.permute.xlu1 %v5316_v28  ;;  %3113 = vset.pattern.permute.xlu0 %v5314_v29 }
 0x194   :  { %1340 = vperm.xlu1 %3114, %v3632_v20   ;;  %1252 = vperm.xlu0 %3113, %v3632_v20  }
 0x195   :  { %v676_v37 = vpop.permute.xlu0 %675 }
 0x196   :  { %v3666_v40 = vadd.f32 %v676_v37, %v671_v39 }
 0x198   :  { %3116 = vset.pattern.permute.xlu1 %v5306_v31  ;;  %3115 = vset.pattern.permute.xlu0 %v5308_v33  ;;  %v3759_v63 = vadd.f32 1.0, %v3666_v40  ;;  %v3766_v4 = vadd.f32 %v3666_v40, %v3619_v12 }
 0x199   :  { %1978 = vperm.xlu1 %3116, %v3632_v20   ;;  %1615 = vperm.xlu0 %3115, %v3632_v20   ;;  %v3708_v53 = vpop.permute.xlu0 %630 }
 0x19d   :  { %3117 = vset.pattern.permute.xlu1 %v5328_v34  ;;  %3120 = vset.pattern.permute.xlu0 %v5304_v36  ;;  %v3719_v57 = vpop.permute.xlu0 %3103 }
 0x19e   :  { %1703 = vperm.xlu1 %3117, %v3632_v20   ;;  %1527 = vperm.xlu0 %3120, %v3632_v20  }
 0x1a1   :  { %v2216_v59 = vpop.permute.xlu0 %2215 }
 0x1a2   :  { %3118 = vset.pattern.permute.xlu1 %v5322_v41  ;;  %3123 = vset.pattern.permute.xlu0 %v5312_v22 }
 0x1a3   :  { %2066 = vperm.xlu1 %3118, %v3632_v20   ;;  %885 = vperm.xlu0 %3123, %v3666_v40  }
 0x1a5   :  { %v3768_v5 = vpop.permute.xlu0 %2273 }
 0x1a6   :  { %5357 = vst [vmem:[#allocation9_spill] sm:$0xff] %v3768_v5  ;;  %v5386_v5 = vmov 23  }
 0x1a7   :  { %3119 = vset.pattern.permute.xlu1 %v5318_v43  ;;  %911 = vperm.xlu0 %3123, %v3673_v42  }
 0x1a8   :  { %1802 = vperm.xlu1 %3119, %v3632_v20  }
 0x1ab   :  { %933 = vperm.xlu0 %3123, %v3680_v44  }
 0x1ac   :  { %3121 = vset.pattern.permute.xlu1 %v5298_v45 }
 0x1ad   :  { %1890 = vperm.xlu1 %3121, %v3632_v20  }
 0x1af   :  { %3126 = vset.pattern.permute.xlu0 %v5326_v25 }
 0x1b0   :  { %1160 = vperm.xlu0 %3126, %v3666_v40  }
 0x1b1   :  { %3122 = vset.pattern.permute.xlu1 %v5310_v61 }
 0x1b2   :  { %797 = vperm.xlu1 %3122, %v3666_v40  }
 0x1b3   :  { %v3689_v46 = vpop.xlane.xlu1 %457 }
 0x1b4   :  { %1186 = vperm.xlu0 %3126, %v3673_v42  }
 0x1b6   :  { %823 = vperm.xlu1 %3122, %v3673_v42  }
 0x1b7   :  { %v3693_v48 = vpop.permute.xlu1 %632 }
 0x1b8   :  { %1208 = vperm.xlu0 %3126, %v3680_v44  }
 0x1ba   :  { %845 = vperm.xlu1 %3122, %v3680_v44  }
 0x1bb   :  { %v2214_v49 = vpop.permute.xlu1 %2213 }
 0x1bc   :  { %3128 = vset.pattern.permute.xlu0 %v5316_v28 }
 0x1bd   :  { %1336 = vperm.xlu0 %3128, %v3666_v40  }
 0x1be   :  { %3124 = vset.pattern.permute.xlu1 %v5320_v23 }
 0x1bf   :  { %v3700_v51 = vpop.permute.xlu1 %600  ;;  %973 = vperm.xlu1 %3124, %v3666_v40  }
 0x1c1   :  { %1362 = vperm.xlu0 %3128, %v3673_v42  }
 0x1c3   :  { %v3704_v52 = vpop.permute.xlu1 %3098  ;;  %999 = vperm.xlu1 %3124, %v3673_v42  }
 0x1c5   :  { %1384 = vperm.xlu0 %3128, %v3680_v44  }
 0x1c7   :  { %v3710_v54 = vpop.permute.xlu1 %598  ;;  %1021 = vperm.xlu1 %3124, %v3680_v44  }
 0x1c9   :  { %3130 = vset.pattern.permute.xlu0 %v5306_v31 }
 0x1ca   :  { %1974 = vperm.xlu0 %3130, %v3666_v40  }
 0x1cb   :  { %v3715_v55 = vpop.permute.xlu1 %2331  ;;  %3125 = vset.pattern.permute.xlu1 %v5324_v26 }
 0x1cc   :  { %5355 = vst [vmem:[#allocation7_spill] sm:$0xff] %v3715_v55  ;;  %1072 = vperm.xlu1 %3125, %v3666_v40  }
 0x1ce   :  { %2000 = vperm.xlu0 %3130, %v3673_v42  }
 0x1cf   :  { %v2218_v58 = vpop.permute.xlu1 %2217 }
 0x1d0   :  { %2958 = vmatpush3.bf16.msra.mxu0 %v2218_v58  ;;  %1098 = vperm.xlu1 %3125, %v3673_v42  }
 0x1d1   :  { %2959 = vmatprep.subr.bf16.mxu0 %v5295_v32 }
 0x1d2   :  { %3131 = vset.pattern.permute.xlu0 %v5308_v33 }
 0x1d3   :  { %1659 = vperm.xlu0 %3131, %v3680_v44   ;;  %v3756_v62 = vpop.permute.xlu1 %2275 }
 0x1d4   :  { %1120 = vperm.xlu1 %3125, %v3680_v44   ;;  %2960 = vmatpush3.bf16.msra.mxu0 %v2216_v59  ;;  %5356 = vst [vmem:[#allocation8_spill] sm:$0xff] %v3756_v62 }
 0x1d5   :  { %2961 = vmatprep.subr.bf16.mxu0 %v5295_v32 }
 0x1d7   :  { %3133 = vset.pattern.permute.xlu0 %v5328_v34  ;;  %v3770_v10 = vpop.permute.xlu1 %2333 }
 0x1d8   :  { %1699 = vperm.xlu0 %3133, %v3666_v40   ;;  %3127 = vset.pattern.permute.xlu1 %v5314_v29  ;;  %5358 = vst [vmem:[#allocation10_spill] sm:$0xff] %v3770_v10  ;;  %v5380_v10 = vmov 28  }
 0x1d9   :  { %2962 = vmatpush3.bf16.msra.mxu0 %v2214_v49  ;;  %1248 = vperm.xlu1 %3127, %v3666_v40  }
 0x1da   :  { %2963 = vmatprep.subr.bf16.mxu0 %v5295_v32 }
 0x1dc   :  { %3134 = vset.pattern.permute.xlu0 %v5322_v41 }
 0x1dd   :  { %2964 = vmatpush3.bf16.msra.mxu0 %v3621_v13  ;;  %2062 = vperm.xlu0 %3134, %v3666_v40   ;;  %v5300_v13 = vmov 24  }
 0x1de   :  { %1274 = vperm.xlu1 %3127, %v3673_v42   ;;  %2965 = vmatprep.subr.bf16.mxu0 %v5295_v32 }
 0x1e1   :  { %2966 = vmatpush3.bf16.msra.mxu0 %v3623_v14  ;;  %3135 = vset.pattern.permute.xlu0 %v5328_v34 }
 0x1e2   :  { %1296 = vperm.xlu1 %3127, %v3680_v44   ;;  %1725 = vperm.xlu0 %3135, %v3673_v42  }
 0x1e3   :  { %2985 = vmatprep.subr.bf16.mxu0 %v5295_v32 }
 0x1e6   :  { %3129 = vset.pattern.permute.xlu1 %v5308_v33  ;;  %1747 = vperm.xlu0 %3135, %v3680_v44  }
 0x1e7   :  { %1611 = vperm.xlu1 %3129, %v3666_v40  }
 0x1ea   :  { %3138 = vset.pattern.permute.xlu0 %v5318_v43 }
 0x1eb   :  { %1637 = vperm.xlu1 %3129, %v3673_v42   ;;  %1798 = vperm.xlu0 %3138, %v3666_v40  }
 0x1ef   :  { %3132 = vset.pattern.permute.xlu1 %v5306_v31  ;;  %1824 = vperm.xlu0 %3138, %v3673_v42  }
 0x1f0   :  { %2022 = vperm.xlu1 %3132, %v3680_v44  }
 0x1f3   :  { %3141 = vset.pattern.permute.xlu0 %v5304_v36 }
 0x1f4   :  { %3136 = vset.pattern.permute.xlu1 %v5322_v41  ;;  %1549 = vperm.xlu0 %3141, %v3673_v42  }
 0x1f5   :  { %2088 = vperm.xlu1 %3136, %v3673_v42  }
 0x1f8   :  { %3143 = vset.pattern.permute.xlu0 %v5310_v61 }
 0x1f9   :  { %2110 = vperm.xlu1 %3136, %v3680_v44   ;;  %819 = vperm.xlu0 %3143, %v3759_v63  }
 0x1fd   :  { %3137 = vset.pattern.permute.xlu1 %v5300_v13  ;;  %841 = vperm.xlu0 %3143, %v3766_v4  }
 0x1fe   :  { %1435 = vperm.xlu1 %3137, %v3666_v40  }
 0x200   :  { %v3775_v14 = vpop.permute.xlu1 %699  ;;  %v3777_v18 = vpop.permute.xlu0 %801 }
 0x201   :  { %5359 = vst [vmem:[#allocation11_spill] sm:$0xff] %v3775_v14  ;;  %5360 = vst [vmem:[#allocation12_spill] sm:$0xff] %v3777_v18  ;;  %3146 = vset.pattern.permute.xlu0 %v5312_v22 }
 0x202   :  { %1461 = vperm.xlu1 %3137, %v3673_v42   ;;  %955 = vperm.xlu0 %3146, %v3780_v19  }
 0x205   :  { %v3785_v12 = vpop.permute.xlu1 %889  ;;  %v3787_v37 = vpop.permute.xlu0 %977 }
 0x206   :  { %3139 = vset.pattern.permute.xlu1 %v5318_v43  ;;  %3147 = vset.pattern.permute.xlu0 %v5320_v23 }
 0x207   :  { %1846 = vperm.xlu1 %3139, %v3680_v44   ;;  %995 = vperm.xlu0 %3147, %v3759_v63  }
 0x20a   :  { %v3793_v39 = vpop.permute.xlu1 %1164  ;;  %v3795_v49 = vpop.permute.xlu0 %1076 }
 0x20b   :  { %5361 = vst [vmem:[#allocation13_spill] sm:$0xff] %v3793_v39  ;;  %5362 = vst [vmem:[#allocation14_spill] sm:$0xff] %v3795_v49  ;;  %3140 = vset.pattern.permute.xlu1 %v5304_v36  ;;  %1017 = vperm.xlu0 %3147, %v3766_v4   ;;  %v5385_v49 = vmov 17  }
 0x20c   :  { %1523 = vperm.xlu1 %3140, %v3666_v40  }
 0x20f   :  { %v3800_v58 = vpop.permute.xlu1 %1340  ;;  %3149 = vset.pattern.permute.xlu0 %v5324_v26  ;;  %v3803_v59 = vpop.permute.xlu0 %1252 }
 0x210   :  { %5363 = vst [vmem:[#allocation15_spill] sm:$0xff] %v3800_v58  ;;  %5364 = vst [vmem:[#allocation16_spill] sm:$0xff] %v3803_v59  ;;  %3142 = vset.pattern.permute.xlu1 %v5302_v60  ;;  %1094 = vperm.xlu0 %3149, %v3759_v63  }
 0x211   :  { %720 = vperm.xlu1 %3142, %v3759_v63  }
 0x214   :  { %v3808_v32 = vpop.permute.xlu1 %1978  ;;  %1116 = vperm.xlu0 %3149, %v3766_v4   ;;  %v3811_v2 = vpop.permute.xlu0 %1615 }
 0x215   :  { %5365 = vst [vmem:[#allocation17_spill] sm:$0xff] %v3808_v32  ;;  %5366 = vst [vmem:[#allocation18_spill] sm:$0xff] %v3811_v2  ;;  %746 = vperm.xlu1 %3142, %v3766_v4   ;;  %v494_v32 = vsub.f32 %v3529_v50, %v3636_v21  ;;  %v5396_v2 = vmov 30  }
 0x218   :  { %3152 = vset.pattern.permute.xlu0 %v5326_v25 }
 0x219   :  { %3144 = vset.pattern.permute.xlu1 %v5310_v61  ;;  %v3816_v45 = vpop.permute.xlu1 %1703  ;;  %1230 = vperm.xlu0 %3152, %v3780_v19   ;;  %v3819_v13 = vpop.permute.xlu0 %1527 }
 0x21a   :  { %5367 = vst [vmem:[#allocation19_spill] sm:$0xff] %v3816_v45  ;;  %5368 = vst [vmem:[#allocation20_spill] sm:$0xff] %v3819_v13  ;;  %867 = vperm.xlu1 %3144, %v3780_v19  }
 0x21d   :  { %3153 = vset.pattern.permute.xlu0 %v5314_v29 }
 0x21e   :  { %3145 = vset.pattern.permute.xlu1 %v5312_v22  ;;  %v3824_v60 = vpop.permute.xlu1 %2066  ;;  %1270 = vperm.xlu0 %3153, %v3759_v63   ;;  %v3827_v36 = vpop.permute.xlu0 %885 }
 0x21f   :  { %5369 = vst [vmem:[#allocation21_spill] sm:$0xff] %v3824_v60  ;;  %5370 = vst [vmem:[#allocation22_spill] sm:$0xff] %v3827_v36  ;;  %907 = vperm.xlu1 %3145, %v3759_v63  }
 0x222   :  { %1292 = vperm.xlu0 %3153, %v3766_v4   ;;  %v3831_v31 = vpop.permute.xlu0 %911 }
 0x223   :  { %929 = vperm.xlu1 %3145, %v3766_v4   ;;  %v3834_v33 = vpop.permute.xlu1 %1802 }
 0x224   :  { %5371 = vst [vmem:[#allocation23_spill] sm:$0xff] %v3834_v33  ;;  %v5393_v33 = vmov 20  }
 0x226   :  { %3156 = vset.pattern.permute.xlu0 %v5316_v28  ;;  %v3837_v61 = vpop.permute.xlu0 %933 }
 0x227   :  { %3148 = vset.pattern.permute.xlu1 %v5320_v23  ;;  %1406 = vperm.xlu0 %3156, %v3780_v19  }
 0x228   :  { %1043 = vperm.xlu1 %3148, %v3780_v19   ;;  %v3842_v22 = vpop.permute.xlu1 %1890 }
 0x229   :  { %5372 = vst [vmem:[#allocation24_spill] sm:$0xff] %v3842_v22  ;;  %v5392_v22 = vmov 26  }
 0x22b   :  { %3164 = vset.pattern.permute.xlu0 %v5322_v41  ;;  %v3845_v29 = vpop.permute.xlu0 %1160 }
 0x22c   :  { %5373 = vst [vmem:[#allocation25_spill] sm:$0xff] %v3845_v29  ;;  %3150 = vset.pattern.permute.xlu1 %v5324_v26  ;;  %2084 = vperm.xlu0 %3164, %v3759_v63  }
 0x22d   :  { %1142 = vperm.xlu1 %3150, %v3780_v19   ;;  %v3850_v28 = vpop.permute.xlu1 %797 }
 0x22e   :  { %5374 = vst [vmem:[#allocation26_spill] sm:$0xff] %v3850_v28  ;;  %v432_v28 = vsub.f32 %v3529_v50, %v3629_v17  ;;  %v497_v17 = vmul.f32 1.442695, %v494_v32 }
 0x22f   :  { %v3852_v43 = vpop.permute.xlu0 %1186 }
 0x230   :  { %5375 = vst [vmem:[#allocation27_spill] sm:$0xff] %v3852_v43  ;;  %2106 = vperm.xlu0 %3164, %v3766_v4   ;;  %v5381_v43 = vmov 22   ;;  %v435_v45 = vmul.f32 1.442695, %v432_v28 }
 0x231   :  { %3151 = vset.pattern.permute.xlu1 %v5326_v25  ;;  %v3856_v23 = vpop.permute.xlu1 %823 }
 0x232   :  { %5376 = vst [vmem:[#allocation28_spill] sm:$0xff] %v3856_v23  ;;  %1182 = vperm.xlu1 %3151, %v3759_v63   ;;  %v5389_v23 = vmov 19   ;;  %3277 = vpow2.f32 %v435_v45 }
 0x233   :  { %v3859_v41 = vpop.permute.xlu0 %1208  ;;  %3279 = vpow2.f32 %v497_v17 }
 0x234   :  { %5377 = vst [vmem:[#allocation29_spill] sm:$0xff] %v3859_v41  ;;  %3165 = vset.pattern.permute.xlu0 %v5328_v34  ;;  %v3877_v34 = vadd.f32 1.0, %v3766_v4 }
 0x235   :  { %v3862_v26 = vpop.permute.xlu1 %845  ;;  %1769 = vperm.xlu0 %3165, %v3780_v19  }
 0x236   :  { %5378 = vst [vmem:[#allocation30_spill] sm:$0xff] %v3862_v26  ;;  %1204 = vperm.xlu1 %3151, %v3766_v4  }
 0x238   :  { %v3866_v55 = vpop.permute.xlu0 %1336 }
 0x239   :  { %5379 = vst [vmem:[#allocation31_spill] sm:$0xff] %v3866_v55  ;;  %3172 = vset.pattern.permute.xlu0 %v5380_v10 }
 0x23a   :  { %3154 = vset.pattern.permute.xlu1 %v5381_v43  ;;  %v3870_v25 = vpop.permute.xlu1 %973  ;;  %1868 = vperm.xlu0 %3172, %v3780_v19  }
 0x23b   :  { %5382 = vst [vmem:[#allocation32_spill] sm:$0xff] %v3870_v25  ;;  %1318 = vperm.xlu1 %3154, %v3780_v19  }
 0x23c   :  { %v3874_v41 = vpop.permute.xlu0 %1362 }
 0x23d   :  { %5383 = vst [vmem:[#allocation33_spill] sm:$0xff] %v3874_v41  ;;  %v5410_v41 = vmov 27  }
 0x23e   :  { %v3879_v39 = vpop.permute.xlu1 %999  ;;  %3177 = vset.pattern.permute.xlu0 %v5385_v49 }
 0x23f   :  { %5384 = vst [vmem:[#allocation34_spill] sm:$0xff] %v3879_v39  ;;  %3155 = vset.pattern.permute.xlu1 %v5386_v5  ;;  %863 = vperm.xlu0 %3177, %v3877_v34  }
 0x240   :  { %1358 = vperm.xlu1 %3155, %v3759_v63   ;;  %v3885_v62 = vpop.permute.xlu0 %1384 }
 0x241   :  { %5387 = vst [vmem:[#allocation35_spill] sm:$0xff] %v3885_v62  ;;  %v431_v62 = vsub.f32 %v3541_v56, %v3648_v27 }
 0x242   :  { %v3887_v26 = vpop.permute.xlu1 %1021 }
 0x243   :  { %5388 = vst [vmem:[#allocation36_spill] sm:$0xff] %v3887_v26  ;;  %3179 = vset.pattern.permute.xlu0 %v5389_v23  ;;  %v433_v21 = vmul.f32 1.442695, %v431_v62  ;;  %v5401_v62 = vmov 31   ;;  %v5440_v26 = vmov 21  }
 0x244   :  { %1380 = vperm.xlu1 %3155, %v3766_v4   ;;  %1039 = vperm.xlu0 %3179, %v3877_v34  }
 0x245   :  { %v3892_v18 = vpop.permute.xlu0 %1974  ;;  %3281 = vpow2.f32 %v433_v21 }
 0x246   :  { %5390 = vst [vmem:[#allocation37_spill] sm:$0xff] %v3892_v18 }
 0x247   :  { %v3896_v14 = vpop.permute.xlu1 %1072 }
 0x248   :  { %5391 = vst [vmem:[#allocation38_spill] sm:$0xff] %v3896_v14  ;;  %3157 = vset.pattern.permute.xlu1 %v5392_v22  ;;  %3180 = vset.pattern.permute.xlu0 %v5393_v33  ;;  %v5431_v14 = vmov 29  }
 0x249   :  { %1633 = vperm.xlu1 %3157, %v3759_v63   ;;  %1138 = vperm.xlu0 %3180, %v3877_v34   ;;  %v3902_v60 = vpop.permute.xlu0 %2000 }
 0x24a   :  { %5394 = vst [vmem:[#allocation39_spill] sm:$0xff] %v3902_v60 }
 0x24b   :  { %v3906_v18 = vpop.permute.xlu1 %1098 }
 0x24c   :  { %5395 = vst [vmem:[#allocation40_spill] sm:$0xff] %v3906_v18  ;;  %v493_v18 = vsub.f32 %v3541_v56, %v3654_v30 }
 0x24d   :  { %3158 = vset.pattern.permute.xlu1 %v5396_v2  ;;  %3182 = vset.pattern.permute.xlu0 %v5381_v43 }
 0x24e   :  { %1996 = vperm.xlu1 %3158, %v3759_v63   ;;  %1314 = vperm.xlu0 %3182, %v3877_v34   ;;  %v3914_v60 = vpop.permute.xlu0 %1659  ;;  %v495_v45 = vmul.f32 1.442695, %v493_v18 }
 0x24f   :  { %5397 = vst [vmem:[#allocation41_spill] sm:$0xff] %v3914_v60  ;;  %v3916_v28 = vpop.permute.xlu1 %1120 }
 0x250   :  { %5398 = vst [vmem:[#allocation42_spill] sm:$0xff] %v3916_v28  ;;  %3283 = vpow2.f32 %v495_v45  ;;  %v3936_v28 = vpop.eup %3277 }
 0x251   :  { %v3946_v60 = vpop.eup %3279 }
 0x252   :  { %3159 = vset.pattern.permute.xlu1 %v5392_v22  ;;  %3184 = vset.pattern.permute.xlu0 %v5392_v22  ;;  %v3955_v35 = vpop.eup %3281 }
 0x253   :  { %1655 = vperm.xlu1 %3159, %v3766_v4   ;;  %1677 = vperm.xlu0 %3184, %v3877_v34   ;;  %v3924_v32 = vpop.permute.xlu0 %1699 }
 0x254   :  { %5399 = vst [vmem:[#allocation43_spill] sm:$0xff] %v3924_v32  ;;  %v3926_v27 = vpop.permute.xlu1 %1248  ;;  %v5406_v32 = vmov 25  }
 0x255   :  { %5400 = vst [vmem:[#allocation44_spill] sm:$0xff] %v3926_v27 }
 0x257   :  { %3160 = vset.pattern.permute.xlu1 %v5396_v2  ;;  %3187 = vset.pattern.permute.xlu0 %v5401_v62 }
 0x258   :  { %2018 = vperm.xlu1 %3160, %v3766_v4   ;;  %2128 = vperm.xlu0 %3187, %v3877_v34   ;;  %v3932_v30 = vpop.permute.xlu0 %2062 }
 0x259   :  { %5402 = vst [vmem:[#allocation45_spill] sm:$0xff] %v3932_v30  ;;  %v3934_v17 = vpop.permute.xlu1 %1274 }
 0x25a   :  { %5403 = vst [vmem:[#allocation46_spill] sm:$0xff] %v3934_v17 }
 0x25c   :  { %3161 = vset.pattern.permute.xlu1 %v5392_v22  ;;  %441 = vrot.lane.b32.xlu0 %v3936_v28, %s3352_s12 }
 0x25d   :  { %v3940_v18 = vpop.permute.xlu1 %1296  ;;  %1681 = vperm.xlu1 %3161, %v3780_v19   ;;  %v3943_v21 = vpop.permute.xlu0 %1725  ;;  %3189 = vset.pattern.permute.xlu0 %v5406_v32 }
 0x25e   :  { %5404 = vst [vmem:[#allocation47_spill] sm:$0xff] %v3940_v18  ;;  %5405 = vst [vmem:[#allocation48_spill] sm:$0xff] %v3943_v21  ;;  %v3963_v38 = vpop.eup %3283 }
 0x260   :  { %503 = vrot.lane.b32.xlu0 %v3946_v60, %s3353_s13 }
 0x261   :  { %3162 = vset.pattern.permute.xlu1 %v5396_v2  ;;  %v3950_v45 = vpop.permute.xlu0 %1747 }
 0x262   :  { %5407 = vst [vmem:[#allocation49_spill] sm:$0xff] %v3950_v45  ;;  %v3952_v30 = vpop.permute.xlu1 %1611  ;;  %2044 = vperm.xlu1 %3162, %v3780_v19  }
 0x263   :  { %5408 = vst [vmem:[#allocation50_spill] sm:$0xff] %v3952_v30 }
 0x264   :  { %439 = vrot.lane.b32.xlu0 %v3955_v35, %s3352_s12 }
 0x266   :  { %v3958_v21 = vpop.permute.xlu1 %1637  ;;  %3163 = vset.pattern.permute.xlu1 %v5410_v41  ;;  %v3961_v55 = vpop.permute.xlu0 %1798 }
 0x267   :  { %5409 = vst [vmem:[#allocation51_spill] sm:$0xff] %v3958_v21  ;;  %5411 = vst [vmem:[#allocation52_spill] sm:$0xff] %v3961_v55  ;;  %1721 = vperm.xlu1 %3163, %v3759_v63   ;;  %v5416_v55 = vmov 16  }
 0x268   :  { %501 = vrot.lane.b32.xlu0 %v3963_v38, %s3353_s13 }
 0x26a   :  { %v3967_v45 = vpop.permute.xlu0 %1824 }
 0x26b   :  { %5412 = vst [vmem:[#allocation53_spill] sm:$0xff] %v3967_v45  ;;  %v3969_v30 = vpop.permute.xlu1 %2022  ;;  %1743 = vperm.xlu1 %3163, %v3766_v4   ;;  %v5418_v45 = vmov 24  }
 0x26c   :  { %5413 = vst [vmem:[#allocation54_spill] sm:$0xff] %v3969_v30  ;;  %1571 = vperm.xlu0 %3189, %v3680_v44  }
 0x26f   :  { %3166 = vset.pattern.permute.xlu1 %v5401_v62  ;;  %v3974_v21 = vpop.permute.xlu0 %1549 }
 0x270   :  { %5414 = vst [vmem:[#allocation55_spill] sm:$0xff] %v3974_v21  ;;  %v3976_v58 = vpop.permute.xlu1 %2088  ;;  %2132 = vperm.xlu1 %3166, %v3780_v19   ;;  %3190 = vset.pattern.permute.xlu0 %v5416_v55 }
 0x271   :  { %5415 = vst [vmem:[#allocation56_spill] sm:$0xff] %v3976_v58  ;;  %694 = vperm.xlu0 %3190, %v3666_v40  }
 0x274   :  { %v3981_v27 = vpop.permute.xlu1 %2110  ;;  %3167 = vset.pattern.permute.xlu1 %v5418_v45  ;;  %v3984_v30 = vpop.permute.xlu0 %819 }
 0x275   :  { %5417 = vst [vmem:[#allocation57_spill] sm:$0xff] %v3981_v27  ;;  %5419 = vst [vmem:[#allocation58_spill] sm:$0xff] %v3984_v30  ;;  %1457 = vperm.xlu1 %3167, %v3759_v63   ;;  %725 = vperm.xlu0 %3190, %v3673_v42  }
 0x278   :  { %v3988_v18 = vpop.permute.xlu0 %841 }
 0x279   :  { %5420 = vst [vmem:[#allocation59_spill] sm:$0xff] %v3988_v18  ;;  %v3990_v59 = vpop.permute.xlu1 %1435  ;;  %3168 = vset.pattern.permute.xlu1 %v5380_v10  ;;  %751 = vperm.xlu0 %3190, %v3680_v44  }
 0x27a   :  { %5421 = vst [vmem:[#allocation60_spill] sm:$0xff] %v3990_v59  ;;  %1820 = vperm.xlu1 %3168, %v3759_v63  }
 0x27d   :  { %v3995_v58 = vpop.permute.xlu1 %1461  ;;  %777 = vperm.xlu0 %3190, %v3780_v19   ;;  %v3998_v27 = vpop.permute.xlu0 %955 }
 0x27e   :  { %5422 = vst [vmem:[#allocation61_spill] sm:$0xff] %v3995_v58  ;;  %3169 = vset.pattern.permute.xlu1 %v5418_v45 }
 0x27f   :  { %1479 = vperm.xlu1 %3169, %v3766_v4  }
 0x282   :  { %v4002_v30 = vpop.permute.xlu1 %1846  ;;  %v4004_v18 = vpop.permute.xlu0 %995 }
 0x283   :  { %5423 = vst [vmem:[#allocation62_spill] sm:$0xff] %v4002_v30  ;;  %5424 = vst [vmem:[#allocation63_spill] sm:$0xff] %v4004_v18  ;;  %3170 = vset.pattern.permute.xlu1 %v5380_v10 }
 0x284   :  { %1842 = vperm.xlu1 %3170, %v3766_v4  }
 0x286   :  { %v4008_v17 = vpop.permute.xlu0 %1017 }
 0x287   :  { %5425 = vst [vmem:[#allocation64_spill] sm:$0xff] %v4008_v17  ;;  %v4010_v29 = vpop.permute.xlu1 %1523 }
 0x288   :  { %5426 = vst [vmem:[#allocation65_spill] sm:$0xff] %v4010_v29  ;;  %3171 = vset.pattern.permute.xlu1 %v5418_v45 }
 0x289   :  { %1505 = vperm.xlu1 %3171, %v3780_v19  }
 0x28b   :  { %v4014_v59 = vpop.permute.xlu0 %1094 }
 0x28c   :  { %5427 = vst [vmem:[#allocation66_spill] sm:$0xff] %v4014_v59  ;;  %v4016_v21 = vpop.permute.xlu1 %720 }
 0x28d   :  { %5428 = vst [vmem:[#allocation67_spill] sm:$0xff] %v4016_v21  ;;  %3173 = vset.pattern.permute.xlu1 %v5406_v32 }
 0x28e   :  { %1545 = vperm.xlu1 %3173, %v3759_v63  }
 0x28f   :  { %v4020_v30 = vpop.permute.xlu0 %1116 }
 0x290   :  { %5429 = vst [vmem:[#allocation68_spill] sm:$0xff] %v4020_v30  ;;  %v4022_v18 = vpop.permute.xlu1 %746 }
 0x291   :  { %5430 = vst [vmem:[#allocation69_spill] sm:$0xff] %v4022_v18 }
 0x292   :  { %3174 = vset.pattern.permute.xlu1 %v5431_v14 }
 0x293   :  { %1908 = vperm.xlu1 %3174, %v3759_v63   ;;  %v5437_v63 = vmov 18  }
 0x294   :  { %v4026_v29 = vpop.permute.xlu0 %1230 }
 0x295   :  { %5432 = vst [vmem:[#allocation70_spill] sm:$0xff] %v4026_v29  ;;  %v4028_v17 = vpop.permute.xlu1 %867 }
 0x296   :  { %5433 = vst [vmem:[#allocation71_spill] sm:$0xff] %v4028_v17 }
 0x297   :  { %3175 = vset.pattern.permute.xlu1 %v5406_v32 }
 0x298   :  { %1567 = vperm.xlu1 %3175, %v3766_v4  }
 0x299   :  { %v4032_v21 = vpop.permute.xlu0 %1270 }
 0x29a   :  { %5434 = vst [vmem:[#allocation72_spill] sm:$0xff] %v4032_v21  ;;  %v4034_v59 = vpop.permute.xlu1 %907 }
 0x29c   :  { %3176 = vset.pattern.permute.xlu1 %v5416_v55 }
 0x29d   :  { %772 = vperm.xlu1 %3176, %v3877_v34   ;;  %v4038_v18 = vpop.permute.xlu0 %1292 }
 0x29e   :  { %5435 = vst [vmem:[#allocation73_spill] sm:$0xff] %v4038_v18  ;;  %v4040_v30 = vpop.permute.xlu1 %929  ;;  %v400_v18 = vsub.f32 %v3529_v50, %v3625_v15  ;;  %v399_v15 = vsub.f32 %v3541_v56, %v3642_v24 }
 0x29f   :  { %5436 = vst [vmem:[#allocation74_spill] sm:$0xff] %v4040_v30 }
 0x2a1   :  { %3178 = vset.pattern.permute.xlu1 %v5437_v63 }
 0x2a2   :  { %951 = vperm.xlu1 %3178, %v3877_v34   ;;  %v4044_v29 = vpop.permute.xlu0 %1406 }
 0x2a3   :  { %5438 = vst [vmem:[#allocation75_spill] sm:$0xff] %v4044_v29  ;;  %v4046_v17 = vpop.permute.xlu1 %1043  ;;  %v403_v29 = vmul.f32 1.442695, %v400_v18  ;;  %v401_v18 = vmul.f32 1.442695, %v399_v15 }
 0x2a4   :  { %5439 = vst [vmem:[#allocation76_spill] sm:$0xff] %v4046_v17  ;;  %v463_v17 = vsub.f32 %v3529_v50, %v3627_v16  ;;  %v462_v50 = vsub.f32 %v3541_v56, %v3689_v46 }
 0x2a5   :  { %3285 = vpow2.f32 %v403_v29 }
 0x2a6   :  { %3181 = vset.pattern.permute.xlu1 %v5440_v26 }
 0x2a7   :  { %1226 = vperm.xlu1 %3181, %v3877_v34   ;;  %v4050_v21 = vpop.permute.xlu0 %2084 }
 0x2a8   :  { %5441 = vst [vmem:[#allocation77_spill] sm:$0xff] %v4050_v21  ;;  %v4052_v39 = vpop.permute.xlu1 %1142 }
 0x2a9   :  { %5442 = vst [vmem:[#allocation78_spill] sm:$0xff] %v4052_v39  ;;  %v466_v39 = vmul.f32 1.442695, %v463_v17  ;;  %v464_v17 = vmul.f32 1.442695, %v462_v50 }
 0x2ab   :  { %3183 = vset.pattern.permute.xlu1 %v5386_v5  ;;  %v4057_v58 = vpop.permute.xlu0 %2106  ;;  %3287 = vpow2.f32 %v466_v39 }
 0x2ac   :  { %5443 = vst [vmem:[#allocation79_spill] sm:$0xff] %v4057_v58  ;;  %1402 = vperm.xlu1 %3183, %v3877_v34   ;;  %3289 = vpow2.f32 %v401_v18 }
 0x2ad   :  { %v4062_v25 = vpop.permute.xlu1 %1182  ;;  %3291 = vpow2.f32 %v464_v17 }
 0x2ae   :  { %5444 = vst [vmem:[#allocation80_spill] sm:$0xff] %v4062_v25 }
 0x2b0   :  { %3185 = vset.pattern.permute.xlu1 %v5396_v2  ;;  %v4065_v21 = vpop.permute.xlu0 %1769 }
 0x2b1   :  { %5445 = vst [vmem:[#allocation81_spill] sm:$0xff] %v4065_v21  ;;  %2040 = vperm.xlu1 %3185, %v3877_v34   ;;  %v4070_v58 = vpop.permute.xlu1 %1204 }
 0x2b2   :  { %5446 = vst [vmem:[#allocation82_spill] sm:$0xff] %v4070_v58  ;;  %v4086_v56 = vpop.eup %3285 }
 0x2b5   :  { %3186 = vset.pattern.permute.xlu1 %v5410_v41  ;;  %v4075_v16 = vpop.permute.xlu0 %1868 }
 0x2b6   :  { %5447 = vst [vmem:[#allocation83_spill] sm:$0xff] %v4075_v16  ;;  %1765 = vperm.xlu1 %3186, %v3877_v34   ;;  %v4078_v29 = vpop.permute.xlu1 %1318 }
 0x2b7   :  { %5448 = vst [vmem:[#allocation84_spill] sm:$0xff] %v4078_v29 }
 0x2b8   :  { %v4095_v18 = vpop.eup %3287 }
 0x2ba   :  { %3188 = vset.pattern.permute.xlu1 %v5380_v10  ;;  %v4081_v24 = vpop.permute.xlu0 %863 }
 0x2bb   :  { %5449 = vst [vmem:[#allocation85_spill] sm:$0xff] %v4081_v24  ;;  %1864 = vperm.xlu1 %3188, %v3877_v34   ;;  %v4084_v39 = vpop.permute.xlu1 %1358  ;;  %v4102_v24 = vpop.eup %3289 }
 0x2bc   :  { %5450 = vst [vmem:[#allocation86_spill] sm:$0xff] %v4084_v39 }
 0x2bf   :  { %409 = vrot.lane.b32.xlu1 %v4086_v56, %s3354_s14  ;;  %v4090_v46 = vpop.permute.xlu1 %1380  ;;  %v4092_v15 = vpop.permute.xlu0 %1039 }
 0x2c0   :  { %5451 = vst [vmem:[#allocation87_spill] sm:$0xff] %v4090_v46  ;;  %5452 = vst [vmem:[#allocation88_spill] sm:$0xff] %v4092_v15  ;;  %3191 = vset.pattern.permute.xlu1 %v5385_v49  ;;  %v4110_v46 = vpop.eup %3291 }
 0x2c3   :  { %472 = vrot.lane.b32.xlu1 %v4095_v18, %s3355_s15 }
 0x2c4   :  { %v4098_v50 = vpop.permute.xlu1 %1633  ;;  %v4100_v17 = vpop.permute.xlu0 %1138 }
 0x2c5   :  { %5453 = vst [vmem:[#allocation89_spill] sm:$0xff] %v4098_v50  ;;  %5454 = vst [vmem:[#allocation90_spill] sm:$0xff] %v4100_v17 }
 0x2c7   :  { %407 = vrot.lane.b32.xlu1 %v4102_v24, %s3354_s14 }
 0x2c9   :  { %v4106_v16 = vpop.permute.xlu1 %1996  ;;  %v4108_v21 = vpop.permute.xlu0 %1314 }
 0x2ca   :  { %5455 = vst [vmem:[#allocation91_spill] sm:$0xff] %v4106_v16  ;;  %5456 = vst [vmem:[#allocation92_spill] sm:$0xff] %v4108_v21 }
 0x2cb   :  { %470 = vrot.lane.b32.xlu1 %v4110_v46, %s3355_s15 }
 0x2ce   :  { %v4113_v39 = vpop.permute.xlu1 %1655  ;;  %v4115_v29 = vpop.permute.xlu0 %1677 }
 0x2cf   :  { %5457 = vst [vmem:[#allocation93_spill] sm:$0xff] %v4113_v39  ;;  %5458 = vst [vmem:[#allocation94_spill] sm:$0xff] %v4115_v29 }
 0x2d3   :  { %v4117_v50 = vpop.permute.xlu1 %2018  ;;  %v4119_v58 = vpop.permute.xlu0 %2128 }
 0x2d4   :  { %5459 = vst [vmem:[#allocation95_spill] sm:$0xff] %v4117_v50  ;;  %5460 = vst [vmem:[#allocation96_spill] sm:$0xff] %v4119_v58 }
 0x2d7   :  { %v442_v25 = vpop.permute.xlu0 %441 }
 0x2d8   :  { %v4121_v17 = vpop.permute.xlu1 %1681  ;;  %v448_v16 = vsel %vm413_vm4, %v442_v25, 0.0 }
 0x2d9   :  { %5461 = vst [vmem:[#allocation97_spill] sm:$0xff] %v4121_v17  ;;  %449 = vadd.xlane.f32.xlu0 %v448_v16 }
 0x2db   :  { %v504_v21 = vpop.permute.xlu0 %503 }
 0x2dc   :  { %v510_v15 = vsel %vm413_vm4, %v504_v21, 0.0 }
 0x2dd   :  { %v4125_v30 = vpop.permute.xlu1 %2044  ;;  %511 = vadd.xlane.f32.xlu0 %v510_v15 }
 0x2de   :  { %5462 = vst [vmem:[#allocation98_spill] sm:$0xff] %v4125_v30 }
 0x2e2   :  { %v4127_v39 = vpop.permute.xlu1 %1721 }
 0x2e3   :  { %5463 = vst [vmem:[#allocation99_spill] sm:$0xff] %v4127_v39 }
 0x2e6   :  { %v4129_v29 = vpop.permute.xlu1 %1743 }
 0x2e7   :  { %5464 = vst [vmem:[#allocation100_spill] sm:$0xff] %v4129_v29 }
 0x2eb   :  { %v4131_v50 = vpop.permute.xlu1 %2132 }
 0x2ec   :  { %5465 = vst [vmem:[#allocation101_spill] sm:$0xff] %v4131_v50 }
 0x2f0   :  { %v4133_v58 = vpop.permute.xlu1 %1457 }
 0x2f1   :  { %5466 = vst [vmem:[#allocation102_spill] sm:$0xff] %v4133_v58 }
 0x2f5   :  { %v4135_v36 = vpop.permute.xlu1 %1820 }
 0x2f6   :  { %5467 = vst [vmem:[#allocation103_spill] sm:$0xff] %v4135_v36 }
 0x2fa   :  { %v4137_v17 = vpop.permute.xlu1 %1479 }
 0x2fb   :  { %5468 = vst [vmem:[#allocation104_spill] sm:$0xff] %v4137_v17 }
 0x2ff   :  { %v4139_v25 = vpop.permute.xlu1 %1842 }
 0x300   :  { %5469 = vst [vmem:[#allocation105_spill] sm:$0xff] %v4139_v25 }
 0x304   :  { %v4141_v16 = vpop.permute.xlu1 %1505 }
 0x305   :  { %5470 = vst [vmem:[#allocation106_spill] sm:$0xff] %v4141_v16 }
 0x309   :  { %v4143_v21 = vpop.permute.xlu1 %1545 }
 0x30a   :  { %5471 = vst [vmem:[#allocation107_spill] sm:$0xff] %v4143_v21 }
 0x30e   :  { %v4145_v30 = vpop.permute.xlu1 %1908 }
 0x30f   :  { %5472 = vst [vmem:[#allocation108_spill] sm:$0xff] %v4145_v30  ;;  %v440_v30 = vpop.permute.xlu0 %439 }
 0x313   :  { %v4147_v15 = vpop.permute.xlu1 %1567  ;;  %v502_v13 = vpop.permute.xlu0 %501 }
 0x314   :  { %5473 = vst [vmem:[#allocation109_spill] sm:$0xff] %v4147_v15 }
 0x318   :  { %v4149_v39 = vpop.permute.xlu1 %772 }
 0x319   :  { %5474 = vst [vmem:[#allocation110_spill] sm:$0xff] %v4149_v39 }
 0x31d   :  { %v4151_v29 = vpop.permute.xlu1 %951 }
 0x31e   :  { %5475 = vst [vmem:[#allocation111_spill] sm:$0xff] %v4151_v29 }
 0x322   :  { %v4153_v50 = vpop.permute.xlu1 %1226 }
 0x323   :  { %5476 = vst [vmem:[#allocation112_spill] sm:$0xff] %v4153_v50 }
 0x327   :  { %v4155_v58 = vpop.permute.xlu1 %1402 }
 0x328   :  { %5477 = vst [vmem:[#allocation113_spill] sm:$0xff] %v4155_v58  ;;  %v445_v58 = vsel %vm413_vm4, %v440_v30, 0.0 }
 0x32c   :  { %v4157_v36 = vpop.permute.xlu1 %2040 }
 0x32d   :  { %5478 = vst [vmem:[#allocation114_spill] sm:$0xff] %v4157_v36 }
 0x331   :  { %v4159_v17 = vpop.permute.xlu1 %1765 }
 0x332   :  { %5479 = vst [vmem:[#allocation115_spill] sm:$0xff] %v4159_v17  ;;  %v507_v17 = vsel %vm413_vm4, %v502_v13, 0.0 }
 0x336   :  { %v4161_v25 = vpop.permute.xlu1 %1864 }
 0x337   :  { %5480 = vst [vmem:[#allocation116_spill] sm:$0xff] %v4161_v25 }
 0x33a   :  { %v410_v16 = vpop.permute.xlu1 %409 }
 0x33b   :  { %v417_v21 = vsel %vm413_vm4, %v410_v16, 0.0  ;;  %v4169_v16 = vpop.permute.xlu0 %1571 }
 0x33c   :  { %418 = vadd.xlane.f32.xlu1 %v417_v21  ;;  %5481 = vst [vmem:[#allocation117_spill] sm:$0xff] %v4169_v16 }
 0x33e   :  { %v473_v15 = vpop.permute.xlu1 %472 }
 0x33f   :  { %v479_v39 = vsel %vm413_vm4, %v473_v15, 0.0  ;;  %v4171_v21 = vpop.permute.xlu0 %694 }
 0x340   :  { %480 = vadd.xlane.f32.xlu1 %v479_v39  ;;  %5482 = vst [vmem:[#allocation118_spill] sm:$0xff] %v4171_v21 }
 0x342   :  { %v408_v29 = vpop.permute.xlu1 %407 }
 0x343   :  { %v414_v50 = vsel %vm413_vm4, %v408_v29, 0.0  ;;  %v4173_v39 = vpop.permute.xlu0 %725 }
 0x344   :  { %415 = vadd.xlane.f32.xlu0 %v414_v50  ;;  %446 = vadd.xlane.f32.xlu1 %v445_v58  ;;  %5483 = vst [vmem:[#allocation119_spill] sm:$0xff] %v4173_v39 }
 0x346   :  { %v471_v36 = vpop.permute.xlu1 %470 }
 0x347   :  { %v476_v25 = vsel %vm413_vm4, %v471_v36, 0.0  ;;  %v4175_v15 = vpop.permute.xlu0 %751 }
 0x348   :  { %477 = vadd.xlane.f32.xlu0 %v476_v25  ;;  %508 = vadd.xlane.f32.xlu1 %v507_v17  ;;  %5484 = vst [vmem:[#allocation120_spill] sm:$0xff] %v4175_v15 }
 0x34b   :  { %v4177_v29 = vpop.permute.xlu0 %777 }
 0x34c   :  { %5485 = vst [vmem:[#allocation121_spill] sm:$0xff] %v4177_v29 }
 0x362   :  { %v450_v30 = vpop.xlane.xlu0 %449 }
 0x366   :  { %v512_v58 = vpop.xlane.xlu0 %511 }
 0x3c5   :  { %v419_v50 = vpop.xlane.xlu1 %418 }
 0x3c6   :  { %3293 = vrcp.f32 %v419_v50 }
 0x3c7   :  { %3295 = vrcp.f32 %v450_v30 }
 0x3c9   :  { %v481_v36 = vpop.xlane.xlu1 %480 }
 0x3ca   :  { %3297 = vrcp.f32 %v481_v36 }
 0x3cb   :  { %3299 = vrcp.f32 %v512_v58 }
 0x3cd   :  { %v416_v13 = vpop.xlane.xlu0 %415  ;;  %v447_v16 = vpop.xlane.xlu1 %446 }
 0x3d1   :  { %v478_v17 = vpop.xlane.xlu0 %477  ;;  %v509_v30 = vpop.xlane.xlu1 %508 }
 0x3d2   :  { %3301 = vrcp.f32 %v478_v17 }
 0x3d3   :  { %v3294_v25 = vpop.eup %3293  ;;  %3303 = vrcp.f32 %v416_v13 }
 0x3d4   :  { %v423_v21 = vmul.f32 %v3294_v25, %v4086_v56  ;;  %v3296_v39 = vpop.eup %3295  ;;  %3305 = vrcp.f32 %v447_v16 }
 0x3d5   :  { %v454_v29 = vmul.f32 %v3296_v39, %v3936_v28  ;;  %3307 = vrcp.f32 %v509_v30 }
 0x3d6   :  { %521 = vrot.lane.b32.xlu1 %v423_v21, %s3354_s14 }
 0x3d7   :  { %v3298_v50 = vpop.eup %3297 }
 0x3d8   :  { %v485_v58 = vmul.f32 %v3298_v50, %v4095_v18  ;;  %v3300_v36 = vpop.eup %3299 }
 0x3d9   :  { %v516_v13 = vmul.f32 %v3300_v36, %v3946_v60 }
 0x3da   :  { %529 = vrot.lane.b32.xlu1 %v454_v29, %s3354_s14 }
 0x3de   :  { %537 = vrot.lane.b32.xlu1 %v485_v58, %s3354_s14 }
 0x3df   :  { %v3302_v17 = vpop.eup %3301 }
 0x3e0   :  { %v3304_v56 = vpop.eup %3303  ;;  %v484_v25 = vmul.f32 %v3302_v17, %v4110_v46 }
 0x3e1   :  { %v422_v28 = vmul.f32 %v3304_v56, %v4102_v24  ;;  %v3306_v16 = vpop.eup %3305 }
 0x3e2   :  { %545 = vrot.lane.b32.xlu1 %v516_v13, %s3354_s14  ;;  %535 = vrot.lane.b32.xlu0 %v484_v25, %s3354_s14  ;;  %v453_v18 = vmul.f32 %v3306_v16, %v3955_v35  ;;  %v3308_v21 = vpop.eup %3307  ;;  %v637_v16 = vmul.f32 %v3693_v48, %v3593_v7 }
 0x3e3   :  { %v515_v39 = vmul.f32 %v3308_v21, %v3963_v38 }
 0x3e6   :  { %519 = vrot.lane.b32.xlu1 %v422_v28, %s3354_s14  ;;  %v605_v28 = vmul.f32 %v3700_v51, %v3593_v7 }
 0x3e8   :  { %v607_v21 = vmul.f32 %v3599_v9, %v605_v28  ;;  %v49_v28 = vld [vmem:[%s5287_s1 + $0x80] sm:$0xff] }
 0x3ea   :  { %527 = vrot.lane.b32.xlu1 %v453_v18, %s3354_s14  ;;  %v3101_v18 = vunpack.i.h.bf16 %v3704_v52 }
 0x3ee   :  { %543 = vrot.lane.b32.xlu1 %v515_v39, %s3354_s14  ;;  %v639_v39 = vmul.f32 %v3599_v9, %v637_v16  ;;  %v50_v16 = vld [vmem:[%s5287_s1 + $0x88] sm:$0xff] }
 0x448   :  { %v522_v60 = vpop.permute.xlu1 %521 }
 0x44c   :  { %v530_v46 = vpop.permute.xlu1 %529 }
 0x44d   :  { %v550_v50 = vsel %vm413_vm4, %v522_v60, %v530_v46  ;;  %v617_v60 = vmul.f32 %v3101_v18, %v607_v21  ;;  %v52_v21 = vld [vmem:[%s5287_s1 + $0x98] sm:$0xff] }
 0x450   :  { %v538_v29 = vpop.permute.xlu1 %537 }
 0x451   :  { %v553_v24 = vsel %vm551_vm5, %v550_v50, %v538_v29  ;;  %v3106_v29 = vunpack.i.h.bf16 %v3719_v57  ;;  %v653_v50 = vmul.f32 %v3700_v51, %v3582_v6 }
 0x453   :  { %v655_v7 = vmul.f32 %v3568_v3, %v653_v50 }
 0x454   :  { %v546_v30 = vpop.permute.xlu1 %545  ;;  %v536_v38 = vpop.permute.xlu0 %535 }
 0x455   :  { %v556_v58 = vsel %vm554_vm6, %v553_v24, %v546_v30  ;;  %v649_v30 = vmul.f32 %v3106_v29, %v639_v39  ;;  %v636_v39 = vmul.f32 %v3708_v53, %v3607_v11 }
 0x456   :  { %622 = vrot.lane.b32.xlu1 %v556_v58, %s3331_s17  ;;  %v661_v58 = vmul.f32 %v3693_v48, %v3582_v6  ;;  %v44_v48 = vld [vmem:[%s5287_s1 + $0x58] sm:$0xff] }
 0x458   :  { %v520_v35 = vpop.permute.xlu1 %519 }
 0x45c   :  { %v528_v36 = vpop.permute.xlu1 %527 }
 0x45d   :  { %v549_v17 = vsel %vm413_vm4, %v520_v35, %v528_v36  ;;  %v663_v35 = vmul.f32 %v3568_v3, %v661_v58  ;;  %v657_v36 = vmul.f32 %v3101_v18, %v655_v7  ;;  %v43_v3 = vld [vmem:[%s5287_s1 + $0x50] sm:$0xff]  ;;  %v3100_v7 = vunpack.i.l.bf16 %v3704_v52 }
 0x45e   :  { %v552_v56 = vsel %vm551_vm5, %v549_v17, %v536_v38  ;;  %2909 = vmatprep.mubr.msk.f32.mxu0 %vm59_vm0, %v43_v3  ;;  %v45_v38 = vld [vmem:[%s5287_s1 + $0x60] sm:$0xff]  ;;  %v51_v18 = vld [vmem:[%s5287_s1 + $0x90] sm:$0xff] }
 0x45f   :  { %v665_v17 = vmul.f32 %v3106_v29, %v663_v35  ;;  %2910 = vmatmul.mubr.msk.f32.gmra.mxu0 %vm59_vm0, %v44_v48  ;;  %v638_v29 = vmul.f32 %v3596_v8, %v636_v39 }
 0x460   :  { %v544_v13 = vpop.permute.xlu1 %543  ;;  %2912 = vmatprep.mubr.msk.f32.mxu0 %vm59_vm0, %v45_v38 }
 0x461   :  { %v555_v25 = vsel %vm554_vm6, %v552_v56, %v544_v13  ;;  %v46_v13 = vld [vmem:[%s5287_s1 + $0x68] sm:$0xff]  ;;  %v47_v56 = vld [vmem:[%s5287_s1 + $0x70] sm:$0xff] }
 0x462   :  { %620 = vrot.lane.b32.xlu0 %v555_v25, %s3331_s17  ;;  %v48_v25 = vld [vmem:[%s5287_s1 + $0x78] sm:$0xff]  ;;  %s3357_s1 = smov 64  }
 0x463   :  { %2913 = vmatmul.mubr.msk.f32.gmra.mxu0 %vm59_vm0, %v46_v13 }
 0x464   :  { %2915 = vmatprep.mubr.msk.f32.mxu0 %vm59_vm0, %v47_v56 }
 0x467   :  { %2916 = vmatmul.mubr.msk.f32.gmra.mxu0 %vm59_vm0, %v48_v25  ;;  %v604_v25 = vmul.f32 %v3710_v54, %v3607_v11 }
 0x468   :  { %2918 = vmatprep.mubr.msk.f32.mxu0 %vm59_vm0, %v49_v28 }
 0x46b   :  { %2919 = vmatmul.mubr.msk.f32.gmra.mxu0 %vm59_vm0, %v50_v16 }
 0x46c   :  { %2921 = vmatprep.mubr.msk.f32.mxu0 %vm59_vm0, %v51_v18  ;;  %v606_v18 = vmul.f32 %v3596_v8, %v604_v25 }
 0x46f   :  { %2922 = vmatmul.mubr.msk.f32.gmra.mxu0 %vm59_vm0, %v52_v21  ;;  %v616_v21 = vmul.f32 %v3100_v7, %v606_v18 }
 0x4c8   :  { %v623_v46 = vpop.permute.xlu1 %622 }
 0x4c9   :  { %v4211_v24 = vmul.f32 %v623_v46, %v617_v60  ;;  %v4218_v9 = vmul.f32 %v649_v30, %v623_v46  ;;  %v4223_v51 = vmul.f32 %v657_v36, %v623_v46  ;;  %v4227_v6 = vmul.f32 %v665_v17, %v623_v46 }
 0x4ca   :  { %v3105_v60 = vunpack.i.l.bf16 %v3719_v57  ;;  %v652_v46 = vmul.f32 %v3710_v54, %v3562_v0  ;;  %v660_v57 = vmul.f32 %v3708_v53, %v3562_v0 }
 0x4cb   :  { %811 = vperm.xlu1 %3191, %v4211_v24   ;;  %711 = vperm.xlu0 %3190, %v4211_v24  }
 0x4cc   :  { %v648_v30 = vmul.f32 %v3105_v60, %v638_v29  ;;  %v654_v58 = vmul.f32 %v3565_v1, %v652_v46  ;;  %v662_v17 = vmul.f32 %v3565_v1, %v660_v57 }
 0x4ce   :  { %v656_v36 = vmul.f32 %v3100_v7, %v654_v58  ;;  %v664_v0 = vmul.f32 %v3105_v60, %v662_v17 }
 0x4cf   :  { %833 = vperm.xlu1 %3191, %v4218_v9   ;;  %737 = vperm.xlu0 %3190, %v4218_v9  }
 0x4d3   :  { %855 = vperm.xlu1 %3191, %v4223_v51   ;;  %763 = vperm.xlu0 %3190, %v4223_v51  }
 0x4d4   :  { %v621_v50 = vpop.permute.xlu0 %620 }
 0x4d5   :  { %v4328_v35 = vmul.f32 %v648_v30, %v621_v50  ;;  %v4334_v3 = vmul.f32 %v656_v36, %v621_v50  ;;  %v4339_v52 = vmul.f32 %v664_v0, %v621_v50  ;;  %v4393_v54 = vmul.f32 %v621_v50, %v616_v21 }
 0x4d7   :  { %877 = vperm.xlu1 %3191, %v4227_v6   ;;  %789 = vperm.xlu0 %3190, %v4227_v6  }
 0x4db   :  { %3193 = vset.pattern.permute.xlu1 %v5389_v23  ;;  %3192 = vset.pattern.permute.xlu0 %v5437_v63 }
 0x4dc   :  { %987 = vperm.xlu1 %3193, %v4211_v24   ;;  %899 = vperm.xlu0 %3192, %v4211_v24  }
 0x4e0   :  { %1009 = vperm.xlu1 %3193, %v4218_v9   ;;  %921 = vperm.xlu0 %3192, %v4218_v9  }
 0x4e4   :  { %1031 = vperm.xlu1 %3193, %v4223_v51   ;;  %943 = vperm.xlu0 %3192, %v4223_v51  }
 0x4e8   :  { %1053 = vperm.xlu1 %3193, %v4227_v6   ;;  %965 = vperm.xlu0 %3192, %v4227_v6  }
 0x4ec   :  { %3194 = vset.pattern.permute.xlu1 %v5393_v33  ;;  %3195 = vset.pattern.permute.xlu0 %v5440_v26 }
 0x4ed   :  { %1086 = vperm.xlu1 %3194, %v4211_v24   ;;  %1174 = vperm.xlu0 %3195, %v4211_v24  }
 0x4f1   :  { %1108 = vperm.xlu1 %3194, %v4218_v9   ;;  %1196 = vperm.xlu0 %3195, %v4218_v9  }
 0x4f5   :  { %1130 = vperm.xlu1 %3194, %v4223_v51   ;;  %1218 = vperm.xlu0 %3195, %v4223_v51  }
 0x4f9   :  { %1152 = vperm.xlu1 %3194, %v4227_v6   ;;  %1240 = vperm.xlu0 %3195, %v4227_v6  }
 0x4fd   :  { %3196 = vset.pattern.permute.xlu1 %v5381_v43  ;;  %3197 = vset.pattern.permute.xlu0 %v5386_v5 }
 0x4fe   :  { %1262 = vperm.xlu1 %3196, %v4211_v24   ;;  %1350 = vperm.xlu0 %3197, %v4211_v24  }
 0x502   :  { %1284 = vperm.xlu1 %3196, %v4218_v9   ;;  %1372 = vperm.xlu0 %3197, %v4218_v9  }
 0x506   :  { %1306 = vperm.xlu1 %3196, %v4223_v51   ;;  %1394 = vperm.xlu0 %3197, %v4223_v51  }
 0x50a   :  { %1328 = vperm.xlu1 %3196, %v4227_v6   ;;  %1416 = vperm.xlu0 %3197, %v4227_v6  }
 0x50e   :  { %3198 = vset.pattern.permute.xlu1 %v5392_v22  ;;  %3200 = vset.pattern.permute.xlu0 %v5392_v22 }
 0x50f   :  { %1625 = vperm.xlu1 %3198, %v4211_v24   ;;  %1669 = vperm.xlu0 %3200, %v4223_v51  }
 0x513   :  { %1647 = vperm.xlu1 %3198, %v4218_v9   ;;  %1691 = vperm.xlu0 %3200, %v4227_v6  }
 0x517   :  { %3199 = vset.pattern.permute.xlu1 %v5396_v2  ;;  %3201 = vset.pattern.permute.xlu0 %v5396_v2 }
 0x518   :  { %1988 = vperm.xlu1 %3199, %v4211_v24   ;;  %2054 = vperm.xlu0 %3201, %v4227_v6  }
 0x51c   :  { %2010 = vperm.xlu1 %3199, %v4218_v9   ;;  %3209 = vset.pattern.permute.xlu0 %v5401_v62 }
 0x51d   :  { %2142 = vperm.xlu0 %3209, %v4227_v6  }
 0x520   :  { %2032 = vperm.xlu1 %3199, %v4223_v51  }
 0x521   :  { %3216 = vset.pattern.permute.xlu0 %v5406_v32 }
 0x522   :  { %1559 = vperm.xlu0 %3216, %v4218_v9  }
 0x524   :  { %3202 = vset.pattern.permute.xlu1 %v5410_v41 }
 0x525   :  { %1713 = vperm.xlu1 %3202, %v4211_v24  }
 0x526   :  { %3220 = vset.pattern.permute.xlu0 %v5385_v49 }
 0x527   :  { %829 = vperm.xlu0 %3220, %v4328_v35  }
 0x529   :  { %3203 = vset.pattern.permute.xlu1 %v5401_v62 }
 0x52a   :  { %2076 = vperm.xlu1 %3203, %v4211_v24  }
 0x52b   :  { %851 = vperm.xlu0 %3220, %v4334_v3  }
 0x52e   :  { %3204 = vset.pattern.permute.xlu1 %v5410_v41 }
 0x52f   :  { %1735 = vperm.xlu1 %3204, %v4218_v9   ;;  %873 = vperm.xlu0 %3220, %v4339_v52  }
 0x533   :  { %3205 = vset.pattern.permute.xlu1 %v5401_v62  ;;  %3223 = vset.pattern.permute.xlu0 %v5389_v23 }
 0x534   :  { %2098 = vperm.xlu1 %3205, %v4218_v9   ;;  %1005 = vperm.xlu0 %3223, %v4328_v35  }
 0x538   :  { %3206 = vset.pattern.permute.xlu1 %v5410_v41  ;;  %1027 = vperm.xlu0 %3223, %v4334_v3  }
 0x539   :  { %1757 = vperm.xlu1 %3206, %v4223_v51  }
 0x53c   :  { %1049 = vperm.xlu0 %3223, %v4339_v52  }
 0x53d   :  { %3207 = vset.pattern.permute.xlu1 %v5401_v62 }
 0x53e   :  { %2120 = vperm.xlu1 %3207, %v4223_v51  }
 0x540   :  { %3225 = vset.pattern.permute.xlu0 %v5393_v33 }
 0x541   :  { %1104 = vperm.xlu0 %3225, %v4328_v35  }
 0x542   :  { %3208 = vset.pattern.permute.xlu1 %v5410_v41 }
 0x543   :  { %1779 = vperm.xlu1 %3208, %v4227_v6  }
 0x545   :  { %1126 = vperm.xlu0 %3225, %v4334_v3  }
 0x546   :  { %v4359_v1 = vpop.permute.xlu1 %811  ;;  %v4361_v53 = vpop.permute.xlu0 %711 }
 0x547   :  { %5486 = vst [vmem:[#allocation122_spill] sm:$0xff] %v4359_v1  ;;  %5487 = vst [vmem:[#allocation123_spill] sm:$0xff] %v4361_v53  ;;  %3210 = vset.pattern.permute.xlu1 %v5418_v45 }
 0x548   :  { %1449 = vperm.xlu1 %3210, %v4211_v24  }
 0x549   :  { %1148 = vperm.xlu0 %3225, %v4339_v52  }
 0x54a   :  { %v4366_v48 = vpop.permute.xlu1 %833  ;;  %v4368_v38 = vpop.permute.xlu0 %737 }
 0x54b   :  { %5488 = vst [vmem:[#allocation124_spill] sm:$0xff] %v4366_v48  ;;  %5489 = vst [vmem:[#allocation125_spill] sm:$0xff] %v4368_v38 }
 0x54c   :  { %1471 = vperm.xlu1 %3210, %v4218_v9  }
 0x54d   :  { %3228 = vset.pattern.permute.xlu0 %v5381_v43 }
 0x54e   :  { %v4372_v13 = vpop.permute.xlu1 %855  ;;  %v4374_v56 = vpop.permute.xlu0 %763  ;;  %1280 = vperm.xlu0 %3228, %v4328_v35  }
 0x54f   :  { %5490 = vst [vmem:[#allocation126_spill] sm:$0xff] %v4372_v13  ;;  %5491 = vst [vmem:[#allocation127_spill] sm:$0xff] %v4374_v56 }
 0x550   :  { %3211 = vset.pattern.permute.xlu1 %v5380_v10 }
 0x551   :  { %1812 = vperm.xlu1 %3211, %v4211_v24  }
 0x552   :  { %v4381_v28 = vpop.permute.xlu1 %877  ;;  %v4383_v16 = vpop.permute.xlu0 %789  ;;  %1302 = vperm.xlu0 %3228, %v4334_v3  }
 0x553   :  { %5492 = vst [vmem:[#allocation128_spill] sm:$0xff] %v4381_v28  ;;  %5493 = vst [vmem:[#allocation129_spill] sm:$0xff] %v4383_v16 }
 0x555   :  { %1834 = vperm.xlu1 %3211, %v4218_v9  }
 0x556   :  { %1324 = vperm.xlu0 %3228, %v4339_v52  }
 0x557   :  { %v4389_v39 = vpop.permute.xlu1 %987  ;;  %v4391_v11 = vpop.permute.xlu0 %899 }
 0x559   :  { %1856 = vperm.xlu1 %3211, %v4223_v51  }
 0x55a   :  { %3230 = vset.pattern.permute.xlu0 %v5392_v22 }
 0x55b   :  { %v4397_v60 = vpop.permute.xlu1 %1009  ;;  %v4399_v46 = vpop.permute.xlu0 %921  ;;  %1621 = vperm.xlu0 %3230, %v4393_v54  }
 0x55d   :  { %3212 = vset.pattern.permute.xlu1 %v5418_v45 }
 0x55e   :  { %1515 = vperm.xlu1 %3212, %v4227_v6  }
 0x55f   :  { %v4404_v8 = vpop.permute.xlu1 %1031  ;;  %v4406_v29 = vpop.permute.xlu0 %943  ;;  %1643 = vperm.xlu0 %3230, %v4328_v35  }
 0x562   :  { %3213 = vset.pattern.permute.xlu1 %v5380_v10 }
 0x563   :  { %1878 = vperm.xlu1 %3213, %v4227_v6   ;;  %v4411_v50 = vpop.permute.xlu1 %1053  ;;  %v4413_v30 = vpop.permute.xlu0 %965  ;;  %3232 = vset.pattern.permute.xlu0 %v5396_v2 }
 0x564   :  { %2006 = vperm.xlu0 %3232, %v4328_v35  }
 0x567   :  { %3214 = vset.pattern.permute.xlu1 %v5406_v32 }
 0x568   :  { %1537 = vperm.xlu1 %3214, %v4211_v24   ;;  %v4419_v58 = vpop.permute.xlu1 %1086  ;;  %v4421_v57 = vpop.permute.xlu0 %1174  ;;  %2028 = vperm.xlu0 %3232, %v4334_v3  }
 0x569   :  { %5494 = vst [vmem:[#allocation130_spill] sm:$0xff] %v4419_v58  ;;  %5495 = vst [vmem:[#allocation131_spill] sm:$0xff] %v4421_v57 }
 0x56c   :  { %3215 = vset.pattern.permute.xlu1 %v5431_v14  ;;  %v4425_v7 = vpop.permute.xlu1 %1108  ;;  %v4427_v36 = vpop.permute.xlu0 %1196  ;;  %3237 = vset.pattern.permute.xlu0 %v5410_v41 }
 0x56d   :  { %5496 = vst [vmem:[#allocation132_spill] sm:$0xff] %v4425_v7  ;;  %5497 = vst [vmem:[#allocation133_spill] sm:$0xff] %v4427_v36  ;;  %1900 = vperm.xlu1 %3215, %v4211_v24   ;;  %1731 = vperm.xlu0 %3237, %v4328_v35  }
 0x570   :  { %v4432_v17 = vpop.permute.xlu1 %1130  ;;  %v4434_v0 = vpop.permute.xlu0 %1218 }
 0x571   :  { %5498 = vst [vmem:[#allocation134_spill] sm:$0xff] %v4432_v17  ;;  %5499 = vst [vmem:[#allocation135_spill] sm:$0xff] %v4434_v0  ;;  %1922 = vperm.xlu1 %3215, %v4218_v9   ;;  %1753 = vperm.xlu0 %3237, %v4334_v3  }
 0x574   :  { %v4438_v25 = vpop.permute.xlu1 %1152  ;;  %v4440_v18 = vpop.permute.xlu0 %1240 }
 0x575   :  { %5500 = vst [vmem:[#allocation136_spill] sm:$0xff] %v4438_v25  ;;  %5501 = vst [vmem:[#allocation137_spill] sm:$0xff] %v4440_v18  ;;  %3217 = vset.pattern.permute.xlu1 %v5406_v32  ;;  %1775 = vperm.xlu0 %3237, %v4339_v52  }
 0x576   :  { %1581 = vperm.xlu1 %3217, %v4223_v51  }
 0x579   :  { %v4445_v24 = vpop.permute.xlu1 %1262  ;;  %v4447_v21 = vpop.permute.xlu0 %1350  ;;  %3240 = vset.pattern.permute.xlu0 %v5406_v32 }
 0x57a   :  { %3218 = vset.pattern.permute.xlu1 %v5416_v55  ;;  %1593 = vperm.xlu0 %3240, %v3780_v19  }
 0x57b   :  { %706 = vperm.xlu1 %3218, %v4393_v54  }
 0x57d   :  { %v4453_v9 = vpop.permute.xlu1 %1284  ;;  %v4455_v18 = vpop.permute.xlu0 %1372 }
 0x57e   :  { %2271 = vrot.lane.b32.xlu0 %v3520_v47, %s3336_s5 }
 0x57f   :  { %732 = vperm.xlu1 %3218, %v4328_v35  }
 0x581   :  { %v4460_v0 = vpop.permute.xlu1 %1306  ;;  %v4462_v36 = vpop.permute.xlu0 %1394 }
 0x582   :  { %1603 = vperm.xlu0 %3240, %v4227_v6  }
 0x583   :  { %758 = vperm.xlu1 %3218, %v4334_v3  }
 0x585   :  { %v4466_v55 = vpop.permute.xlu1 %1328  ;;  %v4468_v57 = vpop.permute.xlu0 %1416 }
 0x586   :  { %3242 = vset.pattern.permute.xlu0 %v5431_v14 }
 0x587   :  { %1886 = vperm.xlu0 %3242, %v3666_v40   ;;  %784 = vperm.xlu1 %3218, %v4339_v52  }
 0x58a   :  { %v4473_v25 = vpop.permute.xlu1 %1625  ;;  %v4475_v17 = vpop.permute.xlu0 %1669 }
 0x58b   :  { %1912 = vperm.xlu0 %3242, %v3673_v42   ;;  %3219 = vset.pattern.permute.xlu1 %v5385_v49 }
 0x58c   :  { %807 = vperm.xlu1 %3219, %v4393_v54  }
 0x58e   :  { %v4480_v58 = vpop.permute.xlu1 %1647  ;;  %v4482_v7 = vpop.permute.xlu0 %1691 }
 0x58f   :  { %5502 = vst [vmem:[#allocation138_spill] sm:$0xff] %v4482_v7  ;;  %1930 = vperm.xlu0 %3242, %v3766_v4  }
 0x590   :  { %3221 = vset.pattern.permute.xlu1 %v5437_v63 }
 0x591   :  { %895 = vperm.xlu1 %3221, %v4393_v54  }
 0x593   :  { %v4487_v40 = vpop.permute.xlu1 %1988  ;;  %v4489_v28 = vpop.permute.xlu0 %2054  ;;  %1956 = vperm.xlu0 %3242, %v3780_v19  }
 0x594   :  { %5503 = vst [vmem:[#allocation139_spill] sm:$0xff] %v4487_v40  ;;  %5504 = vst [vmem:[#allocation140_spill] sm:$0xff] %v4489_v28 }
 0x595   :  { %917 = vperm.xlu1 %3221, %v4328_v35  }
 0x597   :  { %v4493_v42 = vpop.permute.xlu1 %2010  ;;  %3243 = vset.pattern.permute.xlu0 %v5418_v45 }
 0x598   :  { %5505 = vst [vmem:[#allocation141_spill] sm:$0xff] %v4493_v42  ;;  %v4496_v49 = vpop.permute.xlu0 %2142  ;;  %1439 = vperm.xlu0 %3243, %v3632_v20  }
 0x599   :  { %5506 = vst [vmem:[#allocation142_spill] sm:$0xff] %v4496_v49  ;;  %939 = vperm.xlu1 %3221, %v4334_v3  }
 0x59b   :  { %v4500_v4 = vpop.permute.xlu1 %2032 }
 0x59c   :  { %5507 = vst [vmem:[#allocation143_spill] sm:$0xff] %v4500_v4  ;;  %1483 = vperm.xlu0 %3243, %v3680_v44  }
 0x59d   :  { %v4503_v63 = vpop.permute.xlu0 %1559  ;;  %961 = vperm.xlu1 %3221, %v4339_v52  }
 0x5a0   :  { %v4506_v19 = vpop.permute.xlu1 %1713  ;;  %1493 = vperm.xlu0 %3243, %v4223_v51  }
 0x5a1   :  { %5508 = vst [vmem:[#allocation144_spill] sm:$0xff] %v4506_v19  ;;  %3222 = vset.pattern.permute.xlu1 %v5389_v23 }
 0x5a2   :  { %v4510_v13 = vpop.permute.xlu0 %829  ;;  %983 = vperm.xlu1 %3222, %v4393_v54  }
 0x5a3   :  { %5509 = vst [vmem:[#allocation145_spill] sm:$0xff] %v4510_v13 }
 0x5a4   :  { %1501 = vperm.xlu0 %3243, %v3877_v34  }
 0x5a5   :  { %v4514_v20 = vpop.permute.xlu1 %2076 }
 0x5a6   :  { %5510 = vst [vmem:[#allocation146_spill] sm:$0xff] %v4514_v20  ;;  %v4516_v48 = vpop.permute.xlu0 %851  ;;  %3224 = vset.pattern.permute.xlu1 %v5393_v33 }
 0x5a7   :  { %5511 = vst [vmem:[#allocation147_spill] sm:$0xff] %v4516_v48  ;;  %1082 = vperm.xlu1 %3224, %v4393_v54  }
 0x5a8   :  { %1445 = vperm.xlu0 %3243, %v4393_v54  }
 0x5aa   :  { %v4521_v1 = vpop.permute.xlu1 %1735  ;;  %v4523_v16 = vpop.permute.xlu0 %873 }
 0x5ab   :  { %5512 = vst [vmem:[#allocation148_spill] sm:$0xff] %v4521_v1  ;;  %5513 = vst [vmem:[#allocation149_spill] sm:$0xff] %v4523_v16  ;;  %3226 = vset.pattern.permute.xlu1 %v5440_v26 }
 0x5ac   :  { %1467 = vperm.xlu0 %3243, %v4328_v35   ;;  %1170 = vperm.xlu1 %3226, %v4393_v54  }
 0x5af   :  { %v4528_v23 = vpop.permute.xlu1 %2098  ;;  %v4530_v13 = vpop.permute.xlu0 %1005 }
 0x5b0   :  { %5514 = vst [vmem:[#allocation150_spill] sm:$0xff] %v4528_v23  ;;  %3245 = vset.pattern.permute.xlu0 %v5380_v10  ;;  %1192 = vperm.xlu1 %3226, %v4328_v35  }
 0x5b1   :  { %1830 = vperm.xlu0 %3245, %v4328_v35  }
 0x5b3   :  { %v4535_v33 = vpop.permute.xlu0 %1027 }
 0x5b4   :  { %v4537_v48 = vpop.permute.xlu1 %1757  ;;  %1214 = vperm.xlu1 %3226, %v4334_v3  }
 0x5b5   :  { %5515 = vst [vmem:[#allocation151_spill] sm:$0xff] %v4537_v48  ;;  %1852 = vperm.xlu0 %3245, %v4334_v3  }
 0x5b7   :  { %v4541_v26 = vpop.permute.xlu0 %1049 }
 0x5b8   :  { %1236 = vperm.xlu1 %3226, %v4339_v52  }
 0x5b9   :  { %v4544_v16 = vpop.permute.xlu1 %2120  ;;  %3247 = vset.pattern.permute.xlu0 %v5418_v45 }
 0x5ba   :  { %5516 = vst [vmem:[#allocation152_spill] sm:$0xff] %v4544_v16  ;;  %1511 = vperm.xlu0 %3247, %v4339_v52  }
 0x5bc   :  { %v4548_v56 = vpop.permute.xlu0 %1104  ;;  %3227 = vset.pattern.permute.xlu1 %v5381_v43 }
 0x5bd   :  { %1258 = vperm.xlu1 %3227, %v4393_v54  }
 0x5be   :  { %v4552_v53 = vpop.permute.xlu1 %1779  ;;  %3249 = vset.pattern.permute.xlu0 %v5406_v32 }
 0x5bf   :  { %5517 = vst [vmem:[#allocation153_spill] sm:$0xff] %v4552_v53  ;;  %1533 = vperm.xlu0 %3249, %v4393_v54  }
 0x5c0   :  { %v4556_v15 = vpop.permute.xlu0 %1126 }
 0x5c1   :  { %3229 = vset.pattern.permute.xlu1 %v5386_v5 }
 0x5c2   :  { %1346 = vperm.xlu1 %3229, %v4393_v54  }
 0x5c3   :  { %v4560_v38 = vpop.permute.xlu1 %1449  ;;  %1577 = vperm.xlu0 %3249, %v4334_v3  }
 0x5c4   :  { %v4563_v49 = vpop.permute.xlu0 %1148 }
 0x5c6   :  { %1368 = vperm.xlu1 %3229, %v4328_v35  }
 0x5c7   :  { %v4566_v43 = vpop.permute.xlu1 %1471  ;;  %3265 = vset.pattern.permute.xlu0 %v5431_v14 }
 0x5c9   :  { %v4569_v16 = vpop.permute.xlu0 %1280 }
 0x5ca   :  { %1390 = vperm.xlu1 %3229, %v4334_v3  }
 0x5cc   :  { %v4572_v23 = vpop.permute.xlu1 %1812 }
 0x5cd   :  { %5518 = vst [vmem:[#allocation154_spill] sm:$0xff] %v4572_v23  ;;  %v4574_v5 = vpop.permute.xlu0 %1302 }
 0x5ce   :  { %1412 = vperm.xlu1 %3229, %v4339_v52  }
 0x5d0   :  { %v4577_v20 = vpop.permute.xlu1 %1834 }
 0x5d1   :  { %5519 = vst [vmem:[#allocation155_spill] sm:$0xff] %v4577_v20  ;;  %v4579_v28 = vpop.permute.xlu0 %1324 }
 0x5d2   :  { %3231 = vset.pattern.permute.xlu1 %v5396_v2 }
 0x5d3   :  { %1984 = vperm.xlu1 %3231, %v4393_v54  }
 0x5d4   :  { %v4583_v53 = vpop.permute.xlu1 %1856 }
 0x5d5   :  { %5520 = vst [vmem:[#allocation156_spill] sm:$0xff] %v4583_v53 }
 0x5d6   :  { %v4585_v48 = vpop.permute.xlu0 %1621 }
 0x5d7   :  { %5521 = vst [vmem:[#allocation157_spill] sm:$0xff] %v4585_v48  ;;  %3233 = vset.pattern.permute.xlu1 %v5392_v22 }
 0x5d8   :  { %1665 = vperm.xlu1 %3233, %v4334_v3  }
 0x5d9   :  { %v4589_v23 = vpop.permute.xlu1 %1515 }
 0x5da   :  { %v4591_v4 = vpop.permute.xlu0 %1643 }
 0x5dc   :  { %1687 = vperm.xlu1 %3233, %v4339_v52  }
 0x5de   :  { %v4594_v20 = vpop.permute.xlu1 %1878 }
 0x5df   :  { %5522 = vst [vmem:[#allocation158_spill] sm:$0xff] %v4594_v20  ;;  %v4596_v1 = vpop.permute.xlu0 %2006 }
 0x5e0   :  { %5523 = vst [vmem:[#allocation159_spill] sm:$0xff] %v4596_v1  ;;  %3234 = vset.pattern.permute.xlu1 %v5396_v2 }
 0x5e1   :  { %2050 = vperm.xlu1 %3234, %v4339_v52  }
 0x5e3   :  { %v4600_v53 = vpop.permute.xlu1 %1537  ;;  %v4602_v40 = vpop.permute.xlu0 %2028 }
 0x5e4   :  { %5524 = vst [vmem:[#allocation160_spill] sm:$0xff] %v4602_v40 }
 0x5e5   :  { %3235 = vset.pattern.permute.xlu1 %v5410_v41 }
 0x5e6   :  { %1709 = vperm.xlu1 %3235, %v4393_v54  }
 0x5e8   :  { %v4606_v22 = vpop.permute.xlu1 %1900  ;;  %v4608_v42 = vpop.permute.xlu0 %1731 }
 0x5e9   :  { %5525 = vst [vmem:[#allocation161_spill] sm:$0xff] %v4606_v22  ;;  %5526 = vst [vmem:[#allocation162_spill] sm:$0xff] %v4608_v42  ;;  %v5531_v42 = vlaneseq }
 0x5ea   :  { %3236 = vset.pattern.permute.xlu1 %v5401_v62 }
 0x5eb   :  { %2072 = vperm.xlu1 %3236, %v4393_v54   ;;  %v690_v19 = vand.u32 127, %v5531_v42 }
 0x5ec   :  { %v4612_v20 = vpop.permute.xlu1 %1922  ;;  %v4614_v2 = vpop.permute.xlu0 %1753 }
 0x5ed   :  { %5527 = vst [vmem:[#allocation163_spill] sm:$0xff] %v4612_v20  ;;  %5528 = vst [vmem:[#allocation164_spill] sm:$0xff] %v4614_v2  ;;  %v4630_v2 = vcvt.s32.f32 %v690_v19 }
 0x5ef   :  { %2094 = vperm.xlu1 %3236, %v4328_v35   ;;  %vm915_vm7 = vcmp.eq.f32.partialorder %v3831_v31, %v4630_v2  ;;  %vm893_vm8 = vcmp.eq.f32.partialorder %v3785_v12, %v4630_v2  ;;  %vm937_vm9 = vcmp.eq.f32.partialorder %v3837_v61, %v4630_v2  ;;  %vm959_vm10 = vcmp.eq.f32.partialorder %v3998_v27, %v4630_v2  ;;  %v5538_v27 = vld [vmem:[#allocation20_spill] sm:$0xff] }
 0x5f0   :  { %v4617_v1 = vpop.permute.xlu0 %1775  ;;  %vm914_vm11 = vcmp.eq.f32.partialorder %v4034_v59, %v4630_v2  ;;  %vm981_vm13 = vcmp.eq.f32.partialorder %v3787_v37, %v4630_v2  ;;  %vm1531_vm14 = vcmp.eq.f32.partialorder %v5538_v27, %v4630_v2  ;;  %v5541_v59 = vld [vmem:[#allocation32_spill] sm:$0xff] }
 0x5f1   :  { %5529 = vst [vmem:[#allocation165_spill] sm:$0xff] %v4617_v1  ;;  %v4619_v40 = vpop.permute.xlu1 %1581  ;;  %vm980_vm3 = vcmp.eq.f32.partialorder %v5541_v59, %v4630_v2  ;;  %v991_v37 = vsel %vm981_vm13, %v4389_v39, 0.0  ;;  %v5556_v27 = vld [vmem:[#allocation88_spill] sm:$0xff] }
 0x5f3   :  { %2116 = vperm.xlu1 %3236, %v4334_v3  }
 0x5f5   :  { %v1594_v41 = vpop.permute.xlu0 %1593 }
 0x5f6   :  { %v4622_v22 = vpop.permute.xlu1 %706  ;;  %vm1597_vm0 = vcmp.eq.f32.partialorder %v1594_v41, %v4630_v2 }
 0x5f7   :  { %5530 = vst [vmem:[#allocation166_spill] sm:$0xff] %v4622_v22  ;;  %2138 = vperm.xlu1 %3236, %v4339_v52  }
 0x5f9   :  { %v4626_v7 = vpop.permute.xlu0 %2271 }
 0x5fa   :  { %5532 = vst [vmem:[#allocation167_spill] sm:$0xff] %v4626_v7  ;;  %v4628_v20 = vpop.permute.xlu1 %732 }
 0x5fb   :  { %3238 = vset.pattern.permute.xlu1 %v5431_v14 }
 0x5fc   :  { %1934 = vperm.xlu1 %3238, %v3680_v44  }
 0x5fd   :  { %v1604_v1 = vpop.permute.xlu0 %1603 }
 0x5fe   :  { %v4635_v48 = vsel %vm1597_vm0, %v1604_v1, 0.0  ;;  %v4637_v22 = vpop.permute.xlu1 %758 }
 0x5ff   :  { %5533 = vst [vmem:[#allocation168_spill] sm:$0xff] %v4637_v22 }
 0x600   :  { %3239 = vset.pattern.permute.xlu1 %v5406_v32 }
 0x601   :  { %1589 = vperm.xlu1 %3239, %v3877_v34  }
 0x602   :  { %v4641_v42 = vpop.permute.xlu0 %1886  ;;  %v4643_v7 = vpop.permute.xlu1 %784 }
 0x603   :  { %5534 = vst [vmem:[#allocation169_spill] sm:$0xff] %v4641_v42  ;;  %v925_v42 = vsel %vm915_vm7, %v4399_v46, 0.0 }
 0x605   :  { %3241 = vset.pattern.permute.xlu1 %v5431_v14 }
 0x606   :  { %v4646_v19 = vpop.permute.xlu0 %1912  ;;  %1944 = vperm.xlu1 %3241, %v4223_v51   ;;  %v947_v51 = vsel %vm937_vm9, %v4406_v29, 0.0  ;;  %v5539_v29 = vld [vmem:[#allocation22_spill] sm:$0xff] }
 0x607   :  { %v4649_v44 = vpop.permute.xlu1 %807  ;;  %vm892_vm15 = vcmp.eq.f32.partialorder %v5539_v29, %v4630_v2  ;;  %v5544_v29 = vld [vmem:[#allocation34_spill] sm:$0xff] }
 0x608   :  { %5535 = vst [vmem:[#allocation170_spill] sm:$0xff] %v4649_v44  ;;  %vm1003_vm0 = vcmp.eq.f32.partialorder %v5544_v29, %v4630_v2  ;;  %v5552_v29 = vld [vmem:[#allocation76_spill] sm:$0xff] }
 0x60a   :  { %v4651_v1 = vpop.permute.xlu0 %1930  ;;  %1952 = vperm.xlu1 %3241, %v3877_v34   ;;  %v903_v34 = vsel %vm893_vm8, %v4391_v11, 0.0 }
 0x60b   :  { %5536 = vst [vmem:[#allocation171_spill] sm:$0xff] %v4651_v1  ;;  %v927_v46 = vadd.f32 %v925_v42, %v903_v34 }
 0x60c   :  { %v896_v41 = vpop.permute.xlu1 %895 }
 0x60e   :  { %v4657_v22 = vpop.permute.xlu0 %1956  ;;  %2329 = vrot.lane.b32.xlu1 %v3520_v47, %s3337_s11  ;;  %v949_v47 = vadd.f32 %v947_v51, %v927_v46 }
 0x60f   :  { %5537 = vst [vmem:[#allocation172_spill] sm:$0xff] %v4657_v22  ;;  %3244 = vset.pattern.permute.xlu1 %v5380_v10  ;;  %v969_v22 = vsel %vm959_vm10, %v4413_v30, 0.0  ;;  %v5540_v30 = vld [vmem:[#allocation74_spill] sm:$0xff] }
 0x610   :  { %v918_v31 = vpop.permute.xlu1 %917  ;;  %v971_v61 = vadd.f32 %v969_v22, %v949_v47  ;;  %vm936_vm2 = vcmp.eq.f32.partialorder %v5540_v30, %v4630_v2  ;;  %v902_v22 = vsel %vm892_vm15, %v896_v41, 0.0  ;;  %v5545_v30 = vld [vmem:[#allocation36_spill] sm:$0xff] }
 0x611   :  { %v924_v11 = vsel %vm914_vm11, %v918_v31, 0.0  ;;  %v5542_v31 = vld [vmem:[#allocation61_spill] sm:$0xff]  ;;  %vm1025_vm7 = vcmp.eq.f32.partialorder %v5545_v30, %v4630_v2  ;;  %v5554_v30 = vmov 0.0  }
 0x612   :  { %1808 = vperm.xlu1 %3244, %v4393_v54   ;;  %vm1465_vm4 = vcmp.eq.f32.partialorder %v5542_v31, %v4630_v2  ;;  %v993_v46 = vadd.f32 %v991_v37, %v971_v61  ;;  %v926_v47 = vadd.f32 %v924_v11, %v902_v22  ;;  %v5546_v61 = vld [vmem:[#allocation38_spill] sm:$0xff]  ;;  %v5547_v11 = vld [vmem:[#allocation55_spill] sm:$0xff]  ;;  %v1013_v22 = vsel %vm1003_vm0, %v4397_v60, 0.0  ;;  %v5550_v31 = vld [vmem:[#allocation64_spill] sm:$0xff] }
 0x613   :  { %v1440_v12 = vpop.permute.xlu0 %1439  ;;  %v1475_v39 = vsel %vm1465_vm4, %v4566_v43, 0.0  ;;  %vm1079_vm9 = vcmp.eq.f32.partialorder %v5546_v61, %v4630_v2  ;;  %vm1553_vm10 = vcmp.eq.f32.partialorder %v5547_v11, %v4630_v2  ;;  %v5548_v37 = vld [vmem:[#allocation63_spill] sm:$0xff]  ;;  %vm1024_vm13 = vcmp.eq.f32.partialorder %v5550_v31, %v4630_v2 }
 0x614   :  { %v940_v1 = vpop.permute.xlu1 %939  ;;  %vm1443_vm12 = vcmp.eq.f32.partialorder %v1440_v12, %v4630_v2  ;;  %v5543_v12 = vld [vmem:[#allocation111_spill] sm:$0xff]  ;;  %vm1002_vm11 = vcmp.eq.f32.partialorder %v5548_v37, %v4630_v2 }
 0x615   :  { %v946_v34 = vsel %vm936_vm2, %v940_v1, 0.0  ;;  %vm958_vm6 = vcmp.eq.f32.partialorder %v5543_v12, %v4630_v2  ;;  %vm1047_vm2 = vcmp.eq.f32.partialorder %v5552_v29, %v4630_v2  ;;  %v1012_v59 = vsel %vm1002_vm11, %v4530_v13, 0.0 }
 0x616   :  { %3246 = vset.pattern.permute.xlu1 %v5418_v45  ;;  %v1453_v45 = vsel %vm1443_vm12, %v4560_v38, 0.0  ;;  %v948_v1 = vadd.f32 %v946_v34, %v926_v47  ;;  %v5551_v47 = vld [vmem:[#allocation66_spill] sm:$0xff]  ;;  %v1563_v13 = vsel %vm1553_vm10, %v4503_v63, 0.0 }
 0x617   :  { %v1484_v42 = vpop.permute.xlu0 %1483  ;;  %1489 = vperm.xlu1 %3246, %v4334_v3   ;;  %v1477_v38 = vadd.f32 %v1475_v39, %v1453_v45  ;;  %v5549_v45 = vld [vmem:[#allocation106_spill] sm:$0xff]  ;;  %vm1101_vm15 = vcmp.eq.f32.partialorder %v5551_v47, %v4630_v2 }
 0x618   :  { %v962_v51 = vpop.permute.xlu1 %961  ;;  %vm1487_vm8 = vcmp.eq.f32.partialorder %v1484_v42, %v4630_v2  ;;  %vm1509_vm12 = vcmp.eq.f32.partialorder %v5549_v45, %v4630_v2  ;;  %v1015_v42 = vadd.f32 %v1013_v22, %v993_v46  ;;  %v5553_v46 = vld [vmem:[#allocation68_spill] sm:$0xff]  ;;  %v1111_v11 = vsel %vm1101_vm15, %v4548_v56, 0.0 }
 0x619   :  { %v968_v41 = vsel %vm958_vm6, %v962_v51, 0.0  ;;  %v1519_v12 = vsel %vm1509_vm12, %v4589_v23, 0.0  ;;  %vm1123_vm4 = vcmp.eq.f32.partialorder %v5553_v46, %v4630_v2  ;;  %v1035_v23 = vsel %vm1025_vm7, %v4404_v8, 0.0  ;;  %v5555_v8 = vld [vmem:[#allocation117_spill] sm:$0xff]  ;;  %v5560_v46 = vld [vmem:[#allocation102_spill] sm:$0xff] }
 0x61a   :  { %v970_v34 = vadd.f32 %v968_v41, %v948_v1  ;;  %v1541_v1 = vsel %vm1531_vm14, %v4600_v53, 0.0  ;;  %v1037_v22 = vadd.f32 %v1035_v23, %v1015_v42  ;;  %vm1575_vm6 = vcmp.eq.f32.partialorder %v5555_v8, %v4630_v2 }
 0x61b   :  { %v1494_v44 = vpop.permute.xlu0 %1493  ;;  %3248 = vset.pattern.permute.xlu1 %v5380_v10  ;;  %v1034_v53 = vsel %vm1024_vm13, %v4535_v33, 0.0  ;;  %vm1046_vm14 = vcmp.eq.f32.partialorder %v5556_v27, %v4630_v2  ;;  %v1585_v31 = vsel %vm1575_vm6, %v4619_v40, 0.0  ;;  %v1133_v56 = vsel %vm1123_vm4, %v4556_v15, 0.0  ;;  %v5559_v40 = vld [vmem:[#allocation25_spill] sm:$0xff]  ;;  %v5561_v27 = vld [vmem:[#allocation80_spill] sm:$0xff] }
 0x61c   :  { %v1497_v43 = vsel %vm1487_vm8, %v1494_v44, 0.0  ;;  %1874 = vperm.xlu1 %3248, %v4339_v52   ;;  %v4718_v44 = vpop.f32.mrf.mxu0  ;;  %vm1167_vm8 = vcmp.eq.f32.partialorder %v5559_v40, %v4630_v2  ;;  %vm1189_vm10 = vcmp.eq.f32.partialorder %v5561_v27, %v4630_v2 }
 0x61d   :  { %v1499_v10 = vadd.f32 %v1497_v43, %v1477_v38  ;;  %v984_v51 = vpop.permute.xlu1 %983 }
 0x61e   :  { %v990_v60 = vsel %vm980_vm3, %v984_v51, 0.0  ;;  %vm3356_vm3 = vmmov 0   ;;  %v4754_v37 = vpop.f32.mrf.mxu0  ;;  %v1056_v51 = vsel %vm1046_vm14, %v4541_v26, 0.0 }
 0x61f   :  { %v1521_v39 = vadd.f32 %v1519_v12, %v1499_v10  ;;  %v992_v41 = vadd.f32 %v990_v60, %v970_v34  ;;  %v4724_v38 = vpop.permute.xlu0 %1501  ;;  %2953 = vmatprep.mubr.msk.bf16.mxu1 %vm3356_vm3, %v5554_v30  ;;  %2967 = vmatprep.mubr.msk.bf16.mxu0 %vm3356_vm3, %v5554_v30  ;;  %v1057_v10 = vsel %vm1047_vm2, %v4411_v50, 0.0  ;;  %v5558_v50 = vld [vmem:[#allocation60_spill] sm:$0xff] }
 0x620   :  { %3250 = vset.pattern.permute.xlu1 %v5431_v14  ;;  %v1059_v61 = vadd.f32 %v1057_v10, %v1037_v22  ;;  %vm1442_vm7 = vcmp.eq.f32.partialorder %v5558_v50, %v4630_v2  ;;  %v4783_v26 = vpop.f32.mrf.mxu0  ;;  %vm1508_vm4 = vcmp.eq.f32.partialorder %v4724_v38, %v4630_v2  ;;  %v5569_v38 = vld [vmem:[#allocation44_spill] sm:$0xff] }
 0x621   :  { %v1543_v43 = vadd.f32 %v1541_v1, %v1521_v39  ;;  %v1014_v45 = vadd.f32 %v1012_v59, %v992_v41  ;;  %1896 = vperm.xlu1 %3250, %v4393_v54   ;;  %v5557_v39 = vld [vmem:[#allocation90_spill] sm:$0xff] }
 0x622   :  { %v1083_v54 = vpop.permute.xlu1 %1082  ;;  %vm1145_vm0 = vcmp.eq.f32.partialorder %v5557_v39, %v4630_v2  ;;  %v5566_v39 = vld [vmem:[#allocation47_spill] sm:$0xff] }
 0x623   :  { %v1565_v63 = vadd.f32 %v1563_v13, %v1543_v43  ;;  %v1036_v42 = vadd.f32 %v1034_v53, %v1014_v45  ;;  %v1089_v33 = vsel %vm1079_vm9, %v1083_v54, 0.0  ;;  %v1446_v34 = vpop.permute.xlu0 %1445  ;;  %v1155_v15 = vsel %vm1145_vm0, %v4563_v49, 0.0  ;;  %v4795_v49 = vpop.f32.mrf.mxu0 }
 0x624   :  { %v1113_v12 = vadd.f32 %v1111_v11, %v1089_v33  ;;  %vm1464_vm9 = vcmp.eq.f32.partialorder %v5560_v46, %v4630_v2  ;;  %v1452_v22 = vsel %vm1442_vm7, %v1446_v34, 0.0  ;;  %v5562_v33 = vld [vmem:[#allocation82_spill] sm:$0xff]  ;;  %vm1300_vm2 = vcmp.eq.f32.partialorder %v5566_v39, %v4630_v2  ;;  %v5567_v46 = vld [vmem:[#allocation84_spill] sm:$0xff] }
 0x625   :  { %v1587_v47 = vadd.f32 %v1585_v31, %v1565_v63  ;;  %v1058_v60 = vadd.f32 %v1056_v51, %v1036_v42  ;;  %3251 = vset.pattern.permute.xlu1 %v5406_v32  ;;  %v4802_v42 = vpop.f32.mrf.mxu0  ;;  %vm1211_vm11 = vcmp.eq.f32.partialorder %v5562_v33, %v4630_v2  ;;  %v1310_v40 = vsel %vm1300_vm2, %v4460_v0, 0.0 }
 0x626   :  { %v1135_v29 = vadd.f32 %v1133_v56, %v1113_v12  ;;  %1555 = vperm.xlu1 %3251, %v4328_v35   ;;  %v5563_v12 = vld [vmem:[#allocation46_spill] sm:$0xff]  ;;  %v5564_v56 = vld [vmem:[#allocation112_spill] sm:$0xff]  ;;  %vm1322_vm6 = vcmp.eq.f32.partialorder %v5567_v46, %v4630_v2  ;;  %vm1255_vm0 = vcmp.eq.f32.partialorder %v5569_v38, %v4630_v2 }
 0x627   :  { %v1468_v41 = vpop.permute.xlu0 %1467  ;;  %v1171_v23 = vpop.permute.xlu1 %1170  ;;  %v3255_v59 = vpack.i.bf16 %v1059_v61, %v1058_v60  ;;  %v4789_v1 = vadd.f32 %v4635_v48, %v1587_v47  ;;  %vm1278_vm12 = vcmp.eq.f32.partialorder %v5563_v12, %v4630_v2  ;;  %vm1233_vm13 = vcmp.eq.f32.partialorder %v5564_v56, %v4630_v2  ;;  %v5565_v61 = vld [vmem:[#allocation16_spill] sm:$0xff]  ;;  %v5575_v56 = vld [vmem:[#allocation33_spill] sm:$0xff] }
 0x628   :  { %v1474_v43 = vsel %vm1464_vm9, %v1468_v41, 0.0  ;;  %v1157_v45 = vadd.f32 %v1155_v15, %v1135_v29  ;;  %v1177_v8 = vsel %vm1167_vm8, %v1171_v23, 0.0  ;;  %v4809_v31 = vpop.f32.mrf.mxu0  ;;  %vm1256_vm15 = vcmp.eq.f32.partialorder %v5565_v61, %v4630_v2 }
 0x629   :  { %v4791_v13 = vadd.f32 %v1474_v43, %v1452_v22  ;;  %3256 = vrot.lane.b32.xlu0 %v3255_v59, %s3357_s1  ;;  %v1266_v50 = vsel %vm1256_vm15, %v4445_v24, 0.0  ;;  %v1332_v23 = vsel %vm1322_vm6, %v4466_v55, 0.0  ;;  %v5568_v59 = vld [vmem:[#allocation72_spill] sm:$0xff] }
 0x62a   :  { %v1179_v53 = vadd.f32 %v1177_v8, %v1157_v45  ;;  %3252 = vset.pattern.permute.xlu1 %v5431_v14  ;;  %v4830_v15 = vpop.f32.mrf.mxu0  ;;  %vm1277_vm14 = vcmp.eq.f32.partialorder %v5568_v59, %v4630_v2  ;;  %v5570_v45 = vld [vmem:[#allocation73_spill] sm:$0xff] }
 0x62b   :  { %1918 = vperm.xlu1 %3252, %v4328_v35   ;;  %v1193_v48 = vpop.permute.xlu1 %1192  ;;  %v1287_v22 = vsel %vm1277_vm14, %v4569_v16, 0.0  ;;  %vm1299_vm7 = vcmp.eq.f32.partialorder %v5570_v45, %v4630_v2  ;;  %v5573_v16 = vld [vmem:[#allocation6_spill] sm:$0xff] }
 0x62c   :  { %v1199_v54 = vsel %vm1189_vm10, %v1193_v48, 0.0  ;;  %v4800_v11 = vpop.permute.xlu0 %1830  ;;  %v266_v55 = vpop.f32.mrf.mxu0  ;;  %v1309_v27 = vsel %vm1299_vm7, %v4574_v5, 0.0  ;;  %v5574_v5 = vld [vmem:[#allocation31_spill] sm:$0xff] }
 0x62d   :  { %v1201_v63 = vadd.f32 %v1199_v54, %v1179_v53  ;;  %v5572_v54 = vld [vmem:[#allocation92_spill] sm:$0xff]  ;;  %vm1343_vm10 = vcmp.eq.f32.partialorder %v5574_v5, %v4630_v2 }
 0x62e   :  { %vm1321_vm9 = vcmp.eq.f32.partialorder %v5572_v54, %v4630_v2  ;;  %v4895_v54 = vpack.c.bf16 %v4830_v15, %v266_v55  ;;  %v5584_v15 = vld [vmem:[#allocation89_spill] sm:$0xff] }
 0x62f   :  { %1940 = vperm.xlu1 %3252, %v4334_v3   ;;  %v1215_v34 = vpop.permute.xlu1 %1214  ;;  %v1288_v3 = vsel %vm1278_vm12, %v4453_v9, 0.0  ;;  %v1331_v33 = vsel %vm1321_vm9, %v4579_v28, 0.0  ;;  %v5577_v28 = vld [vmem:[#allocation86_spill] sm:$0xff]  ;;  %v5585_v55 = vld [vmem:[#allocation17_spill] sm:$0xff] }
 0x630   :  { %v1221_v10 = vsel %vm1211_vm11, %v1215_v34, 0.0  ;;  %v4807_v51 = vpop.permute.xlu0 %1852  ;;  %v1290_v41 = vadd.f32 %v1288_v3, %v1266_v50  ;;  %v2923_v34 = vpop.f32.mrf.mxu0  ;;  %vm1366_vm11 = vcmp.eq.f32.partialorder %v5575_v56, %v4630_v2  ;;  %vm1365_vm12 = vcmp.eq.f32.partialorder %v5577_v28, %v4630_v2  ;;  %v5578_v50 = vld [vmem:[#allocation35_spill] sm:$0xff]  ;;  %v5598_v28 = vld [vmem:[#allocation97_spill] sm:$0xff] }
 0x631   :  { %v1223_v35 = vadd.f32 %v1221_v10, %v1201_v63  ;;  %vm1982_vm7 = vcmp.eq.f32.partialorder %v5585_v55, %v4630_v2 }
 0x632   :  { %v1312_v0 = vadd.f32 %v1310_v40, %v1290_v41  ;;  %v276_v61 = vpop.f32.mrf.mxu0  ;;  %v5579_v40 = vld [vmem:[#allocation87_spill] sm:$0xff] }
 0x633   :  { %3253 = vset.pattern.permute.xlu1 %v5406_v32  ;;  %v1237_v47 = vpop.permute.xlu1 %1236  ;;  %vm1387_vm15 = vcmp.eq.f32.partialorder %v5579_v40, %v4630_v2  ;;  %v4868_v41 = vpack.c.bf16 %v2923_v34, %v276_v61  ;;  %v5600_v40 = vld [vmem:[#allocation81_spill] sm:$0xff] }
 0x634   :  { %v1243_v60 = vsel %vm1233_vm13, %v1237_v47, 0.0  ;;  %1599 = vperm.xlu1 %3253, %v4339_v52   ;;  %v1334_v53 = vadd.f32 %v1332_v23, %v1312_v0  ;;  %v5576_v47 = vld [vmem:[#allocation5_spill] sm:$0xff]  ;;  %vm1388_vm13 = vcmp.eq.f32.partialorder %v5578_v50, %v4630_v2  ;;  %v4875_v0 = vpack.c.bf16 %v4802_v42, %v4809_v31  ;;  %v5582_v31 = vld [vmem:[#allocation51_spill] sm:$0xff]  ;;  %v5599_v50 = vld [vmem:[#allocation54_spill] sm:$0xff] }
 0x635   :  { %v4824_v29 = vadd.f32 %v1243_v60, %v1223_v35  ;;  %v1512_v32 = vpop.permute.xlu0 %1511  ;;  %v1376_v60 = vsel %vm1366_vm11, %v4455_v18, 0.0  ;;  %v1398_v18 = vsel %vm1388_vm13, %v4462_v36, 0.0  ;;  %vm1641_vm6 = vcmp.eq.f32.partialorder %v5582_v31, %v4630_v2 }
 0x636   :  { %v4828_v9 = vsel %vm1508_vm4, %v1512_v32, 0.0 }
 0x638   :  { %3254 = vset.pattern.permute.xlu1 %v5431_v14  ;;  %v1259_v24 = vpop.permute.xlu1 %1258  ;;  %v5571_v14 = vld [vmem:[#allocation15_spill] sm:$0xff] }
 0x639   :  { %v1265_v43 = vsel %vm1255_vm0, %v1259_v24, 0.0  ;;  %1962 = vperm.xlu1 %3254, %v4339_v52   ;;  %vm1344_vm8 = vcmp.eq.f32.partialorder %v5571_v14, %v4630_v2  ;;  %v5580_v24 = vld [vmem:[#allocation75_spill] sm:$0xff]  ;;  %vm1640_vm0 = vcmp.eq.f32.partialorder %v5584_v15, %v4630_v2 }
 0x63a   :  { %v1289_v8 = vadd.f32 %v1287_v22, %v1265_v43  ;;  %v1354_v52 = vsel %vm1344_vm8, %v4447_v21, 0.0  ;;  %vm1410_vm2 = vcmp.eq.f32.partialorder %v5580_v24, %v4630_v2  ;;  %v5581_v43 = vld [vmem:[#allocation113_spill] sm:$0xff] }
 0x63b   :  { %v1356_v10 = vadd.f32 %v1354_v52, %v1334_v53  ;;  %vm1409_vm4 = vcmp.eq.f32.partialorder %v5581_v43, %v4630_v2  ;;  %v1420_v36 = vsel %vm1410_vm2, %v4468_v57, 0.0  ;;  %v5603_v24 = vld [vmem:[#allocation141_spill] sm:$0xff]  ;;  %v5604_v43 = vld [vmem:[#allocation91_spill] sm:$0xff] }
 0x63c   :  { %v1311_v48 = vadd.f32 %v1309_v27, %v1289_v8 }
 0x63d   :  { %2269 = vrot.lane.b32.xlu1 %v5573_v16, %s3336_s5  ;;  %v1347_v63 = vpop.permute.xlu1 %1346  ;;  %v1378_v21 = vadd.f32 %v1376_v60, %v1356_v10  ;;  %v5590_v10 = vld [vmem:[#allocation157_spill] sm:$0xff]  ;;  %v5592_v60 = vld [vmem:[#allocation39_spill] sm:$0xff] }
 0x63e   :  { %v1333_v35 = vadd.f32 %v1331_v33, %v1311_v48  ;;  %v1353_v12 = vsel %vm1343_vm10, %v1347_v63, 0.0  ;;  %v4884_v48 = vpack.c.bf16 %v4718_v44, %v4754_v37  ;;  %v1651_v44 = vsel %vm1641_vm6, %v4480_v58, 0.0  ;;  %v5583_v37 = vld [vmem:[#allocation18_spill] sm:$0xff]  ;;  %v5586_v33 = vld [vmem:[#allocation41_spill] sm:$0xff] }
 0x63f   :  { %v1400_v59 = vadd.f32 %v1398_v18, %v1378_v21  ;;  %vm1619_vm14 = vcmp.eq.f32.partialorder %v5583_v37, %v4630_v2  ;;  %v1650_v58 = vsel %vm1640_vm0, %v4591_v4, 0.0  ;;  %vm1663_vm8 = vcmp.eq.f32.partialorder %v5586_v33, %v4630_v2  ;;  %v5594_v21 = vld [vmem:[#allocation43_spill] sm:$0xff] }
 0x640   :  { %v1355_v39 = vadd.f32 %v1353_v12, %v1333_v35  ;;  %v1673_v34 = vsel %vm1663_vm8, %v4475_v17, 0.0  ;;  %vm2004_vm13 = vcmp.eq.f32.partialorder %v5592_v60, %v4630_v2  ;;  %v5593_v17 = vld [vmem:[#allocation37_spill] sm:$0xff]  ;;  %vm1706_vm2 = vcmp.eq.f32.partialorder %v5594_v21, %v4630_v2  ;;  %v5610_v33 = vld [vmem:[#allocation95_spill] sm:$0xff]  ;;  %v5616_v21 = vld [vmem:[#allocation98_spill] sm:$0xff] }
 0x641   :  { %2267 = vrot.lane.b32.xlu1 %v5576_v47, %s3336_s5  ;;  %v1369_v3 = vpop.permute.xlu1 %1368  ;;  %v1422_v53 = vadd.f32 %v1420_v36, %v1400_v59  ;;  %vm1685_vm0 = vcmp.eq.f32.partialorder %v5598_v28, %v4630_v2  ;;  %vm2026_vm8 = vcmp.eq.f32.partialorder %v5599_v50, %v4630_v2 }
 0x642   :  { %v1375_v32 = vsel %vm1365_vm12, %v1369_v3, 0.0  ;;  %v5591_v3 = vld [vmem:[#allocation94_spill] sm:$0xff] }
 0x643   :  { %v1377_v38 = vadd.f32 %v1375_v32, %v1355_v39  ;;  %vm1684_vm12 = vcmp.eq.f32.partialorder %v5591_v3, %v4630_v2  ;;  %v5595_v39 = vld [vmem:[#allocation21_spill] sm:$0xff]  ;;  %v5615_v3 = vld [vmem:[#allocation164_spill] sm:$0xff] }
 0x645   :  { %2325 = vrot.lane.b32.xlu1 %v5576_v47, %s3337_s11  ;;  %v1391_v46 = vpop.permute.xlu1 %1390  ;;  %v4925_v47 = vpack.c.bf16 %v4783_v26, %v4795_v49  ;;  %v5596_v26 = vld [vmem:[#allocation48_spill] sm:$0xff]  ;;  %v5597_v49 = vld [vmem:[#allocation49_spill] sm:$0xff] }
 0x646   :  { %v1397_v23 = vsel %vm1387_vm15, %v1391_v46, 0.0  ;;  %vm1981_vm15 = vcmp.eq.f32.partialorder %v5593_v17, %v4630_v2  ;;  %vm1729_vm6 = vcmp.eq.f32.partialorder %v5596_v26, %v4630_v2  ;;  %v5601_v46 = vld [vmem:[#allocation138_spill] sm:$0xff] }
 0x647   :  { %v1399_v22 = vadd.f32 %v1397_v23, %v1377_v38  ;;  %v1695_v18 = vsel %vm1685_vm0, %v5601_v46, 0.0  ;;  %v5602_v23 = vld [vmem:[#allocation144_spill] sm:$0xff]  ;;  %v5619_v46 = vld [vmem:[#allocation146_spill] sm:$0xff] }
 0x649   :  { %v1413_v45 = vpop.permute.xlu1 %1412  ;;  %2460 = vrot.lane.b32.xlu1 %v4868_v41, %s3333_s9 }
 0x64a   :  { %v1419_v8 = vsel %vm1409_vm4, %v1413_v45, 0.0  ;;  %vm2070_vm4 = vcmp.eq.f32.partialorder %v5595_v39, %v4630_v2  ;;  %v5624_v39 = vld [vmem:[#allocation45_spill] sm:$0xff] }
 0x64b   :  { %v1421_v27 = vadd.f32 %v1419_v8, %v1399_v22  ;;  %v2014_v22 = vsel %vm2004_vm13, %v5603_v24, 0.0  ;;  %v5605_v8 = vld [vmem:[#allocation139_spill] sm:$0xff]  ;;  %vm2048_vm13 = vcmp.eq.f32.partialorder %v5616_v21, %v4630_v2  ;;  %v5622_v24 = vld [vmem:[#allocation160_spill] sm:$0xff]  ;;  %v5633_v21 = vld [vmem:[#allocation53_spill] sm:$0xff] }
 0x64d   :  { %v3260_v14 = vpack.i.bf16 %v1422_v53, %v1421_v27  ;;  %2456 = vrot.lane.b32.xlu1 %v4875_v0, %s3333_s9  ;;  %v1992_v53 = vsel %vm1982_vm7, %v5605_v8, 0.0  ;;  %v5606_v27 = vld [vmem:[#allocation148_spill] sm:$0xff]  ;;  %vm2025_vm7 = vcmp.eq.f32.partialorder %v5610_v33, %v4630_v2 }
 0x64e   :  { %v1985_v42 = vpop.permute.xlu1 %1984  ;;  %v2016_v15 = vadd.f32 %v2014_v22, %v1992_v53  ;;  %v2035_v22 = vsel %vm2025_vm7, %v5622_v24, 0.0 }
 0x64f   :  { %3261 = vrot.lane.b32.xlu0 %v3260_v14, %s3357_s1  ;;  %v1739_v14 = vsel %vm1729_vm6, %v5606_v27, 0.0 }
 0x651   :  { %2452 = vrot.lane.b32.xlu1 %v4884_v48, %s3333_s9 }
 0x653   :  { %1966 = vperm.xlu0 %3265, %v4227_v6   ;;  %v1666_v57 = vpop.permute.xlu1 %1665  ;;  %v1629_v6 = vsel %vm1619_vm14, %v4473_v25, 0.0  ;;  %v5589_v25 = vld [vmem:[#allocation19_spill] sm:$0xff]  ;;  %vm1751_vm14 = vcmp.eq.f32.partialorder %v5597_v49, %v4630_v2 }
 0x654   :  { %v1653_v52 = vadd.f32 %v1651_v44, %v1629_v6  ;;  %vm1707_vm11 = vcmp.eq.f32.partialorder %v5589_v25, %v4630_v2  ;;  %v5608_v44 = vld [vmem:[#allocation143_spill] sm:$0xff]  ;;  %v1991_v6 = vsel %vm1981_vm15, %v1985_v42, 0.0  ;;  %v5613_v42 = vld [vmem:[#allocation100_spill] sm:$0xff] }
 0x655   :  { %2580 = vrot.lane.b32.xlu1 %v4868_v41, %s3337_s11  ;;  %v1717_v59 = vsel %vm1707_vm11, %v5602_v23, 0.0  ;;  %v2036_v37 = vsel %vm2026_vm8, %v5608_v44, 0.0  ;;  %v5617_v49 = vld [vmem:[#allocation115_spill] sm:$0xff] }
 0x656   :  { %v1675_v12 = vadd.f32 %v1673_v34, %v1653_v52  ;;  %v5612_v34 = vld [vmem:[#allocation159_spill] sm:$0xff]  ;;  %vm1772_vm15 = vcmp.eq.f32.partialorder %v5617_v49, %v4630_v2 }
 0x657   :  { %2327 = vrot.lane.b32.xlu0 %v5573_v16, %s3337_s11  ;;  %v1688_v63 = vpop.permute.xlu1 %1687  ;;  %v5587_v16 = vld [vmem:[#allocation50_spill] sm:$0xff] }
 0x658   :  { %3276 = vset.pattern.permute.xlu0 %v5401_v62  ;;  %vm1618_vm9 = vcmp.eq.f32.partialorder %v5587_v16, %v4630_v2  ;;  %v5588_v62 = vld [vmem:[#allocation93_spill] sm:$0xff]  ;;  %v1694_v61 = vsel %vm1684_vm12, %v1688_v63, 0.0  ;;  %v1697_v38 = vadd.f32 %v1695_v18, %v1675_v12  ;;  %v5611_v16 = vld [vmem:[#allocation162_spill] sm:$0xff]  ;;  %vm1750_vm12 = vcmp.eq.f32.partialorder %v5613_v42, %v4630_v2 }
 0x659   :  { %2578 = vrot.lane.b32.xlu1 %v4895_v54, %s3337_s11  ;;  %vm1662_vm10 = vcmp.eq.f32.partialorder %v5588_v62, %v4630_v2  ;;  %v1628_v35 = vsel %vm1618_vm9, %v5590_v10, 0.0  ;;  %vm1773_vm9 = vcmp.eq.f32.partialorder %v5600_v40, %v4630_v2  ;;  %v5614_v12 = vld [vmem:[#allocation153_spill] sm:$0xff]  ;;  %v1760_v60 = vsel %vm1750_vm12, %v5615_v3, 0.0 }
 0x65a   :  { %v1672_v4 = vsel %vm1662_vm10, %v1666_v57, 0.0  ;;  %v1652_v56 = vadd.f32 %v1650_v58, %v1628_v35  ;;  %vm2003_vm10 = vcmp.eq.f32.partialorder %v5604_v43, %v4630_v2  ;;  %v5607_v57 = vld [vmem:[#allocation99_spill] sm:$0xff]  ;;  %v1719_v63 = vadd.f32 %v1717_v59, %v1697_v38  ;;  %v5620_v18 = vld [vmem:[#allocation165_spill] sm:$0xff]  ;;  %v5621_v59 = vld [vmem:[#allocation114_spill] sm:$0xff] }
 0x65b   :  { %vm1728_vm11 = vcmp.eq.f32.partialorder %v5607_v57, %v4630_v2  ;;  %v5609_v58 = vld [vmem:[#allocation151_spill] sm:$0xff]  ;;  %v2013_v10 = vsel %vm2003_vm10, %v5612_v34, 0.0  ;;  %v2080_v40 = vsel %vm2070_vm4, %v5619_v46, 0.0  ;;  %v1782_v23 = vsel %vm1772_vm15, %v5620_v18, 0.0  ;;  %v5630_v42 = vld [vmem:[#allocation101_spill] sm:$0xff] }
 0x65c   :  { %v2051_v5 = vpop.permute.xlu1 %2050  ;;  %v1674_v32 = vadd.f32 %v1672_v4, %v1652_v56  ;;  %v1761_v55 = vsel %vm1751_vm14, %v5609_v58, 0.0  ;;  %v1738_v62 = vsel %vm1728_vm11, %v5611_v16, 0.0  ;;  %v1741_v25 = vadd.f32 %v1739_v14, %v1719_v63  ;;  %v5625_v14 = vld [vmem:[#allocation150_spill] sm:$0xff]  ;;  %v5629_v16 = vld [vmem:[#allocation79_spill] sm:$0xff] }
 0x65d   :  { %2576 = vrot.lane.b32.xlu1 %v4875_v0, %s3337_s11  ;;  %v2038_v4 = vadd.f32 %v2036_v37, %v2016_v15  ;;  %v1783_v56 = vsel %vm1773_vm9, %v5614_v12, 0.0  ;;  %v2015_v17 = vadd.f32 %v2013_v10, %v1991_v6  ;;  %vm2069_vm4 = vcmp.eq.f32.partialorder %v5624_v39, %v4630_v2  ;;  %v5626_v37 = vld [vmem:[#allocation57_spill] sm:$0xff] }
 0x65e   :  { %v1696_v45 = vadd.f32 %v1694_v61, %v1674_v32  ;;  %v1763_v26 = vadd.f32 %v1761_v55, %v1741_v25  ;;  %v5618_v32 = vld [vmem:[#allocation140_spill] sm:$0xff]  ;;  %vm2114_vm14 = vcmp.eq.f32.partialorder %v5626_v37, %v4630_v2  ;;  %vm2113_vm8 = vcmp.eq.f32.partialorder %v5629_v16, %v4630_v2  ;;  %v5649_v16 = vld [vmem:[#allocation123_spill] sm:$0xff] }
 0x65f   :  { %v2058_v50 = vsel %vm2048_vm13, %v5618_v32, 0.0  ;;  %v2037_v53 = vadd.f32 %v2035_v22, %v2015_v17  ;;  %vm2136_vm9 = vcmp.eq.f32.partialorder %v5630_v42, %v4630_v2  ;;  %vm1828_vm11 = vcmp.eq.f32.partialorder %v5633_v21, %v4630_v2  ;;  %v5635_v32 = vld [vmem:[#allocation23_spill] sm:$0xff]  ;;  %v5640_v22 = vld [vmem:[#allocation158_spill] sm:$0xff]  ;;  %v5656_v21 = vld [vmem:[#allocation168_spill] sm:$0xff] }
 0x660   :  { %v1785_v38 = vadd.f32 %v1783_v56, %v1763_v26  ;;  %v2060_v8 = vadd.f32 %v2058_v50, %v2038_v4  ;;  %v5631_v4 = vld [vmem:[#allocation96_spill] sm:$0xff]  ;;  %v5632_v56 = vld [vmem:[#allocation142_spill] sm:$0xff]  ;;  %v5634_v26 = vld [vmem:[#allocation155_spill] sm:$0xff]  ;;  %vm1806_vm7 = vcmp.eq.f32.partialorder %v5635_v32, %v4630_v2 }
 0x661   :  { %v1710_v36 = vpop.permute.xlu1 %1709  ;;  %2574 = vrot.lane.b32.xlu1 %v4925_v47, %s3337_s11  ;;  %vm2135_vm10 = vcmp.eq.f32.partialorder %v5631_v4, %v4630_v2  ;;  %v2146_v3 = vsel %vm2136_vm9, %v5632_v56, 0.0  ;;  %v1838_v49 = vsel %vm1828_vm11, %v5634_v26, 0.0  ;;  %v5636_v50 = vld [vmem:[#allocation62_spill] sm:$0xff]  ;;  %v5652_v4 = vld [vmem:[#allocation69_spill] sm:$0xff] }
 0x662   :  { %v1716_v31 = vsel %vm1706_vm2, %v1710_v36, 0.0  ;;  %vm2047_vm2 = vcmp.eq.f32.partialorder %v5621_v59, %v4630_v2  ;;  %v5623_v36 = vld [vmem:[#allocation56_spill] sm:$0xff]  ;;  %v2082_v63 = vadd.f32 %v2080_v40, %v2060_v8  ;;  %vm1850_vm12 = vcmp.eq.f32.partialorder %v5636_v50, %v4630_v2  ;;  %v5637_v40 = vld [vmem:[#allocation154_spill] sm:$0xff]  ;;  %v5642_v8 = vld [vmem:[#allocation161_spill] sm:$0xff] }
 0x663   :  { %v1718_v52 = vadd.f32 %v1716_v31, %v1696_v45  ;;  %v2057_v43 = vsel %vm2047_vm2, %v2051_v5, 0.0  ;;  %vm2092_vm6 = vcmp.eq.f32.partialorder %v5623_v36, %v4630_v2  ;;  %v5627_v5 = vld [vmem:[#allocation77_spill] sm:$0xff]  ;;  %v1816_v18 = vsel %vm1806_vm7, %v5637_v40, 0.0 }
 0x664   :  { %v2102_v57 = vsel %vm2092_vm6, %v5625_v14, 0.0  ;;  %v2059_v6 = vadd.f32 %v2057_v43, %v2037_v53  ;;  %vm2091_vm0 = vcmp.eq.f32.partialorder %v5627_v5, %v4630_v2  ;;  %v1840_v24 = vadd.f32 %v1838_v49, %v1816_v18  ;;  %v5643_v14 = vld [vmem:[#allocation163_spill] sm:$0xff]  ;;  %v5645_v5 = vld [vmem:[#allocation125_spill] sm:$0xff]  ;;  %v5659_v18 = vld [vmem:[#allocation12_spill] sm:$0xff] }
 0x665   :  { %v1740_v35 = vadd.f32 %v1738_v62, %v1718_v52  ;;  %2572 = vrot.lane.b32.xlu1 %v4884_v48, %s3337_s11  ;;  %v5628_v52 = vld [vmem:[#allocation152_spill] sm:$0xff]  ;;  %v2104_v55 = vadd.f32 %v2102_v57, %v2082_v63  ;;  %vm1916_vm2 = vcmp.eq.f32.partialorder %v4646_v19, %v4630_v2  ;;  %v5644_v19 = vld [vmem:[#allocation119_spill] sm:$0xff]  ;;  %v5654_v56 = vld [vmem:[#allocation129_spill] sm:$0xff] }
 0x666   :  { %v2073_v61 = vpop.permute.xlu1 %2072  ;;  %v2124_v15 = vsel %vm2114_vm14, %v5628_v52, 0.0  ;;  %v1926_v57 = vsel %vm1916_vm2, %v5643_v14, 0.0 }
 0x667   :  { %v1762_v28 = vadd.f32 %v1760_v60, %v1740_v35  ;;  %v2079_v31 = vsel %vm2069_vm4, %v2073_v61, 0.0  ;;  %v2126_v34 = vadd.f32 %v2124_v15, %v2104_v55  ;;  %vm729_vm4 = vcmp.eq.f32.partialorder %v5644_v19, %v4630_v2  ;;  %v5646_v15 = vld [vmem:[#allocation11_spill] sm:$0xff]  ;;  %v5666_v19 = vld [vmem:[#allocation58_spill] sm:$0xff] }
 0x668   :  { %v2081_v33 = vadd.f32 %v2079_v31, %v2059_v6  ;;  %v741_v52 = vsel %vm729_vm4, %v5645_v5, 0.0  ;;  %vm703_vm14 = vcmp.eq.f32.partialorder %v5646_v15, %v4630_v2 }
 0x669   :  { %v1784_v45 = vadd.f32 %v1782_v23, %v1762_v28  ;;  %v2148_v17 = vadd.f32 %v2146_v3, %v2126_v34  ;;  %v5638_v23 = vld [vmem:[#allocation156_spill] sm:$0xff] }
 0x66a   :  { %v2095_v27 = vpop.permute.xlu1 %2094  ;;  %v1860_v59 = vsel %vm1850_vm12, %v5638_v23, 0.0  ;;  %v5660_v23 = vld [vmem:[#allocation170_spill] sm:$0xff] }
 0x66b   :  { %v3266_v44 = vpack.i.bf16 %v1785_v38, %v1784_v45  ;;  %v2101_v58 = vsel %vm2091_vm0, %v2095_v27, 0.0  ;;  %v5639_v38 = vld [vmem:[#allocation83_spill] sm:$0xff]  ;;  %v5641_v45 = vld [vmem:[#allocation24_spill] sm:$0xff]  ;;  %v1862_v36 = vadd.f32 %v1860_v59, %v1840_v24 }
 0x66c   :  { %v2103_v10 = vadd.f32 %v2101_v58, %v2081_v33  ;;  %vm1872_vm13 = vcmp.eq.f32.partialorder %v5639_v38, %v4630_v2  ;;  %vm1894_vm15 = vcmp.eq.f32.partialorder %v5641_v45, %v4630_v2  ;;  %v5647_v58 = vld [vmem:[#allocation120_spill] sm:$0xff]  ;;  %v5648_v33 = vld [vmem:[#allocation67_spill] sm:$0xff] }
 0x66d   :  { %3267 = vrot.lane.b32.xlu0 %v3266_v44, %s3357_s1  ;;  %v1882_v43 = vsel %vm1872_vm13, %v5640_v22, 0.0  ;;  %v1904_v53 = vsel %vm1894_vm15, %v5642_v8, 0.0  ;;  %vm755_vm0 = vcmp.eq.f32.partialorder %v5647_v58, %v4630_v2  ;;  %vm805_vm13 = vcmp.eq.f32.partialorder %v5659_v18, %v4630_v2  ;;  %v5661_v38 = vld [vmem:[#allocation103_spill] sm:$0xff]  ;;  %v5662_v24 = vld [vmem:[#allocation52_spill] sm:$0xff]  ;;  %v5679_v18 = vld [vmem:[#allocation149_spill] sm:$0xff] }
 0x66e   :  { %v2117_v62 = vpop.permute.xlu1 %2116  ;;  %v1884_v27 = vadd.f32 %v1882_v43, %v1862_v36  ;;  %vm1827_vm15 = vcmp.eq.f32.partialorder %v5661_v38, %v4630_v2  ;;  %vm1805_vm2 = vcmp.eq.f32.partialorder %v5662_v24, %v4630_v2  ;;  %v5680_v24 = vld [vmem:[#allocation169_spill] sm:$0xff] }
 0x66f   :  { %v2123_v25 = vsel %vm2113_vm8, %v2117_v62, 0.0  ;;  %vm728_vm8 = vcmp.eq.f32.partialorder %v5648_v33, %v4630_v2  ;;  %v715_v62 = vsel %vm703_vm14, %v5649_v16, 0.0  ;;  %v1837_v36 = vsel %vm1827_vm15, %v4800_v11, 0.0  ;;  %v5667_v11 = vld [vmem:[#allocation124_spill] sm:$0xff]  ;;  %v5669_v33 = vld [vmem:[#allocation145_spill] sm:$0xff] }
 0x670   :  { %v2125_v35 = vadd.f32 %v2123_v25, %v2103_v10  ;;  %v1906_v31 = vadd.f32 %v1904_v53, %v1884_v27  ;;  %v5650_v25 = vld [vmem:[#allocation127_spill] sm:$0xff]  ;;  %v5651_v10 = vld [vmem:[#allocation121_spill] sm:$0xff]  ;;  %v743_v42 = vadd.f32 %v741_v52, %v715_v62  ;;  %vm826_vm14 = vcmp.eq.f32.partialorder %v5666_v19, %v4630_v2  ;;  %v5668_v52 = vld [vmem:[#allocation104_spill] sm:$0xff] }
 0x671   :  { %v767_v34 = vsel %vm755_vm0, %v5650_v25, 0.0  ;;  %vm781_vm9 = vcmp.eq.f32.partialorder %v5651_v10, %v4630_v2  ;;  %v5664_v27 = vld [vmem:[#allocation105_spill] sm:$0xff]  ;;  %vm1486_vm0 = vcmp.eq.f32.partialorder %v5668_v52, %v4630_v2  ;;  %v5671_v10 = vld [vmem:[#allocation59_spill] sm:$0xff]  ;;  %vm2160_vm15 = vcmask 654336   ;;  %v5685_v52 = vld [vmem:[#allocation40_spill] sm:$0xff] }
 0x672   :  { %v2139_v12 = vpop.permute.xlu1 %2138  ;;  %v1928_v44 = vadd.f32 %v1926_v57, %v1906_v31  ;;  %v793_v3 = vsel %vm781_vm9, %v5654_v56, 0.0  ;;  %vm848_vm9 = vcmp.eq.f32.partialorder %v5671_v10, %v4630_v2  ;;  %v5684_v19 = vld [vmem:[#allocation107_spill] sm:$0xff]  ;;  %v5689_v10 = vld [vmem:[#allocation14_spill] sm:$0xff] }
 0x673   :  { %v2145_v60 = vsel %vm2135_vm10, %v2139_v12, 0.0  ;;  %vm754_vm10 = vcmp.eq.f32.partialorder %v5652_v4, %v4630_v2  ;;  %v5653_v12 = vld [vmem:[#allocation118_spill] sm:$0xff]  ;;  %v5673_v4 = vld [vmem:[#allocation65_spill] sm:$0xff] }
 0x674   :  { %v2147_v61 = vadd.f32 %v2145_v60, %v2125_v35  ;;  %v740_v35 = vsel %vm728_vm8, %v4628_v20, 0.0  ;;  %vm702_vm11 = vcmp.eq.f32.partialorder %v5653_v12, %v4630_v2  ;;  %v769_v60 = vadd.f32 %v767_v34, %v743_v42  ;;  %v5657_v20 = vld [vmem:[#allocation110_spill] sm:$0xff] }
 0x675   :  { %v766_v26 = vsel %vm754_vm10, %v5656_v21, 0.0  ;;  %vm780_vm7 = vcmp.eq.f32.partialorder %v5657_v20, %v4630_v2  ;;  %v5670_v34 = vld [vmem:[#allocation30_spill] sm:$0xff]  ;;  %vm1530_vm10 = vcmp.eq.f32.partialorder %v5673_v4, %v4630_v2 }
 0x676   :  { %v3271_v28 = vpack.i.bf16 %v2148_v17, %v2147_v61  ;;  %v5655_v17 = vld [vmem:[#allocation166_spill] sm:$0xff]  ;;  %v795_v32 = vadd.f32 %v793_v3, %v769_v60  ;;  %v792_v50 = vsel %vm780_vm7, %v4643_v7, 0.0  ;;  %vm849_vm8 = vcmp.eq.f32.partialorder %v5670_v34, %v4630_v2  ;;  %v5674_v3 = vld [vmem:[#allocation147_spill] sm:$0xff] }
 0x677   :  { %v1935_v46 = vpop.permute.xlu1 %1934  ;;  %v714_v61 = vsel %vm702_vm11, %v5655_v17, 0.0  ;;  %v5663_v7 = vld [vmem:[#allocation122_spill] sm:$0xff]  ;;  %v858_v60 = vsel %vm848_vm9, %v5674_v3, 0.0 }
 0x678   :  { %3272 = vrot.lane.b32.xlu0 %v3271_v28, %s3357_s1  ;;  %vm1938_vm6 = vcmp.eq.f32.partialorder %v1935_v46, %v4630_v2  ;;  %v742_v28 = vadd.f32 %v740_v35, %v714_v61  ;;  %v5658_v46 = vld [vmem:[#allocation26_spill] sm:$0xff]  ;;  %v815_v43 = vsel %vm805_vm13, %v5663_v7, 0.0  ;;  %v5675_v61 = vld [vmem:[#allocation116_spill] sm:$0xff]  ;;  %vm1893_vm13 = vcmp.eq.f32.partialorder %v5680_v24, %v4630_v2 }
 0x679   :  { %vm804_vm12 = vcmp.eq.f32.partialorder %v5658_v46, %v4630_v2  ;;  %v817_v53 = vadd.f32 %v815_v43, %v795_v32  ;;  %v5672_v42 = vld [vmem:[#allocation126_spill] sm:$0xff]  ;;  %vm1871_vm11 = vcmp.eq.f32.partialorder %v5675_v61, %v4630_v2  ;;  %v5676_v32 = vld [vmem:[#allocation71_spill] sm:$0xff]  ;;  %v5677_v46 = vld [vmem:[#allocation85_spill] sm:$0xff] }
 0x67a   :  { %v768_v40 = vadd.f32 %v766_v26, %v742_v28  ;;  %v814_v59 = vsel %vm804_vm12, %v5660_v23, 0.0  ;;  %v859_v35 = vsel %vm849_vm8, %v5672_v42, 0.0  ;;  %vm871_vm7 = vcmp.eq.f32.partialorder %v5676_v32, %v4630_v2  ;;  %v5690_v42 = vld [vmem:[#allocation42_spill] sm:$0xff] }
 0x67b   :  { %vm870_vm12 = vcmp.eq.f32.partialorder %v5677_v46, %v4630_v2  ;;  %vm1124_vm8 = vcmp.eq.f32.partialorder %v5690_v42, %v4630_v2  ;;  %v5691_v4 = vld [vmem:[#allocation130_spill] sm:$0xff] }
 0x67c   :  { %2458 = vrot.lane.b32.xlu0 %v4895_v54, %s3333_s9  ;;  %v5047_v39 = vpop.permute.xlu1 %1589  ;;  %v794_v45 = vadd.f32 %v792_v50, %v768_v40  ;;  %v880_v23 = vsel %vm870_vm12, %v5679_v18, 0.0  ;;  %v5696_v18 = vld [vmem:[#allocation13_spill] sm:$0xff] }
 0x67e   :  { %v816_v57 = vadd.f32 %v814_v59, %v794_v45 }
 0x680   :  { %2454 = vrot.lane.b32.xlu0 %v4925_v47, %s3333_s9  ;;  %s3358_s9 = smov 8  }
 0x681   :  { %v1945_v37 = vpop.permute.xlu1 %1944 }
 0x682   :  { %v1948_v63 = vsel %vm1938_vm6, %v1945_v37, 0.0  ;;  %vm1849_vm6 = vcmp.eq.f32.partialorder %v5664_v27, %v4630_v2  ;;  %v1534_v37 = vpop.permute.xlu0 %1533 }
 0x683   :  { %v5055_v6 = vadd.f32 %v1948_v63, %v1928_v44  ;;  %v1859_v31 = vsel %vm1849_vm6, %v4807_v51, 0.0  ;;  %v5665_v44 = vld [vmem:[#allocation28_spill] sm:$0xff]  ;;  %v836_v51 = vsel %vm826_vm14, %v5669_v33, 0.0  ;;  %vm1552_vm6 = vcmp.eq.f32.partialorder %v5684_v19, %v4630_v2  ;;  %v5687_v33 = vld [vmem:[#allocation167_spill] sm:$0xff] }
 0x684   :  { %2520 = vrot.lane.b32.xlu0 %v4868_v41, %s3336_s5  ;;  %vm827_vm4 = vcmp.eq.f32.partialorder %v5665_v44, %v4630_v2  ;;  %v838_v62 = vadd.f32 %v836_v51, %v816_v57  ;;  %v5682_v44 = vld [vmem:[#allocation9_spill] sm:$0xff] }
 0x685   :  { %v5064_v55 = vpop.permute.xlu1 %1952  ;;  %v837_v5 = vsel %vm827_vm4, %v5667_v11, 0.0  ;;  %vm1102_vm4 = vcmp.eq.f32.partialorder %v5685_v52, %v4630_v2 }
 0x686   :  { %v839_v58 = vadd.f32 %v837_v5, %v817_v53  ;;  %v1578_v17 = vpop.permute.xlu0 %1577  ;;  %v860_v26 = vadd.f32 %v858_v60, %v838_v62  ;;  %v5693_v60 = vld [vmem:[#allocation109_spill] sm:$0xff]  ;;  %vm1959_vm12 = vcmp.eq.f32.partialorder %v5064_v55, %v4630_v2 }
 0x687   :  { %vm1574_vm9 = vcmp.eq.f32.partialorder %v5693_v60, %v4630_v2 }
 0x688   :  { %2518 = vrot.lane.b32.xlu0 %v4895_v54, %s3336_s5  ;;  %v861_v56 = vadd.f32 %v859_v35, %v839_v58 }
 0x689   :  { %v5082_v49 = vpop.permute.xlu1 %2329 }
 0x68c   :  { %2516 = vrot.lane.b32.xlu0 %v4875_v0, %s3336_s5 }
 0x68d   :  { %v1809_v22 = vpop.permute.xlu1 %1808 }
 0x68e   :  { %v1815_v8 = vsel %vm1805_vm2, %v1809_v22, 0.0  ;;  %v882_v22 = vadd.f32 %v880_v23, %v860_v26  ;;  %v5695_v26 = vld [vmem:[#allocation136_spill] sm:$0xff] }
 0x68f   :  { %v1839_v14 = vadd.f32 %v1837_v36, %v1815_v8 }
 0x690   :  { %2514 = vrot.lane.b32.xlu0 %v4925_v47, %s3336_s5 }
 0x691   :  { %v1861_v63 = vadd.f32 %v1859_v31, %v1839_v14  ;;  %v5681_v31 = vld [vmem:[#allocation8_spill] sm:$0xff] }
 0x692   :  { %v1490_v15 = vpop.permute.xlu1 %1489 }
 0x693   :  { %v1496_v16 = vsel %vm1486_vm0, %v1490_v15, 0.0  ;;  %v5686_v15 = vld [vmem:[#allocation171_spill] sm:$0xff]  ;;  %vm1080_vm0 = vcmp.eq.f32.partialorder %v5689_v10, %v4630_v2 }
 0x694   :  { %v1498_v25 = vadd.f32 %v1496_v16, %v4791_v13  ;;  %2512 = vrot.lane.b32.xlu0 %v4884_v48, %s3336_s5  ;;  %v1540_v13 = vsel %vm1530_vm10, %v1534_v37, 0.0  ;;  %v5683_v37 = vld [vmem:[#allocation108_spill] sm:$0xff]  ;;  %vm1937_vm14 = vcmp.eq.f32.partialorder %v5686_v15, %v4630_v2  ;;  %s3359_s5 = smov 24  }
 0x695   :  { %vm1915_vm2 = vcmp.eq.f32.partialorder %v5683_v37, %v4630_v2  ;;  %v5688_v16 = vld [vmem:[#allocation132_spill] sm:$0xff] }
 0x696   :  { %v1520_v12 = vadd.f32 %v4828_v9, %v1498_v25  ;;  %v5678_v9 = vld [vmem:[#allocation128_spill] sm:$0xff]  ;;  %v1112_v62 = vsel %vm1102_vm4, %v5688_v16, 0.0 }
 0x697   :  { %v1875_v21 = vpop.permute.xlu1 %1874  ;;  %v881_v40 = vsel %vm871_vm7, %v5678_v9, 0.0  ;;  %vm1168_vm7 = vcmp.eq.f32.partialorder %v5696_v18, %v4630_v2  ;;  %v5706_v16 = vld [vmem:[#allocation172_spill] sm:$0xff] }
 0x698   :  { %v1881_v20 = vsel %vm1871_vm11, %v1875_v21, 0.0  ;;  %v1542_v28 = vadd.f32 %v1540_v13, %v1520_v12  ;;  %v883_v59 = vadd.f32 %v881_v40, %v861_v56  ;;  %v1090_v12 = vsel %vm1080_vm0, %v5691_v4, 0.0  ;;  %v5692_v56 = vld [vmem:[#allocation134_spill] sm:$0xff] }
 0x699   :  { %v1883_v50 = vadd.f32 %v1881_v20, %v1861_v63  ;;  %v1134_v3 = vsel %vm1124_vm8, %v5692_v56, 0.0  ;;  %v5694_v13 = vld [vmem:[#allocation78_spill] sm:$0xff]  ;;  %v1114_v61 = vadd.f32 %v1112_v62, %v1090_v12  ;;  %v1584_v21 = vsel %vm1574_vm9, %v1578_v17, 0.0 }
 0x69a   :  { %vm1146_vm10 = vcmp.eq.f32.partialorder %v5694_v13, %v4630_v2  ;;  %vm1596_vm11 = vcmp.eq.f32.partialorder %v5047_v39, %v4630_v2  ;;  %v5698_v39 = vld [vmem:[#allocation27_spill] sm:$0xff]  ;;  %vm1960_vm4 = vcmp.eq.f32.partialorder %v5706_v16, %v4630_v2 }
 0x69b   :  { %v3257_v38 = vpop.permute.xlu0 %3256  ;;  %v1156_v20 = vsel %vm1146_vm10, %v5695_v26, 0.0 }
 0x69c   :  { %v3259_v7 = vunpack.i.h.bf16 %v3257_v38  ;;  %v3258_v43 = vunpack.i.l.bf16 %v3257_v38  ;;  %v1897_v45 = vpop.permute.xlu1 %1896 }
 0x69d   :  { %v1903_v36 = vsel %vm1893_vm13, %v1897_v45, 0.0  ;;  %vm1190_vm13 = vcmp.eq.f32.partialorder %v5698_v39, %v4630_v2 }
 0x69e   :  { %v1069_v8 = vsel %vm310_vm1, %v883_v59, %v3259_v7  ;;  %v1068_v53 = vsel %vm310_vm1, %v882_v22, %v3258_v43  ;;  %v1905_v27 = vadd.f32 %v1903_v36, %v1883_v50  ;;  %v1136_v50 = vadd.f32 %v1134_v3, %v1114_v61  ;;  %v5697_v59 = vld [vmem:[#allocation131_spill] sm:$0xff]  ;;  %v5699_v43 = vld [vmem:[#allocation133_spill] sm:$0xff] }
 0x69f   :  { %v5137_v14 = vpack.c.bf16 %v1069_v8, %v1068_v53  ;;  %v1178_v17 = vsel %vm1168_vm7, %v5697_v59, 0.0  ;;  %v1200_v45 = vsel %vm1190_vm13, %v5699_v43, 0.0  ;;  %v5700_v8 = vld [vmem:[#allocation29_spill] sm:$0xff]  ;;  %v5701_v53 = vld [vmem:[#allocation135_spill] sm:$0xff] }
 0x6a0   :  { %v1158_v40 = vadd.f32 %v1156_v20, %v1136_v50 }
 0x6a1   :  { %2954 = vmatmul.mubr.msk.bf16.vlgmr.msra.gmra.mxu1 %vm2160_vm15, %v5137_v14  ;;  %v1556_v57 = vpop.permute.xlu1 %1555  ;;  %v2401_v20 = vrot.slane %v5137_v14, 4 }
 0x6a2   :  { %2972 = vmatpush3.bf16.msra.mxu1 %v5681_v31  ;;  %2981 = vmatprep.mubr.msk.bf16.mxu1 %vm3356_vm3, %v5554_v30  ;;  %v1562_v5 = vsel %vm1552_vm6, %v1556_v57, 0.0  ;;  %v1180_v24 = vadd.f32 %v1178_v17, %v1158_v40  ;;  %v5702_v31 = vld [vmem:[#allocation70_spill] sm:$0xff] }
 0x6a3   :  { %2973 = vmatprep.subr.bf16.mxu1 %v5554_v30  ;;  %v1564_v25 = vadd.f32 %v1562_v5, %v1542_v28  ;;  %vm1234_vm6 = vcmp.eq.f32.partialorder %v5702_v31, %v4630_v2 }
 0x6a4   :  { %v1202_v36 = vadd.f32 %v1200_v45, %v1180_v24 }
 0x6a5   :  { %v1586_v28 = vadd.f32 %v1584_v21, %v1564_v25 }
 0x6a6   :  { %2974 = vmatpush3.bf16.msra.mxu1 %v5682_v44  ;;  %v1919_v63 = vpop.permute.xlu1 %1918  ;;  %v5703_v44 = vld [vmem:[#allocation137_spill] sm:$0xff] }
 0x6a7   :  { %v1925_v11 = vsel %vm1915_vm2, %v1919_v63, 0.0  ;;  %2975 = vmatprep.subr.bf16.mxu1 %v5554_v30  ;;  %vm1212_vm2 = vcmp.eq.f32.partialorder %v5700_v8, %v4630_v2  ;;  %v1244_v37 = vsel %vm1234_vm6, %v5703_v44, 0.0 }
 0x6a8   :  { %v1927_v58 = vadd.f32 %v1925_v11, %v1905_v27  ;;  %v1222_v27 = vsel %vm1212_vm2, %v5701_v53, 0.0 }
 0x6a9   :  { %v1224_v57 = vadd.f32 %v1222_v27, %v1202_v36 }
 0x6aa   :  { %2976 = vmatpush3.bf16.msra.mxu1 %v5687_v33  ;;  %v1941_v51 = vpop.permute.xlu1 %1940  ;;  %v5704_v33 = vld [vmem:[#allocation10_spill] sm:$0xff] }
 0x6ab   :  { %v1947_v34 = vsel %vm1937_vm14, %v1941_v51, 0.0  ;;  %2977 = vmatprep.subr.bf16.mxu1 %v5554_v30  ;;  %v1246_v19 = vadd.f32 %v1244_v37, %v1224_v57  ;;  %v5705_v51 = vld [vmem:[#allocation7_spill] sm:$0xff] }
 0x6ac   :  { %v1949_v35 = vadd.f32 %v1947_v34, %v1927_v58 }
 0x6af   :  { %v1600_v32 = vpop.permute.xlu1 %1599 }
 0x6b0   :  { %v1606_v46 = vsel %vm1596_vm11, %v1600_v32, 0.0 }
 0x6b1   :  { %v1608_v9 = vadd.f32 %v1606_v46, %v1586_v28 }
 0x6b4   :  { %v1963_v23 = vpop.permute.xlu1 %1962 }
 0x6b5   :  { %v1969_v38 = vsel %vm1959_vm12, %v1963_v23, 0.0 }
 0x6b6   :  { %v1971_v22 = vadd.f32 %v1969_v38, %v1949_v35 }
 0x6b8   :  { %v2270_v7 = vpop.permute.xlu1 %2269 }
 0x6b9   :  { %2978 = vmatpush3.bf16.msra.mxu1 %v2270_v7 }
 0x6ba   :  { %2979 = vmatprep.subr.bf16.mxu1 %v5554_v30 }
 0x6bc   :  { %v2268_v55 = vpop.permute.xlu1 %2267 }
 0x6bd   :  { %2980 = vmatpush3.bf16.msra.mxu1 %v2268_v55 }
 0x6be   :  { %2999 = vmatprep.subr.bf16.mxu1 %v5554_v30 }
 0x6c0   :  { %v2326_v10 = vpop.permute.xlu1 %2325 }
 0x6c1   :  { %v3262_v63 = vpop.permute.xlu0 %3261 }
 0x6c2   :  { %v3264_v11 = vunpack.i.h.bf16 %v3262_v63  ;;  %v3263_v5 = vunpack.i.l.bf16 %v3262_v63 }
 0x6c4   :  { %v1432_v52 = vsel %vm310_vm1, %v1246_v19, %v3264_v11  ;;  %v1431_v15 = vsel %vm310_vm1, %v4824_v29, %v3263_v5  ;;  %v2648_v11 = vld [vmem:[%s5292_s6 + $0x18] sm:$0xff]  ;;  %v2647_v5 = vld [vmem:[%s5292_s6 + $0x10] sm:$0xff] }
 0x6c5   :  { %v5190_v58 = vpack.c.bf16 %v1432_v52, %v1431_v15  ;;  %v2646_v52 = vld [vmem:[%s5292_s6 + $0x8] sm:$0xff] }
 0x6c7   :  { %2968 = vmatmul.mubr.msk.bf16.vlgmr.msra.gmra.mxu0 %vm2160_vm15, %v5190_v58  ;;  %v2446_v14 = vrot.slane %v5190_v58, 4  ;;  %v2645_v58 = vld [vmem:[%s5292_s6] sm:$0xff] }
 0x6c8   :  { %2986 = vmatpush3.bf16.msra.mxu0 %v5704_v33  ;;  %2995 = vmatprep.mubr.msk.bf16.mxu0 %vm3356_vm3, %v5554_v30 }
 0x6c9   :  { %2987 = vmatprep.subr.bf16.mxu0 %v5554_v30 }
 0x6cc   :  { %2988 = vmatpush3.bf16.msra.mxu0 %v5705_v51 }
 0x6cd   :  { %2989 = vmatprep.subr.bf16.mxu0 %v5554_v30 }
 0x6ce   :  { %v1967_v29 = vpop.permute.xlu0 %1966 }
 0x6cf   :  { %v1970_v62 = vsel %vm1960_vm4, %v1967_v29, 0.0 }
 0x6d0   :  { %v1972_v25 = vadd.f32 %v1970_v62, %v5055_v6  ;;  %2990 = vmatpush3.bf16.msra.mxu0 %v5082_v49  ;;  %v2461_v49 = vpop.permute.xlu1 %2460 }
 0x6d1   :  { %2991 = vmatprep.subr.bf16.mxu0 %v5554_v30 }
 0x6d2   :  { %v2328_v34 = vpop.permute.xlu0 %2327 }
 0x6d4   :  { %2992 = vmatpush3.bf16.msra.mxu0 %v2328_v34  ;;  %v2457_v21 = vpop.permute.xlu1 %2456 }
 0x6d5   :  { %2993 = vmatprep.subr.bf16.mxu0 %v5554_v30 }
 0x6d8   :  { %2994 = vmatpush3.bf16.msra.mxu0 %v2326_v10  ;;  %v2453_v26 = vpop.permute.xlu1 %2452 }
 0x6d9   :  { %3013 = vmatprep.subr.bf16.mxu0 %v5554_v30 }
 0x6df   :  { %v3268_v42 = vpop.permute.xlu0 %3267 }
 0x6e0   :  { %v3270_v35 = vunpack.i.h.bf16 %v3268_v42  ;;  %v3269_v4 = vunpack.i.l.bf16 %v3268_v42 }
 0x6e2   :  { %v1795_v2 = vsel %vm310_vm1, %v4789_v1, %v3270_v35  ;;  %v1794_v6 = vsel %vm310_vm1, %v1608_v9, %v3269_v4 }
 0x6e3   :  { %v5210_v12 = vpack.c.bf16 %v1795_v2, %v1794_v6 }
 0x6e5   :  { %2982 = vmatmul.mubr.msk.bf16.vlgmr.msra.gmra.mxu1 %vm2160_vm15, %v5210_v12  ;;  %v2511_v40 = vrot.slane %v5210_v12, 4 }
 0x6e6   :  { %3000 = vmatpush3.bf16.msra.mxu1 %v4868_v41  ;;  %3009 = vmatprep.mubr.msk.bf16.mxu1 %vm3356_vm3, %v5554_v30 }
 0x6e7   :  { %3001 = vmatprep.subr.bf16.mxu1 %v5554_v30 }
 0x6ea   :  { %3002 = vmatpush3.bf16.msra.mxu1 %v4895_v54  ;;  %v3273_v56 = vpop.permute.xlu0 %3272 }
 0x6eb   :  { %v3275_v3 = vunpack.i.h.bf16 %v3273_v56  ;;  %v3274_v1 = vunpack.i.l.bf16 %v3273_v56  ;;  %3003 = vmatprep.subr.bf16.mxu1 %v5554_v30 }
 0x6ed   :  { %v2157_v60 = vsel %vm310_vm1, %v1971_v22, %v3274_v1  ;;  %v2158_v13 = vsel %vm310_vm1, %v1972_v25, %v3275_v3  ;;  %vm2396_vm1 = vcmask 130048  }
 0x6ee   :  { %v2159_v61 = vpack.c.bf16 %v2158_v13, %v2157_v60  ;;  %3004 = vmatpush3.bf16.msra.mxu1 %v4875_v0  ;;  %v2459_v41 = vpop.permute.xlu0 %2458 }
 0x6ef   :  { %3005 = vmatprep.subr.bf16.mxu1 %v5554_v30 }
 0x6f0   :  { %2996 = vmatmul.mubr.msk.bf16.vlgmr.msra.gmra.mxu0 %vm2160_vm15, %v2159_v61  ;;  %v2571_v59 = vrot.slane %v2159_v61, 4 }
 0x6f1   :  { %3014 = vmatpush3.bf16.msra.mxu0 %v2461_v49  ;;  %3023 = vmatprep.mubr.msk.bf16.mxu0 %vm3356_vm3, %v5554_v30 }
 0x6f2   :  { %3006 = vmatpush3.bf16.msra.mxu1 %v4925_v47  ;;  %v2455_v54 = vpop.permute.xlu0 %2454  ;;  %3015 = vmatprep.subr.bf16.mxu0 %v5554_v30 }
 0x6f3   :  { %3007 = vmatprep.subr.bf16.mxu1 %v5554_v30 }
 0x6f5   :  { %3016 = vmatpush3.bf16.msra.mxu0 %v2459_v41 }
 0x6f6   :  { %3008 = vmatpush3.bf16.msra.mxu1 %v4884_v48  ;;  %v2521_v0 = vpop.permute.xlu0 %2520  ;;  %3017 = vmatprep.subr.bf16.mxu0 %v5554_v30  ;;  %v2581_v48 = vpop.permute.xlu1 %2580 }
 0x6f7   :  { %3027 = vmatprep.subr.bf16.mxu1 %v5554_v30 }
 0x6f9   :  { %3010 = vmatmul.mubr.msk.bf16.vlgmr.msra.gmra.mxu1 %vm2160_vm15, %v2401_v20  ;;  %3018 = vmatpush3.bf16.msra.mxu0 %v2457_v21 }
 0x6fa   :  { %3028 = vmatpush3.bf16.msra.mxu1 %v2521_v0  ;;  %v2519_v47 = vpop.permute.xlu0 %2518  ;;  %3019 = vmatprep.subr.bf16.mxu0 %v5554_v30  ;;  %v2579_v32 = vpop.permute.xlu1 %2578 }
 0x6fb   :  { %3029 = vmatprep.subr.bf16.mxu1 %v5554_v30  ;;  %3037 = vmatprep.mubr.msk.bf16.mxu1 %vm3356_vm3, %v5554_v30 }
 0x6fd   :  { %3020 = vmatpush3.bf16.msra.mxu0 %v2455_v54  ;;  %v2792_v54 = vld [vmem:[%s5293_s7] ss:$0 sm:$0xff] }
 0x6fe   :  { %3030 = vmatpush3.bf16.msra.mxu1 %v2519_v47  ;;  %v2517_v28 = vpop.permute.xlu0 %2516  ;;  %3021 = vmatprep.subr.bf16.mxu0 %v5554_v30  ;;  %v2577_v46 = vpop.permute.xlu1 %2576 }
 0x6ff   :  { %3031 = vmatprep.subr.bf16.mxu1 %v5554_v30 }
 0x701   :  { %3022 = vmatpush3.bf16.msra.mxu0 %v2453_v26 }
 0x702   :  { %3032 = vmatpush3.bf16.msra.mxu1 %v2517_v28  ;;  %3041 = vmatprep.subr.bf16.mxu0 %v5554_v30  ;;  %v2515_v50 = vpop.permute.xlu0 %2514  ;;  %v2575_v18 = vpop.permute.xlu1 %2574 }
 0x703   :  { %3033 = vmatprep.subr.bf16.mxu1 %v5554_v30 }
 0x704   :  { %3024 = vmatmul.mubr.msk.bf16.vlgmr.msra.gmra.mxu0 %vm2160_vm15, %v2446_v14 }
 0x705   :  { %3042 = vmatpush3.bf16.msra.mxu0 %v2581_v48  ;;  %3051 = vmatprep.mubr.msk.bf16.mxu0 %vm3356_vm3, %v5554_v30  ;;  %vm2398_vm3 = vcmask 195584  }
 0x706   :  { %3034 = vmatpush3.bf16.msra.mxu1 %v2515_v50  ;;  %3043 = vmatprep.subr.bf16.mxu0 %v5554_v30  ;;  %v2513_v9 = vpop.permute.xlu0 %2512  ;;  %v2573_v23 = vpop.permute.xlu1 %2572 }
 0x707   :  { %3035 = vmatprep.subr.bf16.mxu1 %v5554_v30 }
 0x709   :  { %3044 = vmatpush3.bf16.msra.mxu0 %v2579_v32 }
 0x70a   :  { %3036 = vmatpush3.bf16.msra.mxu1 %v2513_v9  ;;  %3045 = vmatprep.subr.bf16.mxu0 %v5554_v30 }
 0x70b   :  { %3055 = vmatprep.subr.mxu1 %v2648_v11 }
 0x70d   :  { %3038 = vmatmul.mubr.msk.bf16.vlgmr.msra.gmra.mxu1 %vm2160_vm15, %v2511_v40  ;;  %3046 = vmatpush3.bf16.msra.mxu0 %v2577_v46 }
 0x70e   :  { %3047 = vmatprep.subr.bf16.mxu0 %v5554_v30  ;;  %3056 = vmatpush3.msra.mxu1 %v2648_v11 }
 0x70f   :  { %3057 = vmatprep.subr.mxu1 %v2647_v5 }
 0x710   :  { %3058 = vmatpush3.msra.mxu1 %v2647_v5 }
 0x711   :  { %3048 = vmatpush3.bf16.msra.mxu0 %v2575_v18  ;;  %3059 = vmatprep.subr.mxu1 %v2646_v52 }
 0x712   :  { %3049 = vmatprep.subr.bf16.mxu0 %v5554_v30  ;;  %3060 = vmatpush3.msra.mxu1 %v2646_v52 }
 0x713   :  { %3061 = vmatprep.subr.mxu1 %v2645_v58 }
 0x714   :  { %3062 = vmatpush3.msra.mxu1 %v2645_v58 }
 0x715   :  { %3050 = vmatpush3.bf16.msra.mxu0 %v2573_v23 }
 0x718   :  { %3052 = vmatmul.mubr.msk.bf16.vlgmr.msra.gmra.mxu0 %vm2160_vm15, %v2571_v59  ;;  %vm2656_vm15 = vcmask 261120  }
 0x761   :  { %v2198_v17 = vpop.f32.mrf.mxu1 }
 0x763   :  { %v2955_v38 = vpop.f32.mrf.mxu1 }
 0x765   :  { %v2201_v24 = vpop.f32.mrf.mxu1 }
 0x767   :  { %v2956_v22 = vpop.f32.mrf.mxu1 }
 0x787   :  { %v2261_v39 = vpop.f32.mrf.mxu0 }
 0x788   :  { %2384 = vrot.lane.b32.xlu0 %v2261_v39, %s3358_s9 }
 0x789   :  { %v2969_v7 = vpop.f32.mrf.mxu0 }
 0x78b   :  { %v2264_v43 = vpop.f32.mrf.mxu0 }
 0x78d   :  { %v2970_v45 = vpop.f32.mrf.mxu0 }
 0x7a5   :  { %v2319_v36 = vpop.f32.mrf.mxu1 }
 0x7a6   :  { %2388 = vrot.lane.b32.xlu1 %v2319_v36, %s3331_s17 }
 0x7a7   :  { %v2983_v30 = vpop.f32.mrf.mxu1 }
 0x7a9   :  { %v2322_v8 = vpop.f32.mrf.mxu1 }
 0x7ab   :  { %v2984_v55 = vpop.f32.mrf.mxu1 }
 0x7b0   :  { %v2377_v53 = vpop.f32.mrf.mxu0 }
 0x7b1   :  { %2392 = vrot.lane.b32.xlu1 %v2377_v53, %s3359_s5 }
 0x7b2   :  { %v2997_v27 = vpop.f32.mrf.mxu0 }
 0x7b4   :  { %v2380_v57 = vpop.f32.mrf.mxu0 }
 0x7b6   :  { %v2998_v31 = vpop.f32.mrf.mxu0 }
 0x7b9   :  { %v2439_v44 = vpop.f32.mrf.mxu1 }
 0x7bb   :  { %v3011_v37 = vpop.f32.mrf.mxu1 }
 0x7bd   :  { %v2442_v63 = vpop.f32.mrf.mxu1 }
 0x7bf   :  { %v3012_v19 = vpop.f32.mrf.mxu1 }
 0x7c4   :  { %v2504_v15 = vpop.f32.mrf.mxu0 }
 0x7c5   :  { %2631 = vrot.lane.b32.xlu0 %v2504_v15, %s3358_s9 }
 0x7c6   :  { %v3025_v33 = vpop.f32.mrf.mxu0 }
 0x7c8   :  { %v2507_v51 = vpop.f32.mrf.mxu0 }
 0x7ca   :  { %v3026_v16 = vpop.f32.mrf.mxu0 }
 0x7cd   :  { %v2564_v29 = vpop.f32.mrf.mxu1 }
 0x7ce   :  { %2635 = vrot.lane.b32.xlu0 %v2564_v29, %s3331_s17 }
 0x7cf   :  { %v3039_v62 = vpop.f32.mrf.mxu1 }
 0x7d1   :  { %v2567_v25 = vpop.f32.mrf.mxu1 }
 0x7d3   :  { %v3040_v34 = vpop.f32.mrf.mxu1 }
 0x7d8   :  { %v2624_v10 = vpop.f32.mrf.mxu0 }
 0x7d9   :  { %2639 = vrot.lane.b32.xlu1 %v2624_v10, %s3359_s5 }
 0x7da   :  { %v3053_v42 = vpop.f32.mrf.mxu0 }
 0x7dc   :  { %v2627_v35 = vpop.f32.mrf.mxu0 }
 0x7de   :  { %v3054_v4 = vpop.f32.mrf.mxu0 }
 0x7fa   :  { %v2385_v2 = vpop.permute.xlu0 %2384 }
 0x7fb   :  { %v2395_v12 = vsel %vm551_vm5, %v2198_v17, %v2385_v2 }
 0x818   :  { %v2389_v6 = vpop.permute.xlu1 %2388 }
 0x819   :  { %v2397_v49 = vsel %vm2396_vm1, %v2395_v12, %v2389_v6 }
 0x823   :  { %v2393_v56 = vpop.permute.xlu1 %2392 }
 0x824   :  { %v2399_v3 = vsel %vm2398_vm3, %v2397_v49, %v2393_v56 }
 0x825   :  { %3063 = vmatprep.mubr.msk.f32.mxu1 %vm2656_vm15, %v2399_v3 }
 0x837   :  { %v2632_v1 = vpop.permute.xlu0 %2631 }
 0x838   :  { %v2642_v13 = vsel %vm551_vm5, %v2439_v44, %v2632_v1 }
 0x840   :  { %v2636_v60 = vpop.permute.xlu0 %2635 }
 0x841   :  { %v2643_v61 = vsel %vm2396_vm1, %v2642_v13, %v2636_v60 }
 0x84b   :  { %v2640_v41 = vpop.permute.xlu1 %2639 }
 0x84c   :  { %v2644_v21 = vsel %vm2398_vm3, %v2643_v61, %v2640_v41 }
 0x84d   :  { %3064 = vmatmul.mubr.msk.f32.vlgmr.msra.gmra.mxu1 %vm2656_vm15, %v2644_v21 }
 0x90d   :  { %v3065_v26 = vpop.f32.mrf.mxu1 }
 0x90e   :  { %v2735_v0 = vadd.f32 %v3065_v26, %v2792_v54 }
 0x90f   :  { %v2729_v20 = vpop.f32.mrf.mxu1 }
 0x910   :  { %2739 = vst.msk [vmem:[#allocation2 + $0x8] sm:$0xff] %vm2656_vm15, %v2735_v0  ;;  %v2730_v47 = vadd.f32 %v2792_v54, %v2729_v20 }
 0x912   :  { %2738 = vst.msk [vmem:[#allocation2] sm:$0xff] %vm2656_vm15, %v2730_v47 }
 0x913   :  { %3320 = shalt.err (!%p3317_p4)
}
 0x914   :  { %s3361_s24 = smov 128  }
 0x915   :  { %2751 = dma.vmem_to_hbm [thread:$0]  %s2746_s22, 256, %s5294_s8, [#allocation3], %s3361_s24, %s3361_s24, %s3358_s9  }
 0x916   :  { %3329 = dma.done.wait [#allocation3], 256  }
 0x917   :  { %3330 = vsyncadd [#allocation3], 4294967040 }
 0x918   :  { %2755 = vsyncpa [#allocation3], 1 }

</bundles_post_ra>
